<compile_context>
chip_gen: v5e
topology: v5e:2x2
jax: 0.10.0
libtpu: 0.0.40
codegen_flags: <defaults>
</compile_context>

<pallas_src>
import functools

import jax
import jax.numpy as jnp
from jax import lax
from jax.experimental import pallas as pl
from jax.experimental.pallas import tpu as pltpu

BN_EPS = 1e-5
# Left zero margin in the W (sublane) axis of the padded scratch; >=1 is needed
# for the conv halo, 8 keeps the interior store sublane-aligned.
_LPAD = 8
_VMEM_LIMIT = 32 * 1024 * 1024


# -----------------------------------------------------------------------------
# Conv stage kernel:
#   [optional fused BN+ReLU of the previous stage]
#   -> 3x3 conv (padding=1) as a single im2col matmul (K = 9*Cin, bf16 operands)
#   -> + bias
#   -> pre-BN output + global per-channel sum / sum-of-squares (BN statistics)
# Grid: one step per batch element ("arbitrary": stats accumulate across steps).
# -----------------------------------------------------------------------------
def _conv_stage_kernel(xin_ref, scale_ref, shift_ref, w_ref, bias_ref,
                       out_ref, ssum_ref, ssq_ref, pad_sc,
                       *, H, W, apply_affine_relu, compute_dtype):
    b = pl.program_id(0)
    Cin = xin_ref.shape[-1]

    @pl.when(b == 0)
    def _init():
        # Zero the padded scratch once; only its zero border is reused afterwards.
        pad_sc[...] = jnp.zeros_like(pad_sc)
        ssum_ref[...] = jnp.zeros_like(ssum_ref)
        ssq_ref[...] = jnp.zeros_like(ssq_ref)

    x = xin_ref[...]                                              # (H*W, Cin) f32
    if apply_affine_relu:
        # Fused BatchNorm (folded to scale/shift) + ReLU of the previous stage.
        x = jnp.maximum(x * scale_ref[...] + shift_ref[...], 0.0)

    # Place the image inside the zero-bordered scratch. The interior starts at
    # sublane-aligned column _LPAD; columns _LPAD-1 and _LPAD+W stay zero.
    pad_sc[1:1 + H, _LPAD:_LPAD + W, :] = x.reshape(H, W, Cin)
    xpad = pad_sc[...]

    # im2col: 9 shifted taps concatenated on the channel (lane) axis.
    cols = []
    for dy in range(3):
        for dx in range(3):
            c0 = _LPAD - 1 + dx
            cols.append(xpad[dy:dy + H, c0:c0 + W, :].reshape(H * W, Cin))
    patches = jnp.concatenate(cols, axis=-1).astype(compute_dtype)  # (H*W, 9*Cin)

    # Single MXU matmul, f32 accumulation.
    acc = jnp.dot(patches, w_ref[...], preferred_element_type=jnp.float32)
    acc = acc + bias_ref[...]                                       # (H*W, Cout) f32

    out_ref[...] = acc
    # Global (all-grid-steps) BatchNorm statistics.
    ssum_ref[...] += jnp.sum(acc, axis=0, keepdims=True)
    ssq_ref[...] += jnp.sum(acc * acc, axis=0, keepdims=True)


def _conv_stage(xin, scale, shift, w_flat, bias, *, B, H, W, Cin, Cout,
                apply_affine_relu, compute_dtype):
    M = H * W
    assert M % 8 == 0, "H*W must be a multiple of 8 for the (8,128) tiling rule"
    kernel = functools.partial(
        _conv_stage_kernel, H=H, W=W,
        apply_affine_relu=apply_affine_relu, compute_dtype=compute_dtype)
    flops = 2 * B * M * (9 * Cin) * Cout
    bytes_accessed = (B * M * Cin * 4 + 9 * Cin * Cout * 2
                      + B * M * Cout * 4 + 4 * (Cin + Cout) * 4)
    return pl.pallas_call(
        kernel,
        out_shape=(
            jax.ShapeDtypeStruct((B * M, Cout), jnp.float32),   # pre-BN conv output
            jax.ShapeDtypeStruct((1, Cout), jnp.float32),       # sum
            jax.ShapeDtypeStruct((1, Cout), jnp.float32),       # sum of squares
        ),
        grid=(B,),
        in_specs=[
            pl.BlockSpec((M, Cin), lambda b: (b, 0)),
            pl.BlockSpec((1, Cin), lambda b: (0, 0)),
            pl.BlockSpec((1, Cin), lambda b: (0, 0)),
            pl.BlockSpec((9 * Cin, Cout), lambda b: (0, 0)),
            pl.BlockSpec((1, Cout), lambda b: (0, 0)),
        ],
        out_specs=(
            pl.BlockSpec((M, Cout), lambda b: (b, 0)),
            pl.BlockSpec((1, Cout), lambda b: (0, 0)),
            pl.BlockSpec((1, Cout), lambda b: (0, 0)),
        ),
        scratch_shapes=[pltpu.VMEM((H + 2, W + _LPAD + 1, Cin), jnp.float32)],
        compiler_params=pltpu.CompilerParams(
            dimension_semantics=("arbitrary",),   # stats accumulate across steps
            vmem_limit_bytes=_VMEM_LIMIT),
        cost_estimate=pl.CostEstimate(
            flops=flops, transcendentals=0, bytes_accessed=bytes_accessed),
    )(xin, scale, shift, w_flat, bias)


# -----------------------------------------------------------------------------
# Final BatchNorm + ReLU: lane-dense elementwise kernel over a (B*H, W*C) slab.
# -----------------------------------------------------------------------------
def _affine_relu_kernel(a_ref, scale_ref, shift_ref, out_ref):
    out_ref[...] = jnp.maximum(a_ref[...] * scale_ref[...] + shift_ref[...], 0.0)


def _pick_row_block(rows, lane_width, target_bytes=1 << 21):
    if rows % 8 != 0:
        return rows
    cap = max(8, min(rows, (target_bytes // (lane_width * 4)) // 8 * 8))
    tr = cap
    while tr > 8 and rows % tr != 0:
        tr -= 8
    return tr if rows % tr == 0 else rows


def _affine_relu(a2d, scale, shift, *, B, H, W, C):
    rows, lane = B * H, W * C
    slab = a2d.reshape(rows, lane)                    # free, contiguous reshape
    scale_t = jnp.tile(scale.reshape(1, C), (1, W))   # per-lane (pixel, channel)
    shift_t = jnp.tile(shift.reshape(1, C), (1, W))
    tr = _pick_row_block(rows, lane)
    return pl.pallas_call(
        _affine_relu_kernel,
        out_shape=jax.ShapeDtypeStruct((rows, lane), jnp.float32),
        grid=(rows // tr,),
        in_specs=[
            pl.BlockSpec((tr, lane), lambda i: (i, 0)),
            pl.BlockSpec((1, lane), lambda i: (0, 0)),
            pl.BlockSpec((1, lane), lambda i: (0, 0)),
        ],
        out_specs=pl.BlockSpec((tr, lane), lambda i: (i, 0)),
        compiler_params=pltpu.CompilerParams(
            dimension_semantics=("parallel",),        # megacore-shardable
            vmem_limit_bytes=_VMEM_LIMIT),
        cost_estimate=pl.CostEstimate(
            flops=3 * rows * lane, transcendentals=0,
            bytes_accessed=2 * rows * lane * 4 + 2 * lane * 4),
    )(slab, scale_t, shift_t)


# -----------------------------------------------------------------------------
# Parameters, BN folding, forward
# -----------------------------------------------------------------------------
def _oihw_to_im2col(w_oihw):
    """(Cout, Cin, 3, 3) -> (9*Cin, Cout), row order = (dy, dx, cin)."""
    cout = w_oihw.shape[0]
    return jnp.transpose(w_oihw, (2, 3, 1, 0)).reshape(-1, cout)


def _bn_affine(ssum, ssq, gamma, beta, n, use_bn):
    """Fold training-mode BatchNorm2d (biased var, eps=1e-5) into scale/shift."""
    if not use_bn:
        return jnp.ones_like(gamma), jnp.zeros_like(beta)
    mean = ssum / float(n)
    var = jnp.maximum(ssq / float(n) - mean * mean, 0.0)
    scale = gamma * jax.lax.rsqrt(var + BN_EPS)
    shift = beta - mean * scale
    return scale, shift


def init_upblock_params(key, input_channel, output_channel):
    ks = jax.random.split(key, 8)

    def n(k, shape, s=0.1):
        return s * jax.random.normal(k, shape, jnp.float32)

    return {
        "w1": n(ks[0], (output_channel, input_channel, 3, 3)),
        "b1": n(ks[1], (output_channel,)),
        "g1": 1.0 + n(ks[2], (output_channel,)),
        "be1": n(ks[3], (output_channel,)),
        "w2": n(ks[4], (output_channel, output_channel, 3, 3)),
        "b2": n(ks[5], (output_channel,)),
        "g2": 1.0 + n(ks[6], (output_channel,)),
        "be2": n(ks[7], (output_channel,)),
    }


def upblock_forward(x_nchw, params, *, batch_normalization=True, downsample=False,
                    compute_dtype=jnp.bfloat16):
    B, Cin, H, W = x_nchw.shape
    C1 = params["w1"].shape[0]
    C2 = params["w2"].shape[0]
    n = B * H * W

    # NCHW -> NHWC -> (B*H*W, Cin) matmul layout (free, contiguous reshape).
    x2d = jnp.transpose(x_nchw, (0, 2, 3, 1)).reshape(n, Cin).astype(jnp.float32)

    w1 = _oihw_to_im2col(params["w1"]).astype(compute_dtype)
    w2 = _oihw_to_im2col(params["w2"]).astype(compute_dtype)
    b1 = params["b1"].reshape(1, C1).astype(jnp.float32)
    b2 = params["b2"].reshape(1, C2).astype(jnp.float32)

    one_in = jnp.ones((1, Cin), jnp.float32)
    zero_in = jnp.zeros((1, Cin), jnp.float32)

    # conv1 -> pre-BN activations + global BN1 statistics.
    a1, s1, q1 = _conv_stage(x2d, one_in, zero_in, w1, b1,
                             B=B, H=H, W=W, Cin=Cin, Cout=C1,
                             apply_affine_relu=False, compute_dtype=compute_dtype)
    scale1, shift1 = _bn_affine(s1, q1,
                                params["g1"].reshape(1, C1).astype(jnp.float32),
                                params["be1"].reshape(1, C1).astype(jnp.float32),
                                n, batch_normalization)

    # BN1+ReLU fused into the conv2 kernel -> pre-BN a2 + global BN2 statistics.
    a2, s2, q2 = _conv_stage(a1, scale1, shift1, w2, b2,
                             B=B, H=H, W=W, Cin=C1, Cout=C2,
                             apply_affine_relu=True, compute_dtype=compute_dtype)
    scale2, shift2 = _bn_affine(s2, q2,
                                params["g2"].reshape(1, C2).astype(jnp.float32),
                                params["be2"].reshape(1, C2).astype(jnp.float32),
                                n, batch_normalization)

    # Final BN2 + ReLU, lane-dense slab, then back to NCHW.
    x1_slab = _affine_relu(a2, scale2, shift2, B=B, H=H, W=W, C=C2)
    x1 = jnp.transpose(x1_slab.reshape(B, H, W, C2), (0, 3, 1, 2))

    if downsample:
        # TODO(synk): MaxPool2d(2,2) downsample branch (off by default) runs as
        # plain-JAX reduce_window glue, not a Pallas kernel.
        xd = lax.reduce_window(x1, -jnp.inf, lax.max,
                               (1, 1, 2, 2), (1, 1, 2, 2), "VALID")
        return xd, x1
    return x1, x1


# -----------------------------------------------------------------------------
# Pure-JAX reference (for correctness checks)
# -----------------------------------------------------------------------------
def _ref_upblock(x_nchw, params, *, batch_normalization=True, downsample=False,
                 compute_dtype=jnp.float32):
    def stage(xh, w_oihw, b, g, be):
        w = jnp.transpose(w_oihw, (2, 3, 1, 0)).astype(compute_dtype)  # HWIO
        y = lax.conv_general_dilated(
            xh.astype(compute_dtype), w, (1, 1), "SAME",
            dimension_numbers=("NHWC", "HWIO", "NHWC"),
            preferred_element_type=jnp.float32) + b
        if batch_normalization:
            m = y.mean(axis=(0, 1, 2))
            v = ((y - m) ** 2).mean(axis=(0, 1, 2))
            y = (y - m) * jax.lax.rsqrt(v + BN_EPS) * g + be
        return jnp.maximum(y, 0.0)

    xh = jnp.transpose(x_nchw, (0, 2, 3, 1)).astype(jnp.float32)
    h = stage(xh, params["w1"], params["b1"], params["g1"], params["be1"])
    h = stage(h, params["w2"], params["b2"], params["g2"], params["be2"])
    x1 = jnp.transpose(h, (0, 3, 1, 2))
    if downsample:
        xd = lax.reduce_window(x1, -jnp.inf, lax.max,
                               (1, 1, 2, 2), (1, 1, 2, 2), "VALID")
        return xd, x1
    return x1, x1


if __name__ == "__main__":
    key = jax.random.PRNGKey(0)
    kx, kp = jax.random.split(key)

    B, Cin, H, W = 2, 4, 16, 16
    Cout = 8

    x = jax.random.normal(kx, (B, Cin, H, W), jnp.float32)
    params = init_upblock_params(kp, Cin, Cout)

    fwd = jax.jit(upblock_forward)
    out, x1 = fwd(x, params)
    out = jax.block_until_ready(out)
    assert out.shape == (B, Cout, H, W), out.shape
    assert x1.shape == (B, Cout, H, W), x1.shape

    # Matched-precision reference (bf16 conv operands, f32 accumulation): tight.
    _, ref_match = _ref_upblock(x, params, compute_dtype=jnp.bfloat16)
    err_match = float(jnp.max(jnp.abs(x1 - ref_match)))
    assert err_match < 5e-3, f"mismatch vs matched-precision reference: {err_match}"

    # Full-f32 reference: loose sanity bound on bf16 MXU drift.
    _, ref_f32 = _ref_upblock(x, params, compute_dtype=jnp.float32)
    err_f32 = float(jnp.max(jnp.abs(x1 - ref_f32)))
    assert err_f32 < 1.5e-1, f"bf16 drift vs f32 reference too large: {err_f32}"

    print("KERNEL_OK")
</pallas_src>

<mosaic_0001>
module attributes {stable_mosaic.version = 11 : i64} {
  func.func @_conv_stage_kernel(%arg0: i32, %arg1: memref<256x4xf32, #tpu.memory_space<vmem>>, %arg2: memref<1x4xf32, #tpu.memory_space<vmem>>, %arg3: memref<1x4xf32, #tpu.memory_space<vmem>>, %arg4: memref<36x8xbf16, #tpu.memory_space<vmem>>, %arg5: memref<1x8xf32, #tpu.memory_space<vmem>>, %arg6: memref<256x8xf32, #tpu.memory_space<vmem>>, %arg7: memref<1x8xf32, #tpu.memory_space<vmem>>, %arg8: memref<1x8xf32, #tpu.memory_space<vmem>>, %arg9: memref<18x25x4xf32, #tpu.memory_space<vmem>>) attributes {dimension_semantics = [#tpu.dimension_semantics<arbitrary>], iteration_bounds = array<i64: 2>, scalar_prefetch = 0 : i64, scratch_operands = 1 : i64, tpu.core_type = #tpu.core_type<tc>, window_params = [{transform_indices = @transform_0, window_bounds = array<i64: 256, 4>}, {pipeline_mode = #tpu.pipeline_mode<synchronous>, transform_indices = @transform_1, window_bounds = array<i64: 1, 4>}, {pipeline_mode = #tpu.pipeline_mode<synchronous>, transform_indices = @transform_2, window_bounds = array<i64: 1, 4>}, {pipeline_mode = #tpu.pipeline_mode<synchronous>, transform_indices = @transform_3, window_bounds = array<i64: 36, 8>}, {pipeline_mode = #tpu.pipeline_mode<synchronous>, transform_indices = @transform_4, window_bounds = array<i64: 1, 8>}, {transform_indices = @transform_5, window_bounds = array<i64: 256, 8>}, {pipeline_mode = #tpu.pipeline_mode<synchronous>, transform_indices = @transform_6, window_bounds = array<i64: 1, 8>}, {pipeline_mode = #tpu.pipeline_mode<synchronous>, transform_indices = @transform_7, window_bounds = array<i64: 1, 8>}]} {
    %c0_i32 = arith.constant 0 : i32
    %0 = arith.cmpi eq, %arg0, %c0_i32 : i32
    %1 = arith.extui %0 : i1 to i32
    %c0_i32_0 = arith.constant 0 : i32
    %2 = arith.cmpi ne, %1, %c0_i32_0 : i32
    scf.if %2 {
      %cst_22 = arith.constant 0.000000e+00 : f32
      %44 = vector.broadcast %cst_22 : f32 to vector<18x25x4xf32>
      %c0_23 = arith.constant 0 : index
      %c0_24 = arith.constant 0 : index
      %c0_25 = arith.constant 0 : index
      %45 = vector.load %arg9[%c0_23, %c0_24, %c0_25] : memref<18x25x4xf32, #tpu.memory_space<vmem>>, vector<18x25x4xf32>
      tpu.vector_store %arg9[%c0_23, %c0_24, %c0_25], %44 {strides = array<i32>} : memref<18x25x4xf32, #tpu.memory_space<vmem>>, vector<18x25x4xf32>,
      %cst_26 = arith.constant 0.000000e+00 : f32
      %46 = vector.broadcast %cst_26 : f32 to vector<1x8xf32>
      %c0_27 = arith.constant 0 : index
      %c0_28 = arith.constant 0 : index
      %47 = vector.load %arg7[%c0_27, %c0_28] : memref<1x8xf32, #tpu.memory_space<vmem>>, vector<1x8xf32>
      tpu.vector_store %arg7[%c0_27, %c0_28], %46 {strides = array<i32>} : memref<1x8xf32, #tpu.memory_space<vmem>>, vector<1x8xf32>,
      %cst_29 = arith.constant 0.000000e+00 : f32
      %48 = vector.broadcast %cst_29 : f32 to vector<1x8xf32>
      %c0_30 = arith.constant 0 : index
      %c0_31 = arith.constant 0 : index
      %49 = vector.load %arg8[%c0_30, %c0_31] : memref<1x8xf32, #tpu.memory_space<vmem>>, vector<1x8xf32>
      tpu.vector_store %arg8[%c0_30, %c0_31], %48 {strides = array<i32>} : memref<1x8xf32, #tpu.memory_space<vmem>>, vector<1x8xf32>,
    } else {
    }
    %c0 = arith.constant 0 : index
    %c0_1 = arith.constant 0 : index
    %3 = vector.load %arg1[%c0, %c0_1] : memref<256x4xf32, #tpu.memory_space<vmem>>, vector<256x4xf32>
    %4 = vector.shape_cast %3 : vector<256x4xf32> to vector<16x16x4xf32>
    %c1 = arith.constant 1 : index
    %c8 = arith.constant 8 : index
    %c0_2 = arith.constant 0 : index
    %5 = vector.load %arg9[%c1, %c8, %c0_2] : memref<18x25x4xf32, #tpu.memory_space<vmem>>, vector<16x16x4xf32>
    tpu.vector_store %arg9[%c1, %c8, %c0_2], %4 {strides = array<i32>} : memref<18x25x4xf32, #tpu.memory_space<vmem>>, vector<16x16x4xf32>,
    %c0_3 = arith.constant 0 : index
    %c0_4 = arith.constant 0 : index
    %c0_5 = arith.constant 0 : index
    %6 = vector.load %arg9[%c0_3, %c0_4, %c0_5] : memref<18x25x4xf32, #tpu.memory_space<vmem>>, vector<18x25x4xf32>
    %7 = vector.extract_strided_slice %6 {offsets = [0, 7, 0], sizes = [16, 16, 4], strides = [1, 1, 1]} : vector<18x25x4xf32> to vector<16x16x4xf32>
    %8 = vector.shape_cast %7 : vector<16x16x4xf32> to vector<256x4xf32>
    %9 = vector.extract_strided_slice %6 {offsets = [0, 8, 0], sizes = [16, 16, 4], strides = [1, 1, 1]} : vector<18x25x4xf32> to vector<16x16x4xf32>
    %10 = vector.shape_cast %9 : vector<16x16x4xf32> to vector<256x4xf32>
    %11 = vector.extract_strided_slice %6 {offsets = [0, 9, 0], sizes = [16, 16, 4], strides = [1, 1, 1]} : vector<18x25x4xf32> to vector<16x16x4xf32>
    %12 = vector.shape_cast %11 : vector<16x16x4xf32> to vector<256x4xf32>
    %13 = vector.extract_strided_slice %6 {offsets = [1, 7, 0], sizes = [16, 16, 4], strides = [1, 1, 1]} : vector<18x25x4xf32> to vector<16x16x4xf32>
    %14 = vector.shape_cast %13 : vector<16x16x4xf32> to vector<256x4xf32>
    %15 = vector.extract_strided_slice %6 {offsets = [1, 8, 0], sizes = [16, 16, 4], strides = [1, 1, 1]} : vector<18x25x4xf32> to vector<16x16x4xf32>
    %16 = vector.shape_cast %15 : vector<16x16x4xf32> to vector<256x4xf32>
    %17 = vector.extract_strided_slice %6 {offsets = [1, 9, 0], sizes = [16, 16, 4], strides = [1, 1, 1]} : vector<18x25x4xf32> to vector<16x16x4xf32>
    %18 = vector.shape_cast %17 : vector<16x16x4xf32> to vector<256x4xf32>
    %19 = vector.extract_strided_slice %6 {offsets = [2, 7, 0], sizes = [16, 16, 4], strides = [1, 1, 1]} : vector<18x25x4xf32> to vector<16x16x4xf32>
    %20 = vector.shape_cast %19 : vector<16x16x4xf32> to vector<256x4xf32>
    %21 = vector.extract_strided_slice %6 {offsets = [2, 8, 0], sizes = [16, 16, 4], strides = [1, 1, 1]} : vector<18x25x4xf32> to vector<16x16x4xf32>
    %22 = vector.shape_cast %21 : vector<16x16x4xf32> to vector<256x4xf32>
    %23 = vector.extract_strided_slice %6 {offsets = [2, 9, 0], sizes = [16, 16, 4], strides = [1, 1, 1]} : vector<18x25x4xf32> to vector<16x16x4xf32>
    %24 = vector.shape_cast %23 : vector<16x16x4xf32> to vector<256x4xf32>
    %25 = tpu.concatenate %8, %10, %12, %14, %16, %18, %20, %22, %24 in 1 : vector<256x4xf32>, vector<256x4xf32>, vector<256x4xf32>, vector<256x4xf32>, vector<256x4xf32>, vector<256x4xf32>, vector<256x4xf32>, vector<256x4xf32>, vector<256x4xf32> -> vector<256x36xf32>
    %26 = arith.truncf %25 : vector<256x36xf32> to vector<256x36xbf16>
    %c0_6 = arith.constant 0 : index
    %c0_7 = arith.constant 0 : index
    %27 = vector.load %arg4[%c0_6, %c0_7] : memref<36x8xbf16, #tpu.memory_space<vmem>>, vector<36x8xbf16>
    %cst = arith.constant dense<0.000000e+00> : vector<256x8xf32>
    %28 = tpu.matmul %26, %27, %cst {dimension_numbers = #tpu.dot_dimension_numbers<[1], [0], [0], [1], [0, 0, 1, 1], [], []>} : vector<256x36xbf16>, vector<36x8xbf16>, vector<256x8xf32> -> vector<256x8xf32>
    %c0_8 = arith.constant 0 : index
    %c0_9 = arith.constant 0 : index
    %29 = vector.load %arg5[%c0_8, %c0_9] : memref<1x8xf32, #tpu.memory_space<vmem>>, vector<1x8xf32>
    %30 = vector.broadcast %29 : vector<1x8xf32> to vector<256x8xf32>
    %31 = arith.addf %28, %30 : vector<256x8xf32>
    %c0_10 = arith.constant 0 : index
    %c0_11 = arith.constant 0 : index
    %32 = vector.load %arg6[%c0_10, %c0_11] : memref<256x8xf32, #tpu.memory_space<vmem>>, vector<256x8xf32>
    tpu.vector_store %arg6[%c0_10, %c0_11], %31 {strides = array<i32>} : memref<256x8xf32, #tpu.memory_space<vmem>>, vector<256x8xf32>,
    %c0_12 = arith.constant 0 : index
    %c0_13 = arith.constant 0 : index
    %33 = vector.load %arg7[%c0_12, %c0_13] : memref<1x8xf32, #tpu.memory_space<vmem>>, vector<1x8xf32>
    %cst_14 = arith.constant dense<0.000000e+00> : vector<8xf32>
    %34 = vector.multi_reduction <add>, %31, %cst_14 [0] : vector<256x8xf32> to vector<8xf32>
    %35 = vector.shape_cast %34 : vector<8xf32> to vector<1x8xf32>
    %36 = arith.addf %33, %35 : vector<1x8xf32>
    %c0_15 = arith.constant 0 : index
    %c0_16 = arith.constant 0 : index
    %37 = vector.load %arg7[%c0_15, %c0_16] : memref<1x8xf32, #tpu.memory_space<vmem>>, vector<1x8xf32>
    tpu.vector_store %arg7[%c0_15, %c0_16], %36 {strides = array<i32>} : memref<1x8xf32, #tpu.memory_space<vmem>>, vector<1x8xf32>,
    %c0_17 = arith.constant 0 : index
    %c0_18 = arith.constant 0 : index
    %38 = vector.load %arg8[%c0_17, %c0_18] : memref<1x8xf32, #tpu.memory_space<vmem>>, vector<1x8xf32>
    %39 = arith.mulf %31, %31 : vector<256x8xf32>
    %cst_19 = arith.constant dense<0.000000e+00> : vector<8xf32>
    %40 = vector.multi_reduction <add>, %39, %cst_19 [0] : vector<256x8xf32> to vector<8xf32>
    %41 = vector.shape_cast %40 : vector<8xf32> to vector<1x8xf32>
    %42 = arith.addf %38, %41 : vector<1x8xf32>
    %c0_20 = arith.constant 0 : index
    %c0_21 = arith.constant 0 : index
    %43 = vector.load %arg8[%c0_20, %c0_21] : memref<1x8xf32, #tpu.memory_space<vmem>>, vector<1x8xf32>
    tpu.vector_store %arg8[%c0_20, %c0_21], %42 {strides = array<i32>} : memref<1x8xf32, #tpu.memory_space<vmem>>, vector<1x8xf32>,
    return
  }
  func.func @transform_0(%arg0: i32) -> (i32, i32) {
    %c0_i32 = arith.constant 0 : i32
    %c0_i32_0 = arith.constant 0 : i32
    return %arg0, %c0_i32 : i32, i32
  }
  func.func @transform_1(%arg0: i32) -> (i32, i32) {
    %c0_i32 = arith.constant 0 : i32
    %c0_i32_0 = arith.constant 0 : i32
    %c0_i32_1 = arith.constant 0 : i32
    return %c0_i32, %c0_i32_0 : i32, i32
  }
  func.func @transform_2(%arg0: i32) -> (i32, i32) {
    %c0_i32 = arith.constant 0 : i32
    %c0_i32_0 = arith.constant 0 : i32
    %c0_i32_1 = arith.constant 0 : i32
    return %c0_i32, %c0_i32_0 : i32, i32
  }
  func.func @transform_3(%arg0: i32) -> (i32, i32) {
    %c0_i32 = arith.constant 0 : i32
    %c0_i32_0 = arith.constant 0 : i32
    %c0_i32_1 = arith.constant 0 : i32
    return %c0_i32, %c0_i32_0 : i32, i32
  }
  func.func @transform_4(%arg0: i32) -> (i32, i32) {
    %c0_i32 = arith.constant 0 : i32
    %c0_i32_0 = arith.constant 0 : i32
    %c0_i32_1 = arith.constant 0 : i32
    return %c0_i32, %c0_i32_0 : i32, i32
  }
  func.func @transform_5(%arg0: i32) -> (i32, i32) {
    %c0_i32 = arith.constant 0 : i32
    %c0_i32_0 = arith.constant 0 : i32
    return %arg0, %c0_i32 : i32, i32
  }
  func.func @transform_6(%arg0: i32) -> (i32, i32) {
    %c0_i32 = arith.constant 0 : i32
    %c0_i32_0 = arith.constant 0 : i32
    %c0_i32_1 = arith.constant 0 : i32
    return %c0_i32, %c0_i32_0 : i32, i32
  }
  func.func @transform_7(%arg0: i32) -> (i32, i32) {
    %c0_i32 = arith.constant 0 : i32
    %c0_i32_0 = arith.constant 0 : i32
    %c0_i32_1 = arith.constant 0 : i32
    return %c0_i32, %c0_i32_0 : i32, i32
  }
}

module attributes {stable_mosaic.version = 11 : i64} {
  func.func @_conv_stage_kernel(%arg0: i32, %arg1: memref<256x8xf32, #tpu.memory_space<vmem>>, %arg2: memref<1x8xf32, #tpu.memory_space<vmem>>, %arg3: memref<1x8xf32, #tpu.memory_space<vmem>>, %arg4: memref<72x8xbf16, #tpu.memory_space<vmem>>, %arg5: memref<1x8xf32, #tpu.memory_space<vmem>>, %arg6: memref<256x8xf32, #tpu.memory_space<vmem>>, %arg7: memref<1x8xf32, #tpu.memory_space<vmem>>, %arg8: memref<1x8xf32, #tpu.memory_space<vmem>>, %arg9: memref<18x25x8xf32, #tpu.memory_space<vmem>>) attributes {dimension_semantics = [#tpu.dimension_semantics<arbitrary>], iteration_bounds = array<i64: 2>, scalar_prefetch = 0 : i64, scratch_operands = 1 : i64, tpu.core_type = #tpu.core_type<tc>, window_params = [{transform_indices = @transform_0, window_bounds = array<i64: 256, 8>}, {pipeline_mode = #tpu.pipeline_mode<synchronous>, transform_indices = @transform_1, window_bounds = array<i64: 1, 8>}, {pipeline_mode = #tpu.pipeline_mode<synchronous>, transform_indices = @transform_2, window_bounds = array<i64: 1, 8>}, {pipeline_mode = #tpu.pipeline_mode<synchronous>, transform_indices = @transform_3, window_bounds = array<i64: 72, 8>}, {pipeline_mode = #tpu.pipeline_mode<synchronous>, transform_indices = @transform_4, window_bounds = array<i64: 1, 8>}, {transform_indices = @transform_5, window_bounds = array<i64: 256, 8>}, {pipeline_mode = #tpu.pipeline_mode<synchronous>, transform_indices = @transform_6, window_bounds = array<i64: 1, 8>}, {pipeline_mode = #tpu.pipeline_mode<synchronous>, transform_indices = @transform_7, window_bounds = array<i64: 1, 8>}]} {
    %c0_i32 = arith.constant 0 : i32
    %0 = arith.cmpi eq, %arg0, %c0_i32 : i32
    %1 = arith.extui %0 : i1 to i32
    %c0_i32_0 = arith.constant 0 : i32
    %2 = arith.cmpi ne, %1, %c0_i32_0 : i32
    scf.if %2 {
      %cst_27 = arith.constant 0.000000e+00 : f32
      %52 = vector.broadcast %cst_27 : f32 to vector<18x25x8xf32>
      %c0_28 = arith.constant 0 : index
      %c0_29 = arith.constant 0 : index
      %c0_30 = arith.constant 0 : index
      %53 = vector.load %arg9[%c0_28, %c0_29, %c0_30] : memref<18x25x8xf32, #tpu.memory_space<vmem>>, vector<18x25x8xf32>
      tpu.vector_store %arg9[%c0_28, %c0_29, %c0_30], %52 {strides = array<i32>} : memref<18x25x8xf32, #tpu.memory_space<vmem>>, vector<18x25x8xf32>,
      %cst_31 = arith.constant 0.000000e+00 : f32
      %54 = vector.broadcast %cst_31 : f32 to vector<1x8xf32>
      %c0_32 = arith.constant 0 : index
      %c0_33 = arith.constant 0 : index
      %55 = vector.load %arg7[%c0_32, %c0_33] : memref<1x8xf32, #tpu.memory_space<vmem>>, vector<1x8xf32>
      tpu.vector_store %arg7[%c0_32, %c0_33], %54 {strides = array<i32>} : memref<1x8xf32, #tpu.memory_space<vmem>>, vector<1x8xf32>,
      %cst_34 = arith.constant 0.000000e+00 : f32
      %56 = vector.broadcast %cst_34 : f32 to vector<1x8xf32>
      %c0_35 = arith.constant 0 : index
      %c0_36 = arith.constant 0 : index
      %57 = vector.load %arg8[%c0_35, %c0_36] : memref<1x8xf32, #tpu.memory_space<vmem>>, vector<1x8xf32>
      tpu.vector_store %arg8[%c0_35, %c0_36], %56 {strides = array<i32>} : memref<1x8xf32, #tpu.memory_space<vmem>>, vector<1x8xf32>,
    } else {
    }
    %c0 = arith.constant 0 : index
    %c0_1 = arith.constant 0 : index
    %3 = vector.load %arg1[%c0, %c0_1] : memref<256x8xf32, #tpu.memory_space<vmem>>, vector<256x8xf32>
    %c0_2 = arith.constant 0 : index
    %c0_3 = arith.constant 0 : index
    %4 = vector.load %arg2[%c0_2, %c0_3] : memref<1x8xf32, #tpu.memory_space<vmem>>, vector<1x8xf32>
    %5 = vector.broadcast %4 : vector<1x8xf32> to vector<256x8xf32>
    %6 = arith.mulf %3, %5 : vector<256x8xf32>
    %c0_4 = arith.constant 0 : index
    %c0_5 = arith.constant 0 : index
    %7 = vector.load %arg3[%c0_4, %c0_5] : memref<1x8xf32, #tpu.memory_space<vmem>>, vector<1x8xf32>
    %8 = vector.broadcast %7 : vector<1x8xf32> to vector<256x8xf32>
    %9 = arith.addf %6, %8 : vector<256x8xf32>
    %cst = arith.constant 0.000000e+00 : f32
    %10 = vector.broadcast %cst : f32 to vector<256x8xf32>
    %11 = arith.maximumf %9, %10 : vector<256x8xf32>
    %12 = vector.shape_cast %11 : vector<256x8xf32> to vector<16x16x8xf32>
    %c1 = arith.constant 1 : index
    %c8 = arith.constant 8 : index
    %c0_6 = arith.constant 0 : index
    %13 = vector.load %arg9[%c1, %c8, %c0_6] : memref<18x25x8xf32, #tpu.memory_space<vmem>>, vector<16x16x8xf32>
    tpu.vector_store %arg9[%c1, %c8, %c0_6], %12 {strides = array<i32>} : memref<18x25x8xf32, #tpu.memory_space<vmem>>, vector<16x16x8xf32>,
    %c0_7 = arith.constant 0 : index
    %c0_8 = arith.constant 0 : index
    %c0_9 = arith.constant 0 : index
    %14 = vector.load %arg9[%c0_7, %c0_8, %c0_9] : memref<18x25x8xf32, #tpu.memory_space<vmem>>, vector<18x25x8xf32>
    %15 = vector.extract_strided_slice %14 {offsets = [0, 7, 0], sizes = [16, 16, 8], strides = [1, 1, 1]} : vector<18x25x8xf32> to vector<16x16x8xf32>
    %16 = vector.shape_cast %15 : vector<16x16x8xf32> to vector<256x8xf32>
    %17 = vector.extract_strided_slice %14 {offsets = [0, 8, 0], sizes = [16, 16, 8], strides = [1, 1, 1]} : vector<18x25x8xf32> to vector<16x16x8xf32>
    %18 = vector.shape_cast %17 : vector<16x16x8xf32> to vector<256x8xf32>
    %19 = vector.extract_strided_slice %14 {offsets = [0, 9, 0], sizes = [16, 16, 8], strides = [1, 1, 1]} : vector<18x25x8xf32> to vector<16x16x8xf32>
    %20 = vector.shape_cast %19 : vector<16x16x8xf32> to vector<256x8xf32>
    %21 = vector.extract_strided_slice %14 {offsets = [1, 7, 0], sizes = [16, 16, 8], strides = [1, 1, 1]} : vector<18x25x8xf32> to vector<16x16x8xf32>
    %22 = vector.shape_cast %21 : vector<16x16x8xf32> to vector<256x8xf32>
    %23 = vector.extract_strided_slice %14 {offsets = [1, 8, 0], sizes = [16, 16, 8], strides = [1, 1, 1]} : vector<18x25x8xf32> to vector<16x16x8xf32>
    %24 = vector.shape_cast %23 : vector<16x16x8xf32> to vector<256x8xf32>
    %25 = vector.extract_strided_slice %14 {offsets = [1, 9, 0], sizes = [16, 16, 8], strides = [1, 1, 1]} : vector<18x25x8xf32> to vector<16x16x8xf32>
    %26 = vector.shape_cast %25 : vector<16x16x8xf32> to vector<256x8xf32>
    %27 = vector.extract_strided_slice %14 {offsets = [2, 7, 0], sizes = [16, 16, 8], strides = [1, 1, 1]} : vector<18x25x8xf32> to vector<16x16x8xf32>
    %28 = vector.shape_cast %27 : vector<16x16x8xf32> to vector<256x8xf32>
    %29 = vector.extract_strided_slice %14 {offsets = [2, 8, 0], sizes = [16, 16, 8], strides = [1, 1, 1]} : vector<18x25x8xf32> to vector<16x16x8xf32>
    %30 = vector.shape_cast %29 : vector<16x16x8xf32> to vector<256x8xf32>
    %31 = vector.extract_strided_slice %14 {offsets = [2, 9, 0], sizes = [16, 16, 8], strides = [1, 1, 1]} : vector<18x25x8xf32> to vector<16x16x8xf32>
    %32 = vector.shape_cast %31 : vector<16x16x8xf32> to vector<256x8xf32>
    %33 = tpu.concatenate %16, %18, %20, %22, %24, %26, %28, %30, %32 in 1 : vector<256x8xf32>, vector<256x8xf32>, vector<256x8xf32>, vector<256x8xf32>, vector<256x8xf32>, vector<256x8xf32>, vector<256x8xf32>, vector<256x8xf32>, vector<256x8xf32> -> vector<256x72xf32>
    %34 = arith.truncf %33 : vector<256x72xf32> to vector<256x72xbf16>
    %c0_10 = arith.constant 0 : index
    %c0_11 = arith.constant 0 : index
    %35 = vector.load %arg4[%c0_10, %c0_11] : memref<72x8xbf16, #tpu.memory_space<vmem>>, vector<72x8xbf16>
    %cst_12 = arith.constant dense<0.000000e+00> : vector<256x8xf32>
    %36 = tpu.matmul %34, %35, %cst_12 {dimension_numbers = #tpu.dot_dimension_numbers<[1], [0], [0], [1], [0, 0, 1, 1], [], []>} : vector<256x72xbf16>, vector<72x8xbf16>, vector<256x8xf32> -> vector<256x8xf32>
    %c0_13 = arith.constant 0 : index
    %c0_14 = arith.constant 0 : index
    %37 = vector.load %arg5[%c0_13, %c0_14] : memref<1x8xf32, #tpu.memory_space<vmem>>, vector<1x8xf32>
    %38 = vector.broadcast %37 : vector<1x8xf32> to vector<256x8xf32>
    %39 = arith.addf %36, %38 : vector<256x8xf32>
    %c0_15 = arith.constant 0 : index
    %c0_16 = arith.constant 0 : index
    %40 = vector.load %arg6[%c0_15, %c0_16] : memref<256x8xf32, #tpu.memory_space<vmem>>, vector<256x8xf32>
    tpu.vector_store %arg6[%c0_15, %c0_16], %39 {strides = array<i32>} : memref<256x8xf32, #tpu.memory_space<vmem>>, vector<256x8xf32>,
    %c0_17 = arith.constant 0 : index
    %c0_18 = arith.constant 0 : index
    %41 = vector.load %arg7[%c0_17, %c0_18] : memref<1x8xf32, #tpu.memory_space<vmem>>, vector<1x8xf32>
    %cst_19 = arith.constant dense<0.000000e+00> : vector<8xf32>
    %42 = vector.multi_reduction <add>, %39, %cst_19 [0] : vector<256x8xf32> to vector<8xf32>
    %43 = vector.shape_cast %42 : vector<8xf32> to vector<1x8xf32>
    %44 = arith.addf %41, %43 : vector<1x8xf32>
    %c0_20 = arith.constant 0 : index
    %c0_21 = arith.constant 0 : index
    %45 = vector.load %arg7[%c0_20, %c0_21] : memref<1x8xf32, #tpu.memory_space<vmem>>, vector<1x8xf32>
    tpu.vector_store %arg7[%c0_20, %c0_21], %44 {strides = array<i32>} : memref<1x8xf32, #tpu.memory_space<vmem>>, vector<1x8xf32>,
    %c0_22 = arith.constant 0 : index
    %c0_23 = arith.constant 0 : index
    %46 = vector.load %arg8[%c0_22, %c0_23] : memref<1x8xf32, #tpu.memory_space<vmem>>, vector<1x8xf32>
    %47 = arith.mulf %39, %39 : vector<256x8xf32>
    %cst_24 = arith.constant dense<0.000000e+00> : vector<8xf32>
    %48 = vector.multi_reduction <add>, %47, %cst_24 [0] : vector<256x8xf32> to vector<8xf32>
    %49 = vector.shape_cast %48 : vector<8xf32> to vector<1x8xf32>
    %50 = arith.addf %46, %49 : vector<1x8xf32>
    %c0_25 = arith.constant 0 : index
    %c0_26 = arith.constant 0 : index
    %51 = vector.load %arg8[%c0_25, %c0_26] : memref<1x8xf32, #tpu.memory_space<vmem>>, vector<1x8xf32>
    tpu.vector_store %arg8[%c0_25, %c0_26], %50 {strides = array<i32>} : memref<1x8xf32, #tpu.memory_space<vmem>>, vector<1x8xf32>,
    return
  }
  func.func @transform_0(%arg0: i32) -> (i32, i32) {
    %c0_i32 = arith.constant 0 : i32
    %c0_i32_0 = arith.constant 0 : i32
    return %arg0, %c0_i32 : i32, i32
  }
  func.func @transform_1(%arg0: i32) -> (i32, i32) {
    %c0_i32 = arith.constant 0 : i32
    %c0_i32_0 = arith.constant 0 : i32
    %c0_i32_1 = arith.constant 0 : i32
    return %c0_i32, %c0_i32_0 : i32, i32
  }
  func.func @transform_2(%arg0: i32) -> (i32, i32) {
    %c0_i32 = arith.constant 0 : i32
    %c0_i32_0 = arith.constant 0 : i32
    %c0_i32_1 = arith.constant 0 : i32
    return %c0_i32, %c0_i32_0 : i32, i32
  }
  func.func @transform_3(%arg0: i32) -> (i32, i32) {
    %c0_i32 = arith.constant 0 : i32
    %c0_i32_0 = arith.constant 0 : i32
    %c0_i32_1 = arith.constant 0 : i32
    return %c0_i32, %c0_i32_0 : i32, i32
  }
  func.func @transform_4(%arg0: i32) -> (i32, i32) {
    %c0_i32 = arith.constant 0 : i32
    %c0_i32_0 = arith.constant 0 : i32
    %c0_i32_1 = arith.constant 0 : i32
    return %c0_i32, %c0_i32_0 : i32, i32
  }
  func.func @transform_5(%arg0: i32) -> (i32, i32) {
    %c0_i32 = arith.constant 0 : i32
    %c0_i32_0 = arith.constant 0 : i32
    return %arg0, %c0_i32 : i32, i32
  }
  func.func @transform_6(%arg0: i32) -> (i32, i32) {
    %c0_i32 = arith.constant 0 : i32
    %c0_i32_0 = arith.constant 0 : i32
    %c0_i32_1 = arith.constant 0 : i32
    return %c0_i32, %c0_i32_0 : i32, i32
  }
  func.func @transform_7(%arg0: i32) -> (i32, i32) {
    %c0_i32 = arith.constant 0 : i32
    %c0_i32_0 = arith.constant 0 : i32
    %c0_i32_1 = arith.constant 0 : i32
    return %c0_i32, %c0_i32_0 : i32, i32
  }
}

module attributes {stable_mosaic.version = 11 : i64} {
  func.func @_affine_relu_kernel(%arg0: i32, %arg1: memref<32x128xf32, #tpu.memory_space<vmem>>, %arg2: memref<1x128xf32, #tpu.memory_space<vmem>>, %arg3: memref<1x128xf32, #tpu.memory_space<vmem>>, %arg4: memref<32x128xf32, #tpu.memory_space<vmem>>) attributes {dimension_semantics = [#tpu.dimension_semantics<parallel>], iteration_bounds = array<i64: 1>, scalar_prefetch = 0 : i64, scratch_operands = 0 : i64, tpu.core_type = #tpu.core_type<tc>, window_params = [{transform_indices = @transform_0, window_bounds = array<i64: 32, 128>}, {pipeline_mode = #tpu.pipeline_mode<synchronous>, transform_indices = @transform_1, window_bounds = array<i64: 1, 128>}, {pipeline_mode = #tpu.pipeline_mode<synchronous>, transform_indices = @transform_2, window_bounds = array<i64: 1, 128>}, {transform_indices = @transform_3, window_bounds = array<i64: 32, 128>}]} {
    %c0 = arith.constant 0 : index
    %c0_0 = arith.constant 0 : index
    %0 = vector.load %arg1[%c0, %c0_0] : memref<32x128xf32, #tpu.memory_space<vmem>>, vector<32x128xf32>
    %c0_1 = arith.constant 0 : index
    %c0_2 = arith.constant 0 : index
    %1 = vector.load %arg2[%c0_1, %c0_2] : memref<1x128xf32, #tpu.memory_space<vmem>>, vector<1x128xf32>
    %2 = vector.broadcast %1 : vector<1x128xf32> to vector<32x128xf32>
    %3 = arith.mulf %0, %2 : vector<32x128xf32>
    %c0_3 = arith.constant 0 : index
    %c0_4 = arith.constant 0 : index
    %4 = vector.load %arg3[%c0_3, %c0_4] : memref<1x128xf32, #tpu.memory_space<vmem>>, vector<1x128xf32>
    %5 = vector.broadcast %4 : vector<1x128xf32> to vector<32x128xf32>
    %6 = arith.addf %3, %5 : vector<32x128xf32>
    %cst = arith.constant 0.000000e+00 : f32
    %7 = vector.broadcast %cst : f32 to vector<32x128xf32>
    %8 = arith.maximumf %6, %7 : vector<32x128xf32>
    %c0_5 = arith.constant 0 : index
    %c0_6 = arith.constant 0 : index
    %9 = vector.load %arg4[%c0_5, %c0_6] : memref<32x128xf32, #tpu.memory_space<vmem>>, vector<32x128xf32>
    tpu.vector_store %arg4[%c0_5, %c0_6], %8 {strides = array<i32>} : memref<32x128xf32, #tpu.memory_space<vmem>>, vector<32x128xf32>,
    return
  }
  func.func @transform_0(%arg0: i32) -> (i32, i32) {
    %c0_i32 = arith.constant 0 : i32
    %c0_i32_0 = arith.constant 0 : i32
    return %arg0, %c0_i32 : i32, i32
  }
  func.func @transform_1(%arg0: i32) -> (i32, i32) {
    %c0_i32 = arith.constant 0 : i32
    %c0_i32_0 = arith.constant 0 : i32
    %c0_i32_1 = arith.constant 0 : i32
    return %c0_i32, %c0_i32_0 : i32, i32
  }
  func.func @transform_2(%arg0: i32) -> (i32, i32) {
    %c0_i32 = arith.constant 0 : i32
    %c0_i32_0 = arith.constant 0 : i32
    %c0_i32_1 = arith.constant 0 : i32
    return %c0_i32, %c0_i32_0 : i32, i32
  }
  func.func @transform_3(%arg0: i32) -> (i32, i32) {
    %c0_i32 = arith.constant 0 : i32
    %c0_i32_0 = arith.constant 0 : i32
    return %arg0, %c0_i32 : i32, i32
  }
}

</mosaic_0001>

<bundles_post_ra>
// kernel: upblock_forward.5
= control target key start
LH: loop header
LB: loop body
LE: loop exit
PB: predicated region body
PF: predicated region fallthrough
CT: control target
= control target key end

     0   :  { %s98_s0 = inlined_call_operand.vmem [shape: f32[32,128], index: 0, kind: input, shape index: {}]   ;;  %s99_s1 = inlined_call_operand.vmem [shape: f32[1,128], index: 1, kind: input, shape index: {}]   ;;  %s100_s2 = inlined_call_operand.vmem [shape: f32[1,128], index: 2, kind: input, shape index: {}]   ;;  %s101_s3 = inlined_call_operand.vmem [shape: f32[32,128], index: 3, kind: output, shape index: {}]  }
   0x1   :  { %v14_v0 = vld [vmem:[%s98_s0] sm:$0xff]  ;;  %v15_v3 = vld [vmem:[%s98_s0 + $0x8] sm:$0xff]  ;;  %v16_v6 = vld [vmem:[%s98_s0 + $0x10] sm:$0xff] }
   0x2   :  { %v46_v1 = vld [vmem:[%s99_s1] ss:$0 sm:$0xff]  ;;  %v17_v7 = vld [vmem:[%s98_s0 + $0x18] sm:$0xff] }
   0x3   :  { %v47_v2 = vld [vmem:[%s100_s2] ss:$0 sm:$0xff]  ;;  %v22_v4 = vmul.f32 %v46_v1, %v14_v0  ;;  %v23_v5 = vmul.f32 %v46_v1, %v15_v3  ;;  %v24_v8 = vmul.f32 %v46_v1, %v16_v6  ;;  %v25_v9 = vmul.f32 %v46_v1, %v17_v7 }
   0x5   :  { %v30_v10 = vadd.f32 %v47_v2, %v22_v4  ;;  %v31_v11 = vadd.f32 %v47_v2, %v23_v5  ;;  %v32_v12 = vadd.f32 %v47_v2, %v24_v8  ;;  %v33_v13 = vadd.f32 %v47_v2, %v25_v9 }
   0x7   :  { %v34_v14 = vmax.f32 %v30_v10, 0.0  ;;  %v35_v15 = vmax.f32 %v31_v11, 0.0  ;;  %v36_v16 = vmax.f32 %v32_v12, 0.0  ;;  %v37_v17 = vmax.f32 %v33_v13, 0.0 }
   0x9   :  { %38 = vst [vmem:[%s101_s3] sm:$0xff] %v34_v14 }
   0xa   :  { %39 = vst [vmem:[%s101_s3 + $0x8] sm:$0xff] %v35_v15 }
   0xb   :  { %40 = vst [vmem:[%s101_s3 + $0x10] sm:$0xff] %v36_v16 }
   0xc   :  { %41 = vst [vmem:[%s101_s3 + $0x18] sm:$0xff] %v37_v17 }

// kernel: upblock_forward.4
= control target key start
LH: loop header
LB: loop body
LE: loop exit
PB: predicated region body
PF: predicated region fallthrough
CT: control target
= control target key end

     0   :  { %s3202_s24 = smov 0   ;;  %s5114_s0 = inlined_call_operand.vmem [shape: f32[512,8], index: 0, kind: input, shape index: {}]   ;;  %s5115_s1 = inlined_call_operand.vmem [shape: f32[1,8], index: 1, kind: input, shape index: {}]   ;;  %s5116_s2 = inlined_call_operand.vmem [shape: f32[1,8], index: 2, kind: input, shape index: {}]   ;;  %s5117_s3 = inlined_call_operand.vmem [shape: bf16[72,8], index: 3, kind: input, shape index: {}]   ;;  %s5118_s4 = inlined_call_operand.vmem [shape: f32[1,8], index: 4, kind: input, shape index: {}]   ;;  %s5119_s5 = inlined_call_operand.vmem [shape: f32[512,8], index: 5, kind: output, shape index: {0}]   ;;  %s5120_s6 = inlined_call_operand.vmem [shape: f32[1,8], index: 6, kind: output, shape index: {1}]   ;;  %s5121_s7 = inlined_call_operand.vmem [shape: f32[1,8], index: 7, kind: output, shape index: {2}]  }
   0x1 LB: > { %s2392_s25 = sadd.s32 4294967295, %s3151_s24   ;;  %p2396_p0 = scmp.ge.s32.totalorder %s3151_s24, 1  ;;  %s3151_s24 = sphi %s3202_s24, %s18_s24  }
   0x2   : > { %p233_p1 = scmp.lt.s32.totalorder %s3151_s24, 3 }
   0x4   : > { %p234_p2 = pnand %p2396_p0, %p233_p1 }
   0x6   : > { %237 = sbr.rel (%p234_p2) target bundleno = 734 (0x2de), region = 40 }
   0xb   : > { %s2397_s26 = sshll.u32 %s2392_s25, 5  ;;  %p2401_p4 = scmp.ne.s32.totalorder %s2392_s25, 0 }
   0xc   : > { %p266_p3 = scmp.lt.s32.totalorder %s2397_s26, 63 }
   0xd   : > { %281 = sbr.rel (%p2401_p4) target bundleno = 93 (0x5d), region = 44 }
   0xe   : > { %s5230_s26 = smov (!%p266_p3, %s2397_s26), 63 }
   0xf   : > { %s2398_s27 = sshll.u32 %s5230_s26, 3 }
  0x10   : > { %s3213_s30 = scalar_lea.vmem %s5114_s0, %s2398_s27  ;;  %s3218_s10 = scalar_lea.vmem %s5119_s5, %s2398_s27 }
  0x12   : > { %vm282_vm0 = vcmask 64512   ;;  %v3153_v0 = vmov 0.0   ;;  %vm286_vm1 = vcmask 57344  }
  0x13   : > { %283 = vst.msk [vmem:[#allocation2] sm:$0xff] %vm282_vm0, %v3153_v0 }
  0x14   : > { %284 = vst.msk [vmem:[#allocation2 + $0x8] sm:$0xff] %vm282_vm0, %v3153_v0 }
  0x15   : > { %285 = vst.msk [vmem:[#allocation2 + $0x10] sm:$0xff] %vm282_vm0, %v3153_v0 }
  0x16   : > { %288 = vst.msk [vmem:[#allocation2 + $0x20] sm:$0xff] %vm282_vm0, %v3153_v0 }
  0x17   : > { %289 = vst.msk [vmem:[#allocation2 + $0x28] sm:$0xff] %vm282_vm0, %v3153_v0 }
  0x18   : > { %290 = vst.msk [vmem:[#allocation2 + $0x30] sm:$0xff] %vm282_vm0, %v3153_v0 }
  0x19   : > { %292 = vst.msk [vmem:[#allocation2 + $0x40] sm:$0xff] %vm282_vm0, %v3153_v0 }
  0x1a   : > { %293 = vst.msk [vmem:[#allocation2 + $0x48] sm:$0xff] %vm282_vm0, %v3153_v0 }
  0x1b   : > { %294 = vst.msk [vmem:[#allocation2 + $0x50] sm:$0xff] %vm282_vm0, %v3153_v0 }
  0x1c   : > { %296 = vst.msk [vmem:[#allocation2 + $0x60] sm:$0xff] %vm282_vm0, %v3153_v0 }
  0x1d   : > { %297 = vst.msk [vmem:[#allocation2 + $0x68] sm:$0xff] %vm282_vm0, %v3153_v0 }
  0x1e   : > { %298 = vst.msk [vmem:[#allocation2 + $0x70] sm:$0xff] %vm282_vm0, %v3153_v0 }
  0x1f   : > { %300 = vst.msk [vmem:[#allocation2 + $0x80] sm:$0xff] %vm282_vm0, %v3153_v0 }
  0x20   : > { %301 = vst.msk [vmem:[#allocation2 + $0x88] sm:$0xff] %vm282_vm0, %v3153_v0 }
  0x21   : > { %302 = vst.msk [vmem:[#allocation2 + $0x90] sm:$0xff] %vm282_vm0, %v3153_v0 }
  0x22   : > { %304 = vst.msk [vmem:[#allocation2 + $0xa0] sm:$0xff] %vm282_vm0, %v3153_v0 }
  0x23   : > { %305 = vst.msk [vmem:[#allocation2 + $0xa8] sm:$0xff] %vm282_vm0, %v3153_v0 }
  0x24   : > { %306 = vst.msk [vmem:[#allocation2 + $0xb0] sm:$0xff] %vm282_vm0, %v3153_v0 }
  0x25   : > { %308 = vst.msk [vmem:[#allocation2 + $0xc0] sm:$0xff] %vm282_vm0, %v3153_v0 }
  0x26   : > { %309 = vst.msk [vmem:[#allocation2 + $0xc8] sm:$0xff] %vm282_vm0, %v3153_v0 }
  0x27   : > { %310 = vst.msk [vmem:[#allocation2 + $0xd0] sm:$0xff] %vm282_vm0, %v3153_v0 }
  0x28   : > { %312 = vst.msk [vmem:[#allocation2 + $0xe0] sm:$0xff] %vm282_vm0, %v3153_v0 }
  0x29   : > { %313 = vst.msk [vmem:[#allocation2 + $0xe8] sm:$0xff] %vm282_vm0, %v3153_v0 }
  0x2a   : > { %314 = vst.msk [vmem:[#allocation2 + $0xf0] sm:$0xff] %vm282_vm0, %v3153_v0 }
  0x2b   : > { %316 = vst.msk [vmem:[#allocation2 + $0x100] sm:$0xff] %vm282_vm0, %v3153_v0 }
  0x2c   : > { %317 = vst.msk [vmem:[#allocation2 + $0x108] sm:$0xff] %vm282_vm0, %v3153_v0 }
  0x2d   : > { %318 = vst.msk [vmem:[#allocation2 + $0x110] sm:$0xff] %vm282_vm0, %v3153_v0 }
  0x2e   : > { %320 = vst.msk [vmem:[#allocation2 + $0x120] sm:$0xff] %vm282_vm0, %v3153_v0 }
  0x2f   : > { %321 = vst.msk [vmem:[#allocation2 + $0x128] sm:$0xff] %vm282_vm0, %v3153_v0 }
  0x30   : > { %322 = vst.msk [vmem:[#allocation2 + $0x130] sm:$0xff] %vm282_vm0, %v3153_v0 }
  0x31   : > { %324 = vst.msk [vmem:[#allocation2 + $0x140] sm:$0xff] %vm282_vm0, %v3153_v0 }
  0x32   : > { %325 = vst.msk [vmem:[#allocation2 + $0x148] sm:$0xff] %vm282_vm0, %v3153_v0 }
  0x33   : > { %326 = vst.msk [vmem:[#allocation2 + $0x150] sm:$0xff] %vm282_vm0, %v3153_v0 }
  0x34   : > { %328 = vst.msk [vmem:[#allocation2 + $0x160] sm:$0xff] %vm282_vm0, %v3153_v0 }
  0x35   : > { %329 = vst.msk [vmem:[#allocation2 + $0x168] sm:$0xff] %vm282_vm0, %v3153_v0 }
  0x36   : > { %330 = vst.msk [vmem:[#allocation2 + $0x170] sm:$0xff] %vm282_vm0, %v3153_v0 }
  0x37   : > { %332 = vst.msk [vmem:[#allocation2 + $0x180] sm:$0xff] %vm282_vm0, %v3153_v0 }
  0x38   : > { %333 = vst.msk [vmem:[#allocation2 + $0x188] sm:$0xff] %vm282_vm0, %v3153_v0 }
  0x39   : > { %334 = vst.msk [vmem:[#allocation2 + $0x190] sm:$0xff] %vm282_vm0, %v3153_v0 }
  0x3a   : > { %336 = vst.msk [vmem:[#allocation2 + $0x1a0] sm:$0xff] %vm282_vm0, %v3153_v0 }
  0x3b   : > { %337 = vst.msk [vmem:[#allocation2 + $0x1a8] sm:$0xff] %vm282_vm0, %v3153_v0 }
  0x3c   : > { %338 = vst.msk [vmem:[#allocation2 + $0x1b0] sm:$0xff] %vm282_vm0, %v3153_v0 }
  0x3d   : > { %340 = vst.msk [vmem:[#allocation2 + $0x1c0] sm:$0xff] %vm282_vm0, %v3153_v0 }
  0x3e   : > { %341 = vst.msk [vmem:[#allocation2 + $0x1c8] sm:$0xff] %vm282_vm0, %v3153_v0 }
  0x3f   : > { %342 = vst.msk [vmem:[#allocation2 + $0x1d0] sm:$0xff] %vm282_vm0, %v3153_v0 }
  0x40   : > { %344 = vst.msk [vmem:[#allocation2 + $0x1e0] sm:$0xff] %vm282_vm0, %v3153_v0 }
  0x41   : > { %345 = vst.msk [vmem:[#allocation2 + $0x1e8] sm:$0xff] %vm282_vm0, %v3153_v0 }
  0x42   : > { %346 = vst.msk [vmem:[#allocation2 + $0x1f0] sm:$0xff] %vm282_vm0, %v3153_v0 }
  0x43   : > { %348 = vst.msk [vmem:[#allocation2 + $0x200] sm:$0xff] %vm282_vm0, %v3153_v0 }
  0x44   : > { %349 = vst.msk [vmem:[#allocation2 + $0x208] sm:$0xff] %vm282_vm0, %v3153_v0 }
  0x45   : > { %350 = vst.msk [vmem:[#allocation2 + $0x210] sm:$0xff] %vm282_vm0, %v3153_v0 }
  0x46   : > { %352 = vst.msk [vmem:[#allocation2 + $0x220] sm:$0xff] %vm282_vm0, %v3153_v0 }
  0x47   : > { %353 = vst.msk [vmem:[#allocation2 + $0x228] sm:$0xff] %vm282_vm0, %v3153_v0 }
  0x48   : > { %354 = vst.msk [vmem:[#allocation2 + $0x230] sm:$0xff] %vm282_vm0, %v3153_v0 }
  0x49   : > { %287 = vst.msk [vmem:[#allocation2 + $0x18] sm:$0x1] %vm286_vm1, %v3153_v0 }
  0x4a   : > { %291 = vst.msk [vmem:[#allocation2 + $0x38] sm:$0x1] %vm286_vm1, %v3153_v0 }
  0x4b   : > { %295 = vst.msk [vmem:[#allocation2 + $0x58] sm:$0x1] %vm286_vm1, %v3153_v0 }
  0x4c   : > { %299 = vst.msk [vmem:[#allocation2 + $0x78] sm:$0x1] %vm286_vm1, %v3153_v0 }
  0x4d   : > { %303 = vst.msk [vmem:[#allocation2 + $0x98] sm:$0x1] %vm286_vm1, %v3153_v0 }
  0x4e   : > { %307 = vst.msk [vmem:[#allocation2 + $0xb8] sm:$0x1] %vm286_vm1, %v3153_v0 }
  0x4f   : > { %311 = vst.msk [vmem:[#allocation2 + $0xd8] sm:$0x1] %vm286_vm1, %v3153_v0 }
  0x50   : > { %315 = vst.msk [vmem:[#allocation2 + $0xf8] sm:$0x1] %vm286_vm1, %v3153_v0 }
  0x51   : > { %319 = vst.msk [vmem:[#allocation2 + $0x118] sm:$0x1] %vm286_vm1, %v3153_v0 }
  0x52   : > { %323 = vst.msk [vmem:[#allocation2 + $0x138] sm:$0x1] %vm286_vm1, %v3153_v0 }
  0x53   : > { %327 = vst.msk [vmem:[#allocation2 + $0x158] sm:$0x1] %vm286_vm1, %v3153_v0 }
  0x54   : > { %331 = vst.msk [vmem:[#allocation2 + $0x178] sm:$0x1] %vm286_vm1, %v3153_v0 }
  0x55   : > { %335 = vst.msk [vmem:[#allocation2 + $0x198] sm:$0x1] %vm286_vm1, %v3153_v0 }
  0x56   : > { %339 = vst.msk [vmem:[#allocation2 + $0x1b8] sm:$0x1] %vm286_vm1, %v3153_v0 }
  0x57   : > { %343 = vst.msk [vmem:[#allocation2 + $0x1d8] sm:$0x1] %vm286_vm1, %v3153_v0 }
  0x58   : > { %347 = vst.msk [vmem:[#allocation2 + $0x1f8] sm:$0x1] %vm286_vm1, %v3153_v0 }
  0x59   : > { %351 = vst.msk [vmem:[#allocation2 + $0x218] sm:$0x1] %vm286_vm1, %v3153_v0 }
  0x5a   : > { %355 = vst.msk [vmem:[#allocation2 + $0x238] sm:$0x1] %vm286_vm1, %v3153_v0 }
  0x5b   : > { %356 = vst.msk [vmem:[%s5120_s6] sm:$0x1] %vm286_vm1, %v3153_v0 }
  0x5c   : > { %357 = vst.msk [vmem:[%s5121_s7] sm:$0x1] %vm286_vm1, %v3153_v0 }
  0x5d PF: > { %v3374_v1 = vld [vmem:[#allocation2 + $0x8] sm:$0xff]  ;;  %v3376_v2 = vld [vmem:[#allocation2 + $0x10] sm:$0xff]  ;;  %v365_v5 = vld [vmem:[%s3213_s30 + $0x38] sm:$0xff]  ;;  %s3154_s17 = smov 8   ;;  %vm495_vm2 = vcmask 64512   ;;  %vm777_vm3 = vcmask 1046528  }
  0x5e   : > { %v2472_v3 = vpack.i.bf16 %v3376_v2, %v3374_v1  ;;  %v364_v4 = vld [vmem:[%s3213_s30 + $0x30] sm:$0xff]  ;;  %v3385_v6 = vld [vmem:[%s5115_s1] ss:$0 sm:$0xff]  ;;  %v361_v9 = vld [vmem:[%s3213_s30 + $0x18] sm:$0xff]  ;;  %s3155_s20 = smov 16   ;;  %vm648_vm4 = vcmask 1040384  }
  0x5f   : > { %v360_v7 = vld [vmem:[%s3213_s30 + $0x10] sm:$0xff]  ;;  %v3392_v8 = vld [vmem:[%s5116_s2] ss:$0 sm:$0xff]  ;;  %v400_v11 = vmul.f32 %v3385_v6, %v364_v4  ;;  %v401_v12 = vmul.f32 %v3385_v6, %v365_v5  ;;  %v397_v14 = vmul.f32 %v3385_v6, %v361_v9  ;;  %v359_v15 = vld [vmem:[%s3213_s30 + $0x8] sm:$0xff]  ;;  %s3156_s21 = smov 24   ;;  %s3157_s22 = smov 32  }
  0x60   : > { %2473 = vrot.lane.b32.xlu0 %v2472_v3, %s3154_s17  ;;  %v358_v10 = vld [vmem:[%s3213_s30] sm:$0xff]  ;;  %v396_v13 = vmul.f32 %v3385_v6, %v360_v7  ;;  %v367_v17 = vld [vmem:[%s3213_s30 + $0x48] sm:$0xff]  ;;  %v395_v19 = vmul.f32 %v3385_v6, %v359_v15  ;;  %v368_v30 = vld [vmem:[%s3213_s30 + $0x50] sm:$0xff]  ;;  %vm1686_vm5 = vcmask 130048   ;;  %s3158_s23 = smov 40   ;;  %vm1719_vm6 = vcmask 195584  }
  0x61   : > { %v366_v16 = vld [vmem:[%s3213_s30 + $0x40] sm:$0xff]  ;;  %v394_v18 = vmul.f32 %v3385_v6, %v358_v10  ;;  %v403_v21 = vmul.f32 %v3385_v6, %v367_v17  ;;  %v436_v22 = vadd.f32 %v3392_v8, %v400_v11  ;;  %v437_v23 = vadd.f32 %v3392_v8, %v401_v12  ;;  %v363_v29 = vld [vmem:[%s3213_s30 + $0x28] sm:$0xff]  ;;  %v369_v31 = vld [vmem:[%s3213_s30 + $0x58] sm:$0xff]  ;;  %s3159_s25 = smov 56   ;;  %s3160_s26 = smov 48  }
  0x62   : > { %v402_v20 = vmul.f32 %v3385_v6, %v366_v16  ;;  %v432_v24 = vadd.f32 %v3392_v8, %v396_v13  ;;  %v433_v25 = vadd.f32 %v3392_v8, %v397_v14  ;;  %v362_v26 = vld [vmem:[%s3213_s30 + $0x20] sm:$0xff]  ;;  %v431_v28 = vadd.f32 %v3392_v8, %v395_v19  ;;  %v372_v36 = vld [vmem:[%s3213_s30 + $0x70] sm:$0xff]  ;;  %v373_v37 = vld [vmem:[%s3213_s30 + $0x78] sm:$0xff]  ;;  %s3161_s27 = smov 64  }
  0x63   : > { %v430_v27 = vadd.f32 %v3392_v8, %v394_v18  ;;  %v468_v32 = vmax.f32 %v436_v22, 0.0  ;;  %v469_v33 = vmax.f32 %v437_v23, 0.0  ;;  %v370_v38 = vld [vmem:[%s3213_s30 + $0x60] sm:$0xff]  ;;  %v439_v41 = vadd.f32 %v3392_v8, %v403_v21  ;;  %v371_v46 = vld [vmem:[%s3213_s30 + $0x68] sm:$0xff]  ;;  %v376_v5 = vld [vmem:[%s3213_s30 + $0x90] sm:$0xff] }
  0x64   : > { %v464_v34 = vmax.f32 %v432_v24, 0.0  ;;  %v438_v35 = vadd.f32 %v3392_v8, %v402_v20  ;;  %v465_v39 = vmax.f32 %v433_v25, 0.0  ;;  %v398_v42 = vmul.f32 %v3385_v6, %v362_v26  ;;  %v374_v55 = vld [vmem:[%s3213_s30 + $0x80] sm:$0xff]  ;;  %v375_v59 = vld [vmem:[%s3213_s30 + $0x88] sm:$0xff]  ;;  %v377_v12 = vld [vmem:[%s3213_s30 + $0x98] sm:$0xff] }
  0x65   : > { %v462_v40 = vmax.f32 %v430_v27, 0.0  ;;  %502 = vst.msk [vmem:[#allocation2 + $0x88] sm:$0xff] %vm495_vm2, %v468_v32  ;;  %v399_v43 = vmul.f32 %v3385_v6, %v363_v29  ;;  %v404_v44 = vmul.f32 %v3385_v6, %v368_v30  ;;  %v405_v45 = vmul.f32 %v3385_v6, %v369_v31  ;;  %v378_v60 = vld [vmem:[%s3213_s30 + $0xa0] sm:$0xff]  ;;  %v379_v63 = vld [vmem:[%s3213_s30 + $0xa8] sm:$0xff]  ;;  %v380_v17 = vld [vmem:[%s3213_s30 + $0xb0] sm:$0xff] }
  0x66   : > { %503 = vst.msk [vmem:[#allocation2 + $0x90] sm:$0xff] %vm495_vm2, %v469_v33  ;;  %v463_v47 = vmax.f32 %v431_v28, 0.0  ;;  %v408_v48 = vmul.f32 %v3385_v6, %v372_v36  ;;  %v409_v49 = vmul.f32 %v3385_v6, %v373_v37  ;;  %v406_v50 = vmul.f32 %v3385_v6, %v370_v38  ;;  %v381_v22 = vld [vmem:[%s3213_s30 + $0xb8] sm:$0xff]  ;;  %v384_v28 = vld [vmem:[%s3213_s30 + $0xd0] sm:$0xff] }
  0x67   : > { %498 = vst.msk [vmem:[#allocation2 + $0x48] sm:$0xff] %vm495_vm2, %v464_v34  ;;  %v470_v51 = vmax.f32 %v438_v35, 0.0  ;;  %v434_v52 = vadd.f32 %v3392_v8, %v398_v42  ;;  %v435_v53 = vadd.f32 %v3392_v8, %v399_v43  ;;  %v440_v54 = vadd.f32 %v3392_v8, %v404_v44  ;;  %v385_v33 = vld [vmem:[%s3213_s30 + $0xd8] sm:$0xff]  ;;  %v383_v44 = vld [vmem:[%s3213_s30 + $0xc8] sm:$0xff] }
  0x68   : > { %499 = vst.msk [vmem:[#allocation2 + $0x50] sm:$0xff] %vm495_vm2, %v465_v39  ;;  %v471_v56 = vmax.f32 %v439_v41, 0.0  ;;  %v441_v57 = vadd.f32 %v3392_v8, %v405_v45  ;;  %v407_v58 = vmul.f32 %v3385_v6, %v371_v46  ;;  %v444_v62 = vadd.f32 %v3392_v8, %v408_v48  ;;  %v382_v39 = vld [vmem:[%s3213_s30 + $0xc0] sm:$0xff] }
  0x69   : > { %496 = vst.msk [vmem:[#allocation2 + $0x28] sm:$0xff] %vm495_vm2, %v462_v40  ;;  %v466_v61 = vmax.f32 %v434_v52, 0.0  ;;  %v467_v0 = vmax.f32 %v435_v53, 0.0  ;;  %v445_v3 = vadd.f32 %v3392_v8, %v409_v49  ;;  %v442_v4 = vadd.f32 %v3392_v8, %v406_v50  ;;  %v386_v50 = vld [vmem:[%s3213_s30 + $0xe0] sm:$0xff] }
  0x6a   : > { %497 = vst.msk [vmem:[#allocation2 + $0x30] sm:$0xff] %vm495_vm2, %v463_v47  ;;  %v472_v7 = vmax.f32 %v440_v54, 0.0  ;;  %v410_v9 = vmul.f32 %v3385_v6, %v374_v55  ;;  %v411_v10 = vmul.f32 %v3385_v6, %v375_v59  ;;  %v414_v11 = vmul.f32 %v3385_v6, %v378_v60  ;;  %v387_v55 = vld [vmem:[%s3213_s30 + $0xe8] sm:$0xff] }
  0x6b   : > { %504 = vst.msk [vmem:[#allocation2 + $0xa8] sm:$0xff] %vm495_vm2, %v470_v51  ;;  %v473_v14 = vmax.f32 %v441_v57, 0.0  ;;  %v443_v15 = vadd.f32 %v3392_v8, %v407_v58  ;;  %v415_v16 = vmul.f32 %v3385_v6, %v379_v63  ;;  %v476_v19 = vmax.f32 %v444_v62, 0.0 }
  0x6c   : > { %v3454_v13 = vld [vmem:[#allocation2 + $0x88] sm:$0xff]  ;;  %505 = vst.msk [vmem:[#allocation2 + $0xb0] sm:$0xff] %vm495_vm2, %v471_v56  ;;  %v446_v20 = vadd.f32 %v3392_v8, %v410_v9  ;;  %v412_v21 = vmul.f32 %v3385_v6, %v376_v5  ;;  %v477_v25 = vmax.f32 %v445_v3, 0.0  ;;  %v447_v26 = vadd.f32 %v3392_v8, %v411_v10 }
  0x6d   : > { %v3460_v18 = vld [vmem:[#allocation2 + $0x90] sm:$0xff]  ;;  %500 = vst.msk [vmem:[#allocation2 + $0x68] sm:$0xff] %vm495_vm2, %v466_v61  ;;  %v413_v27 = vmul.f32 %v3385_v6, %v377_v12  ;;  %v474_v30 = vmax.f32 %v442_v4, 0.0  ;;  %v450_v31 = vadd.f32 %v3392_v8, %v414_v11  ;;  %v416_v32 = vmul.f32 %v3385_v6, %v380_v17 }
  0x6e   : > { %v3468_v23 = vpack.i.bf16 %v3460_v18, %v3454_v13  ;;  %v3470_v24 = vld [vmem:[#allocation2 + $0x48] sm:$0xff]  ;;  %501 = vst.msk [vmem:[#allocation2 + $0x70] sm:$0xff] %vm495_vm2, %v467_v0  ;;  %v475_v36 = vmax.f32 %v443_v15, 0.0  ;;  %v451_v37 = vadd.f32 %v3392_v8, %v415_v16  ;;  %v417_v38 = vmul.f32 %v3385_v6, %v381_v22 }
  0x6f   : > { %v3476_v29 = vld [vmem:[#allocation2 + $0x50] sm:$0xff]  ;;  %506 = vst.msk [vmem:[#allocation2 + $0xc8] sm:$0xff] %vm495_vm2, %v472_v7  ;;  %v478_v41 = vmax.f32 %v446_v20, 0.0  ;;  %v448_v42 = vadd.f32 %v3392_v8, %v412_v21  ;;  %v420_v43 = vmul.f32 %v3385_v6, %v384_v28  ;;  %v479_v47 = vmax.f32 %v447_v26, 0.0 }
  0x70   : > { %2493 = vrot.lane.b32.xlu2 %v3468_v23, %s3154_s17  ;;  %v3486_v34 = vpack.i.bf16 %v3476_v29, %v3470_v24  ;;  %v3488_v35 = vld [vmem:[#allocation2 + $0x28] sm:$0xff]  ;;  %507 = vst.msk [vmem:[#allocation2 + $0xd0] sm:$0xff] %vm495_vm2, %v473_v14  ;;  %v449_v48 = vadd.f32 %v3392_v8, %v413_v27  ;;  %v421_v49 = vmul.f32 %v3385_v6, %v385_v33  ;;  %v482_v52 = vmax.f32 %v450_v31, 0.0 }
  0x71   : > { %v3494_v40 = vld [vmem:[#allocation2 + $0x30] sm:$0xff]  ;;  %510 = vst.msk [vmem:[#allocation2 + $0x108] sm:$0xff] %vm495_vm2, %v476_v19  ;;  %v452_v53 = vadd.f32 %v3392_v8, %v416_v32  ;;  %v418_v54 = vmul.f32 %v3385_v6, %v382_v39  ;;  %v483_v58 = vmax.f32 %v451_v37, 0.0  ;;  %v453_v59 = vadd.f32 %v3392_v8, %v417_v38 }
  0x72   : > { %2483 = vrot.lane.b32.xlu1 %v3486_v34, %s3154_s17  ;;  %v3504_v45 = vpack.i.bf16 %v3494_v40, %v3488_v35  ;;  %v3506_v46 = vld [vmem:[#allocation2 + $0xa8] sm:$0xff]  ;;  %511 = vst.msk [vmem:[#allocation2 + $0x110] sm:$0xff] %vm495_vm2, %v477_v25  ;;  %v419_v60 = vmul.f32 %v3385_v6, %v383_v44  ;;  %v480_v62 = vmax.f32 %v448_v42, 0.0  ;;  %v456_v63 = vadd.f32 %v3392_v8, %v420_v43 }
  0x73   : > { %v3512_v51 = vld [vmem:[#allocation2 + $0xb0] sm:$0xff]  ;;  %508 = vst.msk [vmem:[#allocation2 + $0xe8] sm:$0xff] %vm495_vm2, %v474_v30  ;;  %v422_v0 = vmul.f32 %v3385_v6, %v386_v50  ;;  %v481_v5 = vmax.f32 %v449_v48, 0.0  ;;  %v457_v7 = vadd.f32 %v3392_v8, %v421_v49  ;;  %v423_v9 = vmul.f32 %v3385_v6, %v387_v55  ;;  %v535_v55 = vld [vmem:[#allocation2 + $0x38] sm:$0x1] }
  0x74   : > { %2478 = vrot.lane.b32.xlu0 %v3504_v45, %s3154_s17  ;;  %v3522_v56 = vpack.i.bf16 %v3512_v51, %v3506_v46  ;;  %v3524_v57 = vld [vmem:[#allocation2 + $0x68] sm:$0xff]  ;;  %509 = vst.msk [vmem:[#allocation2 + $0xf0] sm:$0xff] %vm495_vm2, %v475_v36  ;;  %v484_v11 = vmax.f32 %v452_v53, 0.0  ;;  %v454_v12 = vadd.f32 %v3392_v8, %v418_v54  ;;  %v485_v15 = vmax.f32 %v453_v59, 0.0 }
  0x75   : > { %v3529_v61 = vld [vmem:[#allocation2 + $0x70] sm:$0xff]  ;;  %512 = vst.msk [vmem:[#allocation2 + $0x128] sm:$0xff] %vm495_vm2, %v478_v41  ;;  %v455_v16 = vadd.f32 %v3392_v8, %v419_v60  ;;  %v488_v20 = vmax.f32 %v456_v63, 0.0  ;;  %v458_v21 = vadd.f32 %v3392_v8, %v422_v0  ;;  %v489_v22 = vmax.f32 %v457_v7, 0.0 }
  0x76   : > { %v3536_v3 = vpack.i.bf16 %v3529_v61, %v3524_v57  ;;  %v3538_v4 = vld [vmem:[#allocation2 + $0xc8] sm:$0xff]  ;;  %513 = vst.msk [vmem:[#allocation2 + $0x130] sm:$0xff] %vm495_vm2, %v479_v47  ;;  %v459_v25 = vadd.f32 %v3392_v8, %v423_v9  ;;  %v486_v28 = vmax.f32 %v454_v12, 0.0  ;;  %v784_v7 = vrot.slane %v3494_v40, 1  ;;  %v539_v12 = vld [vmem:[#allocation2 + $0x58] sm:$0x1] }
  0x77   : > { %v3543_v10 = vld [vmem:[#allocation2 + $0xd0] sm:$0xff]  ;;  %516 = vst.msk [vmem:[#allocation2 + $0x168] sm:$0xff] %vm495_vm2, %v482_v52  ;;  %v487_v31 = vmax.f32 %v455_v16, 0.0  ;;  %v490_v36 = vmax.f32 %v458_v21, 0.0  ;;  %v786_v9 = vrot.slane %v535_v55, 1  ;;  %v778_v16 = vrot.slane %v3374_v1, 1 }
  0x78   : > { %2498 = vrot.lane.b32.xlu2 %v3522_v56, %s3154_s17  ;;  %v3551_v14 = vpack.i.bf16 %v3543_v10, %v3538_v4  ;;  %517 = vst.msk [vmem:[#allocation2 + $0x170] sm:$0xff] %vm495_vm2, %v483_v58  ;;  %v3555_v17 = vld [vmem:[#allocation2 + $0x108] sm:$0xff]  ;;  %v491_v38 = vmax.f32 %v459_v25, 0.0  ;;  %v789_v25 = vrot.slane %v3476_v29, 1  ;;  %vm1752_vm7 = vcmask 261120  }
  0x79   : > { %v3557_v19 = vld [vmem:[#allocation2 + $0x110] sm:$0xff]  ;;  %514 = vst.msk [vmem:[#allocation2 + $0x148] sm:$0xff] %vm495_vm2, %v480_v62  ;;  %v531_v62 = vld [vmem:[#allocation2 + $0x18] sm:$0x1]  ;;  %vm1785_vm8 = vcmask 326656   ;;  %vm2022_vm9 = vcmask 1043456  }
  0x7a   : > { %2488 = vrot.lane.b32.xlu1 %v3536_v3, %s3154_s17  ;;  %515 = vst.msk [vmem:[#allocation2 + $0x150] sm:$0xff] %vm495_vm2, %v481_v5  ;;  %v3565_v26 = vld [vmem:[#allocation2 + $0xe8] sm:$0xff]  ;;  %v3574_v30 = vpack.i.bf16 %v3557_v19, %v3555_v17  ;;  %v783_v5 = vrot.slane %v3488_v35, 1  ;;  %vm1818_vm10 = vcmask 392192   ;;  %vm1851_vm11 = vcmask 457728  }
  0x7b   : > { %v3567_v27 = vld [vmem:[#allocation2 + $0xf0] sm:$0xff]  ;;  %518 = vst.msk [vmem:[#allocation2 + $0x188] sm:$0xff] %vm495_vm2, %v484_v11  ;;  %vm1884_vm12 = vcmask 523264   ;;  %vm1973_vm13 = vcmask 588800   ;;  %vm2218_vm14 = vcmask 57344  }
  0x7c   : > { %2503 = vrot.lane.b32.xlu0 %v3551_v14, %s3154_s17  ;;  %519 = vst.msk [vmem:[#allocation2 + $0x190] sm:$0xff] %vm495_vm2, %v485_v15  ;;  %v3577_v32 = vld [vmem:[#allocation2 + $0x128] sm:$0xff]  ;;  %v3584_v37 = vpack.i.bf16 %v3567_v27, %v3565_v26  ;;  %v779_v15 = vrot.slane %v3376_v2, 1 }
  0x7d   : > { %v3579_v33 = vld [vmem:[#allocation2 + $0x130] sm:$0xff]  ;;  %522 = vst.msk [vmem:[#allocation2 + $0x1c8] sm:$0xff] %vm495_vm2, %v488_v20  ;;  %v781_v20 = vrot.slane %v531_v62, 1 }
  0x7e   : > { %523 = vst.msk [vmem:[#allocation2 + $0x1d0] sm:$0xff] %vm495_vm2, %v489_v22  ;;  %v3592_v39 = vpack.i.bf16 %v3579_v33, %v3577_v32  ;;  %v3595_v41 = vld [vmem:[#allocation2 + $0x168] sm:$0xff]  ;;  %v788_v22 = vrot.slane %v3470_v24, 1  ;;  %v780_v55 = vsel %vm777_vm3, %v778_v16, %v779_v15  ;;  %v793_v16 = vrot.slane %v3524_v57, 1 }
  0x7f   : > { %520 = vst.msk [vmem:[#allocation2 + $0x1a8] sm:$0xff] %vm495_vm2, %v486_v28  ;;  %v3597_v42 = vld [vmem:[#allocation2 + $0x170] sm:$0xff]  ;;  %v791_v28 = vrot.slane %v539_v12, 1  ;;  %v782_v62 = vsel %vm777_vm3, %v779_v15, %v781_v20  ;;  %v543_v12 = vld [vmem:[#allocation2 + $0x78] sm:$0x1]  ;;  %v794_v15 = vrot.slane %v3529_v61, 1 }
  0x80   : > { %2513 = vrot.lane.b32.xlu2 %v3574_v30, %s3154_s17  ;;  %521 = vst.msk [vmem:[#allocation2 + $0x1b0] sm:$0xff] %vm495_vm2, %v487_v31  ;;  %v3603_v43 = vld [vmem:[#allocation2 + $0x148] sm:$0xff]  ;;  %v3611_v47 = vpack.i.bf16 %v3597_v42, %v3595_v41  ;;  %v785_v31 = vsel %vm777_vm3, %v783_v5, %v784_v7  ;;  %v796_v20 = vrot.slane %v543_v12, 1 }
  0x81   : > { %524 = vst.msk [vmem:[#allocation2 + $0x1e8] sm:$0xff] %vm495_vm2, %v490_v36  ;;  %v3605_v44 = vld [vmem:[#allocation2 + $0x150] sm:$0xff]  ;;  %v787_v36 = vsel %vm777_vm3, %v784_v7, %v786_v9  ;;  %v792_v5 = vsel %vm777_vm3, %v789_v25, %v791_v28  ;;  %v798_v7 = vrot.slane %v3454_v13, 1  ;;  %v799_v9 = vrot.slane %v3460_v18, 1 }
  0x82   : > { %2508 = vrot.lane.b32.xlu1 %v3584_v37, %s3154_s17  ;;  %525 = vst.msk [vmem:[#allocation2 + $0x1f0] sm:$0xff] %vm495_vm2, %v491_v38  ;;  %v3613_v48 = vld [vmem:[#allocation2 + $0x188] sm:$0xff]  ;;  %v3619_v50 = vpack.i.bf16 %v3605_v44, %v3603_v43  ;;  %v547_v38 = vld [vmem:[#allocation2 + $0x98] sm:$0x1] }
  0x83   : > { %5165 = vst [vmem:[#allocation3_spill] sm:$0xff] %v3611_v47  ;;  %v3615_v49 = vld [vmem:[#allocation2 + $0x190] sm:$0xff] }
  0x84   : > { %2518 = vrot.lane.b32.xlu0 %v3592_v39, %s3154_s17  ;;  %5166 = vst [vmem:[#allocation4_spill] sm:$0xff] %v3619_v50  ;;  %v3625_v52 = vpack.i.bf16 %v3615_v49, %v3613_v48  ;;  %v3627_v53 = vld [vmem:[#allocation2 + $0x1c8] sm:$0xff] }
  0x85   : > { %v3629_v54 = vld [vmem:[#allocation2 + $0x1d0] sm:$0xff] }
  0x86   : > { %5167 = vst [vmem:[#allocation5_spill] sm:$0xff] %v3625_v52  ;;  %v3633_v58 = vld [vmem:[#allocation2 + $0x1a8] sm:$0xff]  ;;  %v3641_v60 = vpack.i.bf16 %v3629_v54, %v3627_v53 }
  0x87   : > { %v3635_v59 = vld [vmem:[#allocation2 + $0x1b0] sm:$0xff] }
  0x88   : > { %2528 = vrot.lane.b32.xlu2 %v3611_v47, %s3154_s17  ;;  %5168 = vst [vmem:[#allocation6_spill] sm:$0xff] %v3641_v60  ;;  %v3643_v63 = vld [vmem:[#allocation2 + $0x1e8] sm:$0xff]  ;;  %v3651_v11 = vpack.i.bf16 %v3635_v59, %v3633_v58  ;;  %v3672_v47 = vpack.i.bf16 %v787_v36, %v785_v31  ;;  %v800_v31 = vsel %vm777_vm3, %v798_v7, %v799_v9  ;;  %v813_v7 = vrot.slane %v3565_v26, 1 }
  0x89   : > { %v3645_v0 = vld [vmem:[#allocation2 + $0x1f0] sm:$0xff] }
  0x8a   : > { %2523 = vrot.lane.b32.xlu1 %v3619_v50, %s3154_s17  ;;  %5169 = vst [vmem:[#allocation7_spill] sm:$0xff] %v3651_v11  ;;  %v3659_v21 = vpack.i.bf16 %v3645_v0, %v3643_v63  ;;  %v551_v50 = vld [vmem:[#allocation2 + $0xb8] sm:$0x1] }
  0x8b   : > { %5171 = vst [vmem:[#allocation9_spill] sm:$0xff] %v3672_v47  ;;  %v806_v28 = vrot.slane %v551_v50, 1 }
  0x8c   : > { %2533 = vrot.lane.b32.xlu0 %v3625_v52, %s3154_s17  ;;  %5170 = vst [vmem:[#allocation8_spill] sm:$0xff] %v3659_v21  ;;  %v2552_v52 = vpack.i.bf16 %v782_v62, %v780_v55  ;;  %v795_v55 = vsel %vm777_vm3, %v793_v16, %v794_v15  ;;  %v563_v16 = vld [vmem:[#allocation2 + $0x118] sm:$0x1] }
  0x90   : > { %2543 = vrot.lane.b32.xlu2 %v3641_v60, %s3154_s17  ;;  %v790_v60 = vsel %vm777_vm3, %v788_v22, %v789_v25  ;;  %v803_v22 = vrot.slane %v3506_v46, 1  ;;  %v804_v25 = vrot.slane %v3512_v51, 1 }
  0x92   : > { %2538 = vrot.lane.b32.xlu1 %v3651_v11, %s3154_s17  ;;  %v801_v11 = vrot.slane %v547_v38, 1  ;;  %v559_v38 = vld [vmem:[#allocation2 + $0xf8] sm:$0x1]  ;;  %v805_v62 = vsel %vm777_vm3, %v803_v22, %v804_v25  ;;  %v807_v50 = vsel %vm777_vm3, %v804_v25, %v806_v28  ;;  %v818_v22 = vrot.slane %v3555_v17, 1 }
  0x93   : > { %v819_v25 = vrot.slane %v3557_v19, 1  ;;  %v821_v28 = vrot.slane %v563_v16, 1 }
  0x94   : > { %2548 = vrot.lane.b32.xlu0 %v3659_v21, %s3154_s17  ;;  %v3679_v21 = vpack.i.bf16 %v792_v5, %v790_v60  ;;  %v802_v36 = vsel %vm777_vm3, %v799_v9, %v801_v11  ;;  %v797_v60 = vsel %vm777_vm3, %v794_v15, %v796_v20  ;;  %v555_v5 = vld [vmem:[#allocation2 + $0xd8] sm:$0x1]  ;;  %v814_v11 = vrot.slane %v3567_v27, 1 }
  0x95   : > { %v3693_v12 = vpack.i.bf16 %v802_v36, %v800_v31  ;;  %v3698_v9 = vpack.i.bf16 %v797_v60, %v795_v55  ;;  %v808_v15 = vrot.slane %v3538_v4, 1  ;;  %v809_v20 = vrot.slane %v3543_v10, 1 }
  0x96   : > { %5172 = vst [vmem:[#allocation10_spill] sm:$0xff] %v3679_v21  ;;  %v815_v31 = vsel %vm777_vm3, %v813_v7, %v814_v11  ;;  %v822_v7 = vsel %vm777_vm3, %v819_v25, %v821_v28 }
  0x97   : > { %5173 = vst [vmem:[#allocation11_spill] sm:$0xff] %v3693_v12  ;;  %v810_v55 = vsel %vm777_vm3, %v808_v15, %v809_v20  ;;  %v575_v15 = vld [vmem:[#allocation2 + $0x178] sm:$0x1] }
  0x98   : > { %2558 = vrot.lane.b32.xlu2 %v3672_v47, %s3155_s20  ;;  %5174 = vst [vmem:[#allocation12_spill] sm:$0xff] %v3698_v9  ;;  %v811_v47 = vrot.slane %v555_v5, 1  ;;  %v836_v28 = vrot.slane %v575_v15, 1 }
  0x9a   : > { %2553 = vrot.lane.b32.xlu1 %v2552_v52, %s3155_s20  ;;  %v816_v52 = vrot.slane %v559_v38, 1  ;;  %v571_v38 = vld [vmem:[#allocation2 + $0x158] sm:$0x1]  ;;  %v812_v60 = vsel %vm777_vm3, %v809_v20, %v811_v47  ;;  %v823_v47 = vrot.slane %v3577_v32, 1  ;;  %v824_v20 = vrot.slane %v3579_v33, 1 }
  0x9b   : > { %v831_v16 = vrot.slane %v571_v38, 1  ;;  %v583_v38 = vld [vmem:[#allocation2 + $0x1b8] sm:$0x1] }
  0x9c   : > { %2563 = vrot.lane.b32.xlu0 %v3679_v21, %s3155_s20  ;;  %v3702_v21 = vpack.i.bf16 %v807_v50, %v805_v62  ;;  %v817_v36 = vsel %vm777_vm3, %v814_v11, %v816_v52  ;;  %v820_v62 = vsel %vm777_vm3, %v818_v22, %v819_v25  ;;  %v567_v50 = vld [vmem:[#allocation2 + $0x138] sm:$0x1]  ;;  %v828_v11 = vrot.slane %v3603_v43, 1 }
  0x9d   : > { %v3717_v5 = vpack.i.bf16 %v817_v36, %v815_v31  ;;  %v829_v52 = vrot.slane %v3605_v44, 1  ;;  %v833_v22 = vrot.slane %v3595_v41, 1  ;;  %v834_v25 = vrot.slane %v3597_v42, 1 }
  0x9e   : > { %5175 = vst [vmem:[#allocation13_spill] sm:$0xff] %v3702_v21  ;;  %v846_v15 = vrot.slane %v583_v38, 1  ;;  %v532_v38 = vld [vmem:[#allocation2 + $0x20] sm:$0xff] }
  0x9f   : > { %5176 = vst [vmem:[#allocation14_spill] sm:$0xff] %v3717_v5  ;;  %v830_v31 = vsel %vm777_vm3, %v828_v11, %v829_v52  ;;  %v832_v36 = vsel %vm777_vm3, %v829_v52, %v831_v16  ;;  %v837_v11 = vsel %vm777_vm3, %v834_v25, %v836_v28  ;;  %v843_v52 = vrot.slane %v3633_v58, 1 }
  0xa0   : > { %2573 = vrot.lane.b32.xlu2 %v3693_v12, %s3155_s20  ;;  %v3722_v12 = vpack.i.bf16 %v812_v60, %v810_v55  ;;  %v825_v55 = vsel %vm777_vm3, %v823_v47, %v824_v20  ;;  %v844_v16 = vrot.slane %v3635_v59, 1  ;;  %v587_v47 = vld [vmem:[#allocation2 + $0x1d8] sm:$0x1] }
  0xa1   : > { %v851_v28 = vrot.slane %v587_v47, 1  ;;  %v536_v47 = vld [vmem:[#allocation2 + $0x40] sm:$0xff] }
  0xa2   : > { %2568 = vrot.lane.b32.xlu1 %v3698_v9, %s3155_s20  ;;  %5177 = vst [vmem:[#allocation15_spill] sm:$0xff] %v3722_v12  ;;  %v3726_v9 = vpack.i.bf16 %v822_v7, %v820_v62  ;;  %v835_v62 = vsel %vm777_vm3, %v833_v22, %v834_v25  ;;  %v579_v7 = vld [vmem:[#allocation2 + $0x198] sm:$0x1]  ;;  %v848_v22 = vrot.slane %v3627_v53, 1  ;;  %v849_v25 = vrot.slane %v3629_v54, 1 }
  0xa4   : > { %2578 = vrot.lane.b32.xlu0 %v3702_v21, %s3155_s20  ;;  %v826_v21 = vrot.slane %v567_v50, 1  ;;  %5178 = vst [vmem:[#allocation16_spill] sm:$0xff] %v3726_v9  ;;  %v3741_v50 = vpack.i.bf16 %v832_v36, %v830_v31  ;;  %v845_v31 = vsel %vm777_vm3, %v843_v52, %v844_v16  ;;  %v847_v36 = vsel %vm777_vm3, %v844_v16, %v846_v15 }
  0xa5   : > { %v852_v52 = vsel %vm777_vm3, %v849_v25, %v851_v28  ;;  %v654_v16 = vrot.slane %v532_v38, 7  ;;  %v655_v15 = vrot.slane %v3488_v35, 7  ;;  %v650_v28 = vrot.slane %v3374_v1, 7 }
  0xa6   : > { %v827_v60 = vsel %vm777_vm3, %v824_v20, %v826_v21  ;;  %5179 = vst [vmem:[#allocation17_spill] sm:$0xff] %v3741_v50  ;;  %v838_v21 = vrot.slane %v3613_v48, 1  ;;  %v839_v20 = vrot.slane %v3615_v49, 1  ;;  %v662_v35 = vrot.slane %v3476_v29, 7 }
  0xa8   : > { %2588 = vrot.lane.b32.xlu2 %v3717_v5, %s3155_s20  ;;  %v3746_v5 = vpack.i.bf16 %v827_v60, %v825_v55  ;;  %v840_v55 = vsel %vm777_vm3, %v838_v21, %v839_v20  ;;  %v657_v21 = vrot.slane %v3494_v40, 7  ;;  %v388_v40 = vld [vmem:[%s3213_s30 + $0xf0] sm:$0xff] }
  0xaa   : > { %2583 = vrot.lane.b32.xlu1 %v3722_v12, %s3155_s20  ;;  %v3750_v12 = vpack.i.bf16 %v837_v11, %v835_v62  ;;  %v850_v62 = vsel %vm777_vm3, %v848_v22, %v849_v25  ;;  %v591_v11 = vld [vmem:[#allocation2 + $0x1f8] sm:$0x1]  ;;  %v652_v25 = vrot.slane %v3376_v2, 7  ;;  %v544_v2 = vld [vmem:[#allocation2 + $0x80] sm:$0xff] }
  0xab   : > { %v856_v22 = vrot.slane %v591_v11, 1  ;;  %v3777_v38 = vpack.i.bf16 %v852_v52, %v850_v62  ;;  %v3788_v11 = vsel %vm648_vm4, %v655_v15, %v657_v21 }
  0xac   : > { %2593 = vrot.lane.b32.xlu0 %v3726_v9, %s3155_s20  ;;  %v841_v9 = vrot.slane %v579_v7, 1  ;;  %v3765_v7 = vpack.i.bf16 %v847_v36, %v845_v31  ;;  %v659_v31 = vrot.slane %v536_v47, 7  ;;  %v660_v36 = vrot.slane %v3470_v24, 7 }
  0xad   : > { %5182 = vst [vmem:[#allocation20_spill] sm:$0xff] %v3777_v38  ;;  %v424_v24 = vmul.f32 %v3385_v6, %v388_v40  ;;  %v540_v40 = vld [vmem:[#allocation2 + $0x60] sm:$0xff] }
  0xae   : > { %v842_v60 = vsel %vm777_vm3, %v839_v20, %v841_v9  ;;  %5180 = vst [vmem:[#allocation18_spill] sm:$0xff] %v3765_v7  ;;  %v853_v9 = vrot.slane %v3643_v63, 1  ;;  %v854_v20 = vrot.slane %v3645_v0, 1  ;;  %v3797_v52 = vsel %vm648_vm4, %v659_v31, %v660_v36 }
  0xaf   : > { %v670_v31 = vrot.slane %v3454_v13, 7 }
  0xb0   : > { %2603 = vrot.lane.b32.xlu2 %v3741_v50, %s3155_s20  ;;  %v3770_v50 = vpack.i.bf16 %v842_v60, %v840_v55  ;;  %v389_v55 = vld [vmem:[%s3213_s30 + $0xf8] sm:$0xff]  ;;  %v3785_v60 = vsel %vm648_vm4, %v654_v16, %v655_v15  ;;  %v855_v47 = vsel %vm777_vm3, %v853_v9, %v854_v20  ;;  %v857_v29 = vsel %vm777_vm3, %v854_v20, %v856_v22  ;;  %v548_v20 = vld [vmem:[#allocation2 + $0xa0] sm:$0xff] }
  0xb1   : > { %v425_v62 = vmul.f32 %v3385_v6, %v389_v55  ;;  %v460_v16 = vadd.f32 %v3392_v8, %v424_v24  ;;  %v3803_v15 = vsel %vm648_vm4, %v660_v36, %v662_v35  ;;  %v2632_v21 = vpack.i.bf16 %v3788_v11, %v3785_v60 }
  0xb2   : > { %2598 = vrot.lane.b32.xlu1 %v3746_v5, %s3155_s20  ;;  %5181 = vst [vmem:[#allocation19_spill] sm:$0xff] %v3770_v50  ;;  %v3810_v6 = vsel %vm648_vm4, %v650_v28, %v652_v25  ;;  %v669_v22 = vrot.slane %v544_v2, 7  ;;  %v672_v55 = vrot.slane %v3460_v18, 7  ;;  %v3815_v36 = vpack.i.bf16 %v857_v29, %v855_v47  ;;  %v556_v2 = vld [vmem:[#allocation2 + $0xe0] sm:$0xff] }
  0xb3   : > { %v461_v9 = vadd.f32 %v3392_v8, %v425_v62  ;;  %v492_v24 = vmax.f32 %v460_v16, 0.0  ;;  %v3822_v8 = vpack.i.bf16 %v3803_v15, %v3797_v52  ;;  %v674_v13 = vrot.slane %v548_v20, 7  ;;  %v552_v29 = vld [vmem:[#allocation2 + $0xc0] sm:$0xff] }
  0xb4   : > { %2608 = vrot.lane.b32.xlu0 %v3750_v12, %s3155_s20  ;;  %v675_v18 = vrot.slane %v3506_v46, 7  ;;  %v677_v25 = vrot.slane %v3512_v51, 7  ;;  %v680_v20 = vrot.slane %v3538_v4, 7  ;;  %v528_v4 = vld [vmem:[#allocation2] sm:$0xff] }
  0xb5   : > { %v493_v35 = vmax.f32 %v461_v9, 0.0  ;;  %526 = vst.msk [vmem:[#allocation2 + $0x208] sm:$0xff] %vm495_vm2, %v492_v24  ;;  %v679_v9 = vrot.slane %v552_v29, 7  ;;  %v564_v29 = vld [vmem:[#allocation2 + $0x120] sm:$0xff] }
  0xb6   : > { %v3845_v46 = vsel %vm648_vm4, %v674_v13, %v675_v18  ;;  %v3852_v16 = vsel %vm648_vm4, %v675_v18, %v677_v25  ;;  %v568_v13 = vld [vmem:[#allocation2 + $0x140] sm:$0xff] }
  0xb7   : > { %527 = vst.msk [vmem:[#allocation2 + $0x210] sm:$0xff] %vm495_vm2, %v493_v35  ;;  %v3881_v18 = vsel %vm648_vm4, %v679_v9, %v680_v20  ;;  %v702_v9 = vrot.slane %v3605_v44, 7  ;;  %v707_v44 = vrot.slane %v3597_v42, 7 }
  0xb8   : > { %2618 = vrot.lane.b32.xlu2 %v3765_v7, %s3155_s20  ;;  %v664_v7 = vrot.slane %v540_v40, 7  ;;  %v685_v40 = vrot.slane %v3565_v26, 7  ;;  %v690_v26 = vrot.slane %v3555_v17, 7 }
  0xba   : > { %2613 = vrot.lane.b32.xlu1 %v3770_v50, %s3155_s20  ;;  %v667_v50 = vrot.slane %v3529_v61, 7  ;;  %v3832_v61 = vsel %vm648_vm4, %v670_v31, %v672_v55 }
  0xbc   : > { %2623 = vrot.lane.b32.xlu0 %v3777_v38, %s3155_s20  ;;  %v665_v38 = vrot.slane %v3524_v57, 7  ;;  %v3829_v57 = vsel %vm648_vm4, %v669_v22, %v670_v31  ;;  %v682_v22 = vrot.slane %v3543_v10, 7  ;;  %v3864_v31 = vpack.i.bf16 %v3852_v16, %v3845_v46 }
  0xbd   : > { %v3849_v51 = vpack.i.bf16 %v3832_v61, %v3829_v57 }
  0xbe   : > { %v3837_v62 = vsel %vm648_vm4, %v664_v7, %v665_v38  ;;  %v3840_v47 = vsel %vm648_vm4, %v665_v38, %v667_v50  ;;  %v684_v7 = vrot.slane %v556_v2, 7  ;;  %v687_v50 = vrot.slane %v3567_v27, 7  ;;  %5185 = vst [vmem:[#allocation23_spill] sm:$0xff] %v3864_v31 }
  0xbf   : > { %5183 = vst [vmem:[#allocation21_spill] sm:$0xff] %v3849_v51  ;;  %v3858_v38 = vpack.i.bf16 %v3840_v47, %v3837_v62  ;;  %v692_v27 = vrot.slane %v3557_v19, 7  ;;  %v3884_v17 = vsel %vm648_vm4, %v680_v20, %v682_v22 }
  0xc0   : > { %2633 = vrot.lane.b32.xlu2 %v2632_v21, %s3156_s21  ;;  %v560_v21 = vld [vmem:[#allocation2 + $0x100] sm:$0xff]  ;;  %v3871_v24 = vsel %vm648_vm4, %v684_v7, %v685_v40  ;;  %v3874_v35 = vsel %vm648_vm4, %v685_v40, %v687_v50  ;;  %v699_v40 = vrot.slane %v568_v13, 7  ;;  %v700_v50 = vrot.slane %v3603_v43, 7 }
  0xc1   : > { %5184 = vst [vmem:[#allocation22_spill] sm:$0xff] %v3858_v38  ;;  %v689_v55 = vrot.slane %v560_v21, 7  ;;  %v3892_v25 = vsel %vm648_vm4, %v690_v26, %v692_v27  ;;  %v3896_v2 = vpack.i.bf16 %v3874_v35, %v3871_v24  ;;  %v649_v21 = vrot.slane %v528_v4, 7  ;;  %v572_v7 = vld [vmem:[#allocation2 + $0x160] sm:$0xff] }
  0xc2   : > { %2628 = vrot.lane.b32.xlu1 %v3815_v36, %s3155_s20  ;;  %v3902_v20 = vpack.i.bf16 %v3884_v17, %v3881_v18  ;;  %v697_v27 = vrot.slane %v3579_v33, 7  ;;  %v704_v4 = vrot.slane %v572_v7, 7  ;;  %v705_v43 = vrot.slane %v3595_v41, 7  ;;  %v580_v41 = vld [vmem:[#allocation2 + $0x1a0] sm:$0xff] }
  0xc3   : > { %v3889_v19 = vsel %vm648_vm4, %v689_v55, %v690_v26  ;;  %5186 = vst [vmem:[#allocation24_spill] sm:$0xff] %v3896_v2  ;;  %v694_v55 = vrot.slane %v564_v29, 7  ;;  %v695_v26 = vrot.slane %v3577_v32, 7  ;;  %v3921_v32 = vsel %vm648_vm4, %v700_v50, %v702_v9  ;;  %v576_v9 = vld [vmem:[#allocation2 + $0x180] sm:$0xff] }
  0xc4   : > { %2638 = vrot.lane.b32.xlu0 %v3822_v8, %s3156_s21  ;;  %5187 = vst [vmem:[#allocation25_spill] sm:$0xff] %v3902_v20  ;;  %v3906_v22 = vpack.i.bf16 %v3892_v25, %v3889_v19 }
  0xc5   : > { %v3928_v42 = vsel %vm648_vm4, %v694_v55, %v695_v26  ;;  %v3931_v1 = vsel %vm648_vm4, %v695_v26, %v697_v27  ;;  %v3950_v55 = vsel %vm648_vm4, %v705_v43, %v707_v44  ;;  %v714_v26 = vrot.slane %v580_v41, 7 }
  0xc6   : > { %5188 = vst [vmem:[#allocation26_spill] sm:$0xff] %v3906_v22  ;;  %v715_v27 = vrot.slane %v3633_v58, 7  ;;  %v720_v58 = vrot.slane %v3627_v53, 7 }
  0xc8   : > { %2648 = vrot.lane.b32.xlu2 %v3849_v51, %s3156_s21  ;;  %v3918_v51 = vsel %vm648_vm4, %v699_v40, %v700_v50  ;;  %v3943_v40 = vsel %vm648_vm4, %v704_v4, %v705_v43  ;;  %v709_v4 = vrot.slane %v576_v9, 7  ;;  %v3969_v44 = vsel %vm648_vm4, %v714_v26, %v715_v27  ;;  %v3978_v9 = vld [vmem:[#allocation2 + $0x208] sm:$0xff] }
  0xc9   : > { %v3947_v50 = vpack.i.bf16 %v3921_v32, %v3918_v51 }
  0xca   : > { %2643 = vrot.lane.b32.xlu1 %v3858_v38, %s3156_s21  ;;  %v3878_v10 = vpop.permute.xlu2 %2493 }
  0xcb   : > { %5189 = vst [vmem:[#allocation27_spill] sm:$0xff] %v3947_v50 }
  0xcc   : > { %2653 = vrot.lane.b32.xlu0 %v3864_v31, %s3156_s21  ;;  %v651_v31 = vsel %vm648_vm4, %v649_v21, %v650_v28 }
  0xd0   : > { %2663 = vrot.lane.b32.xlu2 %v3896_v2, %s3156_s21  ;;  %v3980_v2 = vld [vmem:[#allocation2 + $0x210] sm:$0xff] }
  0xd2   : > { %v2474_v13 = vpop.permute.xlu0 %2473  ;;  %2658 = vrot.lane.b32.xlu1 %v3902_v20, %s3156_s21  ;;  %v3925_v7 = vpop.permute.xlu2 %2498  ;;  %v2495_v20 = vunpack.i.l.bf16 %v3878_v10 }
  0xd3   : > { %v2476_v33 = vunpack.i.h.bf16 %v2474_v13  ;;  %v2475_v29 = vunpack.i.l.bf16 %v2474_v13  ;;  %v3956_v13 = vpack.i.bf16 %v3931_v1, %v3928_v42 }
  0xd4   : > { %2668 = vrot.lane.b32.xlu0 %v3906_v22, %s3156_s21  ;;  %v3962_v22 = vpack.i.bf16 %v3950_v55, %v3943_v40 }
  0xd5   : > { %v3934_v28 = vsel %vm495_vm2, %v651_v31, %v2475_v29  ;;  %v3938_v21 = vsel %vm495_vm2, %v3810_v6, %v2476_v33  ;;  %v584_v31 = vld [vmem:[#allocation2 + $0x1c0] sm:$0xff]  ;;  %v717_v6 = vrot.slane %v3635_v59, 7  ;;  %5190 = vst [vmem:[#allocation28_spill] sm:$0xff] %v3956_v13  ;;  %v710_v33 = vrot.slane %v3613_v48, 7 }
  0xd6   : > { %v712_v29 = vrot.slane %v3615_v49, 7  ;;  %5191 = vst [vmem:[#allocation29_spill] sm:$0xff] %v3962_v22  ;;  %v719_v43 = vrot.slane %v584_v31, 7  ;;  %v722_v59 = vrot.slane %v3629_v54, 7  ;;  %v592_v49 = vld [vmem:[#allocation2 + $0x200] sm:$0xff] }
  0xd7   : > { %v3972_v41 = vsel %vm648_vm4, %v715_v27, %v717_v6  ;;  %v3983_v53 = vsel %vm648_vm4, %v709_v4, %v710_v33  ;;  %v588_v27 = vld [vmem:[#allocation2 + $0x1e0] sm:$0xff]  ;;  %v862_v4 = vrot.slane %v3978_v9, 7 }
  0xd8   : > { %2678 = vrot.lane.b32.xlu2 %v3947_v50, %s3156_s21  ;;  %v3986_v54 = vsel %vm648_vm4, %v710_v33, %v712_v29  ;;  %v3991_v31 = vsel %vm648_vm4, %v719_v43, %v720_v58  ;;  %v3995_v26 = vpack.i.bf16 %v3972_v41, %v3969_v44  ;;  %v3998_v6 = vsel %vm648_vm4, %v720_v58, %v722_v59 }
  0xd9   : > { %v864_v33 = vrot.slane %v3980_v2, 7  ;;  %v4004_v29 = vpack.i.bf16 %v3986_v54, %v3983_v53  ;;  %v725_v43 = vrot.slane %v3643_v63, 7  ;;  %v727_v50 = vrot.slane %v3645_v0, 7 }
  0xda   : > { %2673 = vrot.lane.b32.xlu1 %v3956_v13, %s3156_s21  ;;  %v3976_v48 = vpop.permute.xlu2 %2513  ;;  %5192 = vst [vmem:[#allocation30_spill] sm:$0xff] %v3995_v26  ;;  %v861_v13 = vrot.slane %v592_v49, 7  ;;  %v4010_v38 = vpack.i.bf16 %v3998_v6, %v3991_v31 }
  0xdb   : > { %5193 = vst [vmem:[#allocation31_spill] sm:$0xff] %v4004_v29  ;;  %v865_v59 = vsel %vm648_vm4, %v862_v4, %v864_v33  ;;  %v4024_v0 = vsel %vm648_vm4, %v725_v43, %v727_v50 }
  0xdc   : > { %2683 = vrot.lane.b32.xlu0 %v3962_v22, %s3156_s21  ;;  %v724_v22 = vrot.slane %v588_v27, 7  ;;  %5194 = vst [vmem:[#allocation32_spill] sm:$0xff] %v4010_v38  ;;  %v863_v58 = vsel %vm648_vm4, %v861_v13, %v862_v4 }
  0xde   : > { %v4021_v63 = vsel %vm648_vm4, %v724_v22, %v725_v43 }
  0xdf   : > { %v4034_v4 = vpack.i.bf16 %v4024_v0, %v4021_v63 }
  0xe0   : > { %2693 = vrot.lane.b32.xlu2 %v3995_v26, %s3156_s21  ;;  %v4030_v26 = vpack.i.bf16 %v865_v59, %v863_v58 }
  0xe1   : > { %5196 = vst [vmem:[#allocation34_spill] sm:$0xff] %v4034_v4 }
  0xe2   : > { %2688 = vrot.lane.b32.xlu1 %v4004_v29, %s3156_s21  ;;  %v4018_v49 = vpop.permute.xlu2 %2528  ;;  %5195 = vst [vmem:[#allocation33_spill] sm:$0xff] %v4030_v26 }
  0xe4   : > { %2698 = vrot.lane.b32.xlu0 %v4010_v38, %s3156_s21  ;;  %v4028_v27 = vpop.permute.xlu1 %2483 }
  0xe6   : > { %v2479_v13 = vpop.permute.xlu0 %2478 }
  0xe7   : > { %v2481_v43 = vunpack.i.h.bf16 %v2479_v13  ;;  %v2480_v58 = vunpack.i.l.bf16 %v2479_v13 }
  0xe8   : > { %2708 = vrot.lane.b32.xlu2 %v4030_v26, %s3156_s21 }
  0xea   : > { %2703 = vrot.lane.b32.xlu1 %v4034_v4, %s3156_s21  ;;  %v4040_v22 = vpop.permute.xlu2 %2543  ;;  %v1656_v4 = vsel %vm495_vm2, %v3785_v60, %v2480_v58 }
  0xec   : > { %2713 = vrot.lane.b32.xlu0 %v3504_v45, %s3157_s22  ;;  %v4044_v50 = vpop.permute.xlu1 %2488  ;;  %v1657_v45 = vsel %vm495_vm2, %v3788_v11, %v2481_v43 }
  0xee   : > { %v4046_v33 = vpop.permute.xlu0 %2503 }
  0xf0   : > { %2723 = vrot.lane.b32.xlu2 %v3536_v3, %s3157_s22 }
  0xf2   : > { %2718 = vrot.lane.b32.xlu1 %v3486_v34, %s3157_s22  ;;  %v2559_v59 = vpop.permute.xlu2 %2558 }
  0xf3   : > { %v2561_v26 = vunpack.i.h.bf16 %v2559_v59  ;;  %v2560_v29 = vunpack.i.l.bf16 %v2559_v59  ;;  %v2496_v59 = vunpack.i.h.bf16 %v3878_v10 }
  0xf4   : > { %2728 = vrot.lane.b32.xlu0 %v3468_v23, %s3157_s22  ;;  %v2509_v13 = vpop.permute.xlu1 %2508 }
  0xf5   : > { %v4059_v38 = vsel %vm1686_vm5, %v1656_v4, %v2560_v29  ;;  %v4062_v3 = vsel %vm1686_vm5, %v1657_v45, %v2561_v26  ;;  %v1662_v29 = vsel %vm495_vm2, %v3829_v57, %v2495_v20  ;;  %v1663_v26 = vsel %vm495_vm2, %v3832_v61, %v2496_v59  ;;  %v5197_v59 = vld [vmem:[#allocation4_spill] sm:$0xff] }
  0xf6   : > { %v4064_v34 = vpop.permute.xlu0 %2518  ;;  %v2511_v43 = vunpack.i.h.bf16 %v2509_v13  ;;  %v2510_v58 = vunpack.i.l.bf16 %v2509_v13 }
  0xf8   : > { %2738 = vrot.lane.b32.xlu2 %v3551_v14, %s3157_s22  ;;  %v1669_v20 = vsel %vm495_vm2, %v3874_v35, %v2511_v43  ;;  %v1668_v45 = vsel %vm495_vm2, %v3871_v24, %v2510_v58  ;;  %v2485_v35 = vunpack.i.l.bf16 %v4028_v27  ;;  %v5199_v24 = vld [vmem:[#allocation3_spill] sm:$0xff] }
  0xfa   : > { %2733 = vrot.lane.b32.xlu1 %v3522_v56, %s3157_s22  ;;  %v2574_v23 = vpop.permute.xlu2 %2573 }
  0xfb   : > { %v2576_v60 = vunpack.i.h.bf16 %v2574_v23  ;;  %v2575_v11 = vunpack.i.l.bf16 %v2574_v23 }
  0xfc   : > { %2743 = vrot.lane.b32.xlu0 %v3584_v37, %s3157_s22  ;;  %v2524_v4 = vpop.permute.xlu1 %2523 }
  0xfd   : > { %v4079_v10 = vsel %vm1686_vm5, %v1663_v26, %v2576_v60  ;;  %v4082_v14 = vsel %vm1686_vm5, %v1662_v29, %v2575_v11  ;;  %v2526_v60 = vunpack.i.h.bf16 %v2524_v4  ;;  %v2525_v11 = vunpack.i.l.bf16 %v2524_v4  ;;  %v5198_v29 = vld [vmem:[#allocation5_spill] sm:$0xff]  ;;  %v5200_v4 = vld [vmem:[#allocation7_spill] sm:$0xff] }
  0xfe   : > { %v4084_v56 = vpop.permute.xlu0 %2533 }
 0x100   : > { %2753 = vrot.lane.b32.xlu2 %v3592_v39, %s3157_s22 }
 0x102   : > { %2748 = vrot.lane.b32.xlu1 %v3574_v30, %s3157_s22  ;;  %v2589_v57 = vpop.permute.xlu2 %2588 }
 0x103   : > { %v2591_v61 = vunpack.i.h.bf16 %v2589_v57  ;;  %v2590_v37 = vunpack.i.l.bf16 %v2589_v57  ;;  %v2486_v57 = vunpack.i.h.bf16 %v4028_v27  ;;  %v1658_v27 = vsel %vm495_vm2, %v3797_v52, %v2485_v35 }
 0x104   : > { %2758 = vrot.lane.b32.xlu0 %v5197_v59, %s3157_s22  ;;  %v2539_v23 = vpop.permute.xlu1 %2538  ;;  %v2490_v35 = vunpack.i.l.bf16 %v4044_v50 }
 0x105   : > { %v4097_v13 = vsel %vm1686_vm5, %v1669_v20, %v2591_v61  ;;  %v4100_v39 = vsel %vm1686_vm5, %v1668_v45, %v2590_v37  ;;  %v1675_v61 = vsel %vm495_vm2, %v3921_v32, %v2526_v60  ;;  %v1674_v37 = vsel %vm495_vm2, %v3918_v51, %v2525_v11 }
 0x106   : > { %v4102_v30 = vpop.permute.xlu0 %2548 }
 0x108   : > { %2768 = vrot.lane.b32.xlu2 %v5198_v29, %s3157_s22 }
 0x10a   : > { %2763 = vrot.lane.b32.xlu1 %v5199_v24, %s3157_s22  ;;  %v2604_v26 = vpop.permute.xlu2 %2603 }
 0x10b   : > { %v2606_v43 = vunpack.i.h.bf16 %v2604_v26  ;;  %v2605_v58 = vunpack.i.l.bf16 %v2604_v26 }
 0x10c   : > { %2773 = vrot.lane.b32.xlu0 %v5200_v4, %s3157_s22  ;;  %v2554_v20 = vpop.permute.xlu1 %2553  ;;  %v1659_v4 = vsel %vm495_vm2, %v3803_v15, %v2486_v57  ;;  %v5202_v15 = vld [vmem:[#allocation6_spill] sm:$0xff]  ;;  %v2501_v57 = vunpack.i.h.bf16 %v3925_v7 }
 0x10d   : > { %v2556_v45 = vunpack.i.h.bf16 %v2554_v20  ;;  %v2555_v59 = vunpack.i.l.bf16 %v2554_v20  ;;  %v4117_v29 = vsel %vm1686_vm5, %v1675_v61, %v2606_v43  ;;  %v4120_v24 = vsel %vm1686_vm5, %v1674_v37, %v2605_v58  ;;  %v5201_v37 = vld [vmem:[#allocation8_spill] sm:$0xff] }
 0x10e   : > { %v2564_v26 = vpop.permute.xlu0 %2563  ;;  %v2541_v43 = vunpack.i.h.bf16 %v2539_v23  ;;  %v2540_v61 = vunpack.i.l.bf16 %v2539_v23  ;;  %v2787_v58 = vpack.i.bf16 %v3980_v2, %v3978_v9  ;;  %v2500_v20 = vunpack.i.l.bf16 %v3925_v7 }
 0x10f   : > { %v1688_v32 = vsel %vm1686_vm5, %v3938_v21, %v2556_v45  ;;  %v1687_v51 = vsel %vm1686_vm5, %v3934_v28, %v2555_v59  ;;  %v2566_v60 = vunpack.i.h.bf16 %v2564_v26  ;;  %v2565_v11 = vunpack.i.l.bf16 %v2564_v26 }
 0x110   : > { %2783 = vrot.lane.b32.xlu2 %v5201_v37, %s3157_s22  ;;  %v2491_v28 = vunpack.i.h.bf16 %v4044_v50  ;;  %v1681_v45 = vsel %vm495_vm2, %v3972_v41, %v2541_v43  ;;  %v1680_v59 = vsel %vm495_vm2, %v3969_v44, %v2540_v61  ;;  %v1660_v41 = vsel %vm495_vm2, %v3837_v62, %v2490_v35 }
 0x111   : > { %v4135_v52 = vsel %vm1686_vm5, %v1659_v4, %v2566_v60  ;;  %v4138_v21 = vsel %vm1686_vm5, %v1658_v27, %v2565_v11  ;;  %v1665_v37 = vsel %vm495_vm2, %v3852_v16, %v2501_v57  ;;  %v2505_v35 = vunpack.i.l.bf16 %v4046_v33 }
 0x112   : > { %2778 = vrot.lane.b32.xlu1 %v5202_v15, %s3157_s22  ;;  %v2619_v23 = vpop.permute.xlu2 %2618  ;;  %v1661_v7 = vsel %vm495_vm2, %v3840_v47, %v2491_v28  ;;  %v1664_v15 = vsel %vm495_vm2, %v3845_v46, %v2500_v20  ;;  %v2506_v28 = vunpack.i.h.bf16 %v4046_v33  ;;  %v2515_v20 = vunpack.i.l.bf16 %v3976_v48 }
 0x113   : > { %v2621_v2 = vunpack.i.h.bf16 %v2619_v23  ;;  %v2620_v9 = vunpack.i.l.bf16 %v2619_v23  ;;  %v5203_v23 = vld [vmem:[#allocation10_spill] sm:$0xff] }
 0x114   : > { %2788 = vrot.lane.b32.xlu0 %v2787_v58, %s3157_s22  ;;  %v2569_v27 = vpop.permute.xlu1 %2568 }
 0x115   : > { %v2571_v50 = vunpack.i.h.bf16 %v2569_v27  ;;  %v2570_v26 = vunpack.i.l.bf16 %v2569_v27  ;;  %v4152_v60 = vsel %vm1686_vm5, %v1681_v45, %v2621_v2  ;;  %v4155_v11 = vsel %vm1686_vm5, %v1680_v59, %v2620_v9  ;;  %v5204_v2 = vld [vmem:[#allocation9_spill] sm:$0xff]  ;;  %v5205_v45 = vld [vmem:[#allocation12_spill] sm:$0xff] }
 0x116   : > { %v2579_v4 = vpop.permute.xlu0 %2578  ;;  %v2516_v9 = vunpack.i.h.bf16 %v3976_v48 }
 0x117   : > { %v1693_v44 = vsel %vm1686_vm5, %v1660_v41, %v2570_v26  ;;  %v1694_v43 = vsel %vm1686_vm5, %v1661_v7, %v2571_v50  ;;  %v2581_v61 = vunpack.i.h.bf16 %v2579_v4  ;;  %v2580_v58 = vunpack.i.l.bf16 %v2579_v4 }
 0x118   : > { %2798 = vrot.lane.b32.xlu2 %v5203_v23, %s3158_s23  ;;  %v1667_v7 = vsel %vm495_vm2, %v3884_v17, %v2506_v28  ;;  %v1666_v41 = vsel %vm495_vm2, %v3881_v18, %v2505_v35  ;;  %v2521_v28 = vunpack.i.h.bf16 %v4064_v34  ;;  %v2520_v35 = vunpack.i.l.bf16 %v4064_v34 }
 0x119   : > { %v4170_v47 = vsel %vm1686_vm5, %v1665_v37, %v2581_v61  ;;  %v4173_v62 = vsel %vm1686_vm5, %v1664_v15, %v2580_v58  ;;  %v5206_v15 = vld [vmem:[#allocation13_spill] sm:$0xff] }
 0x11a   : > { %2793 = vrot.lane.b32.xlu1 %v5204_v2, %s3158_s23  ;;  %v2634_v16 = vpop.permute.xlu2 %2633  ;;  %v5207_v2 = vld [vmem:[#allocation11_spill] sm:$0xff] }
 0x11b   : > { %v2636_v46 = vunpack.i.h.bf16 %v2634_v16  ;;  %v2635_v57 = vunpack.i.l.bf16 %v2634_v16 }
 0x11c   : > { %2803 = vrot.lane.b32.xlu0 %v5205_v45, %s3158_s23  ;;  %v2584_v59 = vpop.permute.xlu1 %2583 }
 0x11d   : > { %v2586_v27 = vunpack.i.h.bf16 %v2584_v59  ;;  %v2585_v50 = vunpack.i.l.bf16 %v2584_v59  ;;  %v4184_v26 = vsel %vm1719_vm6, %v1688_v32, %v2636_v46  ;;  %v4187_v33 = vsel %vm1719_vm6, %v1687_v51, %v2635_v57 }
 0x11e   : > { %v2594_v4 = vpop.permute.xlu0 %2593  ;;  %v1671_v32 = vsel %vm495_vm2, %v3892_v25, %v2516_v9  ;;  %v1670_v51 = vsel %vm495_vm2, %v3889_v19, %v2515_v20  ;;  %v2531_v19 = vunpack.i.h.bf16 %v4018_v49  ;;  %v2530_v57 = vunpack.i.l.bf16 %v4018_v49  ;;  %v5208_v9 = vld [vmem:[#allocation15_spill] sm:$0xff] }
 0x11f   : > { %v1699_v48 = vsel %vm1686_vm5, %v1666_v41, %v2585_v50  ;;  %v1700_v61 = vsel %vm1686_vm5, %v1667_v7, %v2586_v27  ;;  %v2596_v58 = vunpack.i.h.bf16 %v2594_v4  ;;  %v2595_v37 = vunpack.i.l.bf16 %v2594_v4 }
 0x120   : > { %2813 = vrot.lane.b32.xlu2 %v5206_v15, %s3158_s23  ;;  %v1673_v7 = vsel %vm495_vm2, %v3931_v1, %v2521_v28  ;;  %v1672_v41 = vsel %vm495_vm2, %v3928_v42, %v2520_v35  ;;  %v2536_v28 = vunpack.i.h.bf16 %v4084_v56  ;;  %v2535_v35 = vunpack.i.l.bf16 %v4084_v56 }
 0x121   : > { %v4202_v17 = vsel %vm1686_vm5, %v1671_v32, %v2596_v58  ;;  %v4205_v18 = vsel %vm1686_vm5, %v1670_v51, %v2595_v37  ;;  %v5209_v51 = vld [vmem:[#allocation16_spill] sm:$0xff] }
 0x122   : > { %2808 = vrot.lane.b32.xlu1 %v5207_v2, %s3158_s23  ;;  %v2649_v25 = vpop.permute.xlu2 %2648 }
 0x123   : > { %v2651_v16 = vunpack.i.h.bf16 %v2649_v25  ;;  %v2650_v46 = vunpack.i.l.bf16 %v2649_v25  ;;  %v5210_v25 = vld [vmem:[#allocation14_spill] sm:$0xff] }
 0x124   : > { %2818 = vrot.lane.b32.xlu0 %v5208_v9, %s3158_s23  ;;  %v2599_v20 = vpop.permute.xlu1 %2598 }
 0x125   : > { %v2601_v59 = vunpack.i.h.bf16 %v2599_v20  ;;  %v2600_v27 = vunpack.i.l.bf16 %v2599_v20  ;;  %v4216_v50 = vsel %vm1719_vm6, %v1694_v43, %v2651_v16  ;;  %v4219_v34 = vsel %vm1719_vm6, %v1693_v44, %v2650_v46 }
 0x126   : > { %v2609_v4 = vpop.permute.xlu0 %2608  ;;  %v1677_v43 = vsel %vm495_vm2, %v3950_v55, %v2531_v19  ;;  %v1676_v44 = vsel %vm495_vm2, %v3943_v40, %v2530_v57  ;;  %v2546_v40 = vunpack.i.h.bf16 %v4040_v22  ;;  %v2545_v19 = vunpack.i.l.bf16 %v4040_v22 }
 0x127   : > { %v1705_v49 = vsel %vm1686_vm5, %v1672_v41, %v2600_v27  ;;  %v1706_v58 = vsel %vm1686_vm5, %v1673_v7, %v2601_v59  ;;  %v2611_v37 = vunpack.i.h.bf16 %v2609_v4  ;;  %v2610_v32 = vunpack.i.l.bf16 %v2609_v4 }
 0x128   : > { %2828 = vrot.lane.b32.xlu2 %v5209_v51, %s3158_s23  ;;  %v1679_v7 = vsel %vm495_vm2, %v3986_v54, %v2536_v28  ;;  %v1678_v41 = vsel %vm495_vm2, %v3983_v53, %v2535_v35  ;;  %v2550_v28 = vunpack.i.l.bf16 %v4102_v30  ;;  %v5211_v35 = vld [vmem:[#allocation17_spill] sm:$0xff] }
 0x129   : > { %v4234_v1 = vsel %vm1686_vm5, %v1677_v43, %v2611_v37  ;;  %v4237_v42 = vsel %vm1686_vm5, %v1676_v44, %v2610_v32  ;;  %v2551_v44 = vunpack.i.h.bf16 %v4102_v30 }
 0x12a   : > { %2823 = vrot.lane.b32.xlu1 %v5210_v25, %s3158_s23  ;;  %v2664_v55 = vpop.permute.xlu2 %2663 }
 0x12b   : > { %v2666_v16 = vunpack.i.h.bf16 %v2664_v55  ;;  %v2665_v46 = vunpack.i.l.bf16 %v2664_v55  ;;  %v1685_v30 = vsel %vm495_vm2, %v4024_v0, %v2551_v44 }
 0x12c   : > { %2833 = vrot.lane.b32.xlu0 %v3746_v5, %s3158_s23  ;;  %v2614_v57 = vpop.permute.xlu1 %2613 }
 0x12d   : > { %v2616_v20 = vunpack.i.h.bf16 %v2614_v57  ;;  %v2615_v59 = vunpack.i.l.bf16 %v2614_v57  ;;  %v4248_v27 = vsel %vm1719_vm6, %v1700_v61, %v2666_v16  ;;  %v4251_v56 = vsel %vm1719_vm6, %v1699_v48, %v2665_v46 }
 0x12e   : > { %v2624_v4 = vpop.permute.xlu0 %2623  ;;  %v1683_v61 = vsel %vm495_vm2, %v3998_v6, %v2546_v40  ;;  %v1682_v48 = vsel %vm495_vm2, %v3991_v31, %v2545_v19  ;;  %v5212_v31 = vld [vmem:[#allocation19_spill] sm:$0xff] }
 0x12f   : > { %v1711_v22 = vsel %vm1686_vm5, %v1678_v41, %v2615_v59  ;;  %v1712_v37 = vsel %vm1686_vm5, %v1679_v7, %v2616_v20  ;;  %v2626_v32 = vunpack.i.h.bf16 %v2624_v4  ;;  %v2625_v43 = vunpack.i.l.bf16 %v2624_v4 }
 0x130   : > { %2843 = vrot.lane.b32.xlu2 %v3750_v12, %s3158_s23  ;;  %v1684_v59 = vsel %vm495_vm2, %v4021_v63, %v2550_v28  ;;  %v5214_v63 = vld [vmem:[#allocation18_spill] sm:$0xff] }
 0x131   : > { %v4266_v54 = vsel %vm1686_vm5, %v1683_v61, %v2626_v32  ;;  %v4269_v53 = vsel %vm1686_vm5, %v1682_v48, %v2625_v43  ;;  %v5213_v61 = vld [vmem:[#allocation20_spill] sm:$0xff] }
 0x132   : > { %2838 = vrot.lane.b32.xlu1 %v5211_v35, %s3158_s23  ;;  %v2679_v6 = vpop.permute.xlu2 %2678 }
 0x133   : > { %v2681_v55 = vunpack.i.h.bf16 %v2679_v6  ;;  %v2680_v16 = vunpack.i.l.bf16 %v2679_v6  ;;  %v3115_v6 = vld [vmem:[#allocation2 + $0x48] sm:$0xff] }
 0x134   : > { %2848 = vrot.lane.b32.xlu0 %v5212_v31, %s3158_s23  ;;  %v2629_v46 = vpop.permute.xlu1 %2628 }
 0x135   : > { %v2631_v40 = vunpack.i.h.bf16 %v2629_v46  ;;  %v2630_v19 = vunpack.i.l.bf16 %v2629_v46  ;;  %v4278_v57 = vsel %vm1719_vm6, %v1706_v58, %v2681_v55  ;;  %v4281_v20 = vsel %vm1719_vm6, %v1705_v49, %v2680_v16  ;;  %v3116_v55 = vld [vmem:[#allocation2 + $0x50] sm:$0xff] }
 0x136   : > { %v2639_v7 = vpop.permute.xlu0 %2638  ;;  %v2872_v16 = vpack.i.bf16 %v3116_v55, %v3115_v6 }
 0x137   : > { %v1717_v41 = vsel %vm1686_vm5, %v1684_v59, %v2630_v19  ;;  %v1718_v4 = vsel %vm1686_vm5, %v1685_v30, %v2631_v40  ;;  %v2641_v32 = vunpack.i.h.bf16 %v2639_v7  ;;  %v2640_v43 = vunpack.i.l.bf16 %v2639_v7 }
 0x138   : > { %2858 = vrot.lane.b32.xlu2 %v5213_v61, %s3158_s23 }
 0x139   : > { %v4293_v49 = vsel %vm1719_vm6, %v4059_v38, %v2640_v43  ;;  %v4297_v0 = vsel %vm1719_vm6, %v4062_v3, %v2641_v32 }
 0x13a   : > { %2853 = vrot.lane.b32.xlu1 %v5214_v63, %s3158_s23  ;;  %v2694_v58 = vpop.permute.xlu2 %2693 }
 0x13b   : > { %v2696_v48 = vunpack.i.h.bf16 %v2694_v58  ;;  %v2695_v44 = vunpack.i.l.bf16 %v2694_v58 }
 0x13c   : > { %2863 = vrot.lane.b32.xlu0 %v3815_v36, %s3158_s23  ;;  %v2644_v28 = vpop.permute.xlu1 %2643 }
 0x13d   : > { %v2646_v46 = vunpack.i.h.bf16 %v2644_v28  ;;  %v2645_v38 = vunpack.i.l.bf16 %v2644_v28  ;;  %v4304_v40 = vsel %vm1719_vm6, %v1712_v37, %v2696_v48  ;;  %v4307_v3 = vsel %vm1719_vm6, %v1711_v22, %v2695_v44 }
 0x13e   : > { %v2654_v19 = vpop.permute.xlu0 %2653 }
 0x13f   : > { %v1724_v30 = vsel %vm1719_vm6, %v4138_v21, %v2645_v38  ;;  %v1725_v59 = vsel %vm1719_vm6, %v4135_v52, %v2646_v46  ;;  %v2656_v7 = vunpack.i.h.bf16 %v2654_v19  ;;  %v2655_v32 = vunpack.i.l.bf16 %v2654_v19  ;;  %v3117_v46 = vld [vmem:[#allocation2 + $0x68] sm:$0xff]  ;;  %v3118_v38 = vld [vmem:[#allocation2 + $0x70] sm:$0xff] }
 0x140   : > { %2873 = vrot.lane.b32.xlu2 %v2872_v16, %s3159_s25  ;;  %v2892_v19 = vpack.i.bf16 %v3118_v38, %v3117_v46 }
 0x141   : > { %v4316_v43 = vsel %vm1719_vm6, %v4082_v14, %v2655_v32  ;;  %v4320_v22 = vsel %vm1719_vm6, %v4079_v10, %v2656_v7 }
 0x142   : > { %2868 = vrot.lane.b32.xlu1 %v3822_v8, %s3160_s26  ;;  %v2709_v21 = vpop.permute.xlu2 %2708 }
 0x143   : > { %v2711_v37 = vunpack.i.h.bf16 %v2709_v21  ;;  %v2710_v52 = vunpack.i.l.bf16 %v2709_v21 }
 0x144   : > { %2878 = vrot.lane.b32.xlu0 %v5203_v23, %s3161_s27  ;;  %v2659_v58 = vpop.permute.xlu1 %2658  ;;  %v5215_v23 = vld [vmem:[#allocation25_spill] sm:$0xff] }
 0x145   : > { %v2661_v48 = vunpack.i.h.bf16 %v2659_v58  ;;  %v2660_v44 = vunpack.i.l.bf16 %v2659_v58  ;;  %v4327_v14 = vsel %vm1719_vm6, %v1718_v4, %v2711_v37  ;;  %v4330_v10 = vsel %vm1719_vm6, %v1717_v41, %v2710_v52 }
 0x146   : > { %v2669_v28 = vpop.permute.xlu0 %2668 }
 0x147   : > { %v1730_v8 = vsel %vm1719_vm6, %v4173_v62, %v2660_v44  ;;  %v1731_v6 = vsel %vm1719_vm6, %v4170_v47, %v2661_v48  ;;  %v2671_v55 = vunpack.i.h.bf16 %v2669_v28  ;;  %v2670_v16 = vunpack.i.l.bf16 %v2669_v28  ;;  %v5216_v62 = vld [vmem:[#allocation22_spill] sm:$0xff]  ;;  %v3119_v48 = vld [vmem:[#allocation2 + $0xc8] sm:$0xff]  ;;  %v3120_v44 = vld [vmem:[#allocation2 + $0xd0] sm:$0xff] }
 0x148   : > { %2888 = vrot.lane.b32.xlu2 %v5215_v23, %s3160_s26  ;;  %v2897_v28 = vpack.i.bf16 %v3120_v44, %v3119_v48 }
 0x149   : > { %v4340_v4 = vsel %vm1719_vm6, %v4100_v39, %v2670_v16  ;;  %v4344_v41 = vsel %vm1719_vm6, %v4097_v13, %v2671_v55 }
 0x14a   : > { %2883 = vrot.lane.b32.xlu1 %v5216_v62, %s3160_s26  ;;  %v2724_v47 = vpop.permute.xlu2 %2723  ;;  %v3121_v62 = vld [vmem:[#allocation2 + $0x148] sm:$0xff] }
 0x14b   : > { %v2726_v7 = vunpack.i.h.bf16 %v2724_v47  ;;  %v2725_v32 = vunpack.i.l.bf16 %v2724_v47  ;;  %v3122_v47 = vld [vmem:[#allocation2 + $0x150] sm:$0xff] }
 0x14c   : > { %2893 = vrot.lane.b32.xlu0 %v2892_v19, %s3159_s25  ;;  %v2674_v21 = vpop.permute.xlu1 %2673 }
 0x14d   : > { %v2676_v37 = vunpack.i.h.bf16 %v2674_v21  ;;  %v2675_v52 = vunpack.i.l.bf16 %v2674_v21  ;;  %v4350_v58 = vsel %vm1752_vm7, %v1725_v59, %v2726_v7  ;;  %v4353_v39 = vsel %vm1752_vm7, %v1724_v30, %v2725_v32 }
 0x14e   : > { %v2684_v13 = vpop.permute.xlu0 %2683 }
 0x14f   : > { %v1736_v55 = vsel %vm1719_vm6, %v4205_v18, %v2675_v52  ;;  %v1737_v16 = vsel %vm1719_vm6, %v4202_v17, %v2676_v37  ;;  %v2686_v23 = vunpack.i.h.bf16 %v2684_v13  ;;  %v2685_v46 = vunpack.i.l.bf16 %v2684_v13 }
 0x150   : > { %2903 = vrot.lane.b32.xlu2 %v5205_v45, %s3161_s27  ;;  %v2917_v45 = vpack.i.bf16 %v3122_v47, %v3121_v62  ;;  %v3123_v47 = vld [vmem:[#allocation2 + $0x88] sm:$0xff] }
 0x151   : > { %v4363_v59 = vsel %vm1719_vm6, %v4120_v24, %v2685_v46  ;;  %v4367_v30 = vsel %vm1719_vm6, %v4117_v29, %v2686_v23 }
 0x152   : > { %2898 = vrot.lane.b32.xlu1 %v2897_v28, %s3159_s25  ;;  %v2739_v38 = vpop.permute.xlu2 %2738 }
 0x153   : > { %v2741_v18 = vunpack.i.h.bf16 %v2739_v38  ;;  %v2740_v19 = vunpack.i.l.bf16 %v2739_v38 }
 0x154   : > { %2908 = vrot.lane.b32.xlu0 %v5208_v9, %s3161_s27  ;;  %v2689_v17 = vpop.permute.xlu1 %2688 }
 0x155   : > { %v2691_v7 = vunpack.i.h.bf16 %v2689_v17  ;;  %v2690_v32 = vunpack.i.l.bf16 %v2689_v17  ;;  %v4373_v24 = vsel %vm1752_vm7, %v1731_v6, %v2741_v18  ;;  %v4376_v29 = vsel %vm1752_vm7, %v1730_v8, %v2740_v19  ;;  %v5217_v8 = vld [vmem:[#allocation27_spill] sm:$0xff] }
 0x156   : > { %v2699_v21 = vpop.permute.xlu0 %2698 }
 0x157   : > { %v1742_v37 = vsel %vm1719_vm6, %v4237_v42, %v2690_v32  ;;  %v1743_v52 = vsel %vm1719_vm6, %v4234_v1, %v2691_v7  ;;  %v2701_v9 = vunpack.i.h.bf16 %v2699_v21  ;;  %v2700_v13 = vunpack.i.l.bf16 %v2699_v21 }
 0x158   : > { %2918 = vrot.lane.b32.xlu2 %v2917_v45, %s3159_s25  ;;  %v3124_v45 = vld [vmem:[#allocation2 + $0x90] sm:$0xff] }
 0x159   : > { %v4385_v48 = vsel %vm1719_vm6, %v4155_v11, %v2700_v13  ;;  %v4389_v6 = vsel %vm1719_vm6, %v4152_v60, %v2701_v9  ;;  %v2937_v7 = vpack.i.bf16 %v3124_v45, %v3123_v47 }
 0x15a   : > { %2913 = vrot.lane.b32.xlu1 %v5217_v8, %s3160_s26  ;;  %v2754_v44 = vpop.permute.xlu2 %2753 }
 0x15b   : > { %v2756_v42 = vunpack.i.h.bf16 %v2754_v44  ;;  %v2755_v28 = vunpack.i.l.bf16 %v2754_v44 }
 0x15c   : > { %2923 = vrot.lane.b32.xlu0 %v5211_v35, %s3161_s27  ;;  %v2704_v1 = vpop.permute.xlu1 %2703  ;;  %v5218_v35 = vld [vmem:[#allocation24_spill] sm:$0xff] }
 0x15d   : > { %v2706_v23 = vunpack.i.h.bf16 %v2704_v1  ;;  %v2705_v46 = vunpack.i.l.bf16 %v2704_v1  ;;  %v4396_v38 = vsel %vm1752_vm7, %v1737_v16, %v2756_v42  ;;  %v4399_v11 = vsel %vm1752_vm7, %v1736_v55, %v2755_v28  ;;  %v3126_v28 = vld [vmem:[#allocation2 + $0xf0] sm:$0xff] }
 0x15e   : > { %v2714_v60 = vpop.permute.xlu0 %2713 }
 0x15f   : > { %v1748_v18 = vsel %vm1719_vm6, %v4269_v53, %v2705_v46  ;;  %v1749_v19 = vsel %vm1719_vm6, %v4266_v54, %v2706_v23  ;;  %v2716_v17 = vunpack.i.h.bf16 %v2714_v60  ;;  %v2715_v62 = vunpack.i.l.bf16 %v2714_v60  ;;  %v5219_v53 = vld [vmem:[#allocation21_spill] sm:$0xff] }
 0x160   : > { %2933 = vrot.lane.b32.xlu2 %v5218_v35, %s3160_s26 }
 0x161   : > { %v4409_v16 = vsel %vm1752_vm7, %v4187_v33, %v2715_v62  ;;  %v4413_v55 = vsel %vm1752_vm7, %v4184_v26, %v2716_v17  ;;  %v3125_v26 = vld [vmem:[#allocation2 + $0xe8] sm:$0xff] }
 0x162   : > { %2928 = vrot.lane.b32.xlu1 %v5219_v53, %s3160_s26  ;;  %v2769_v54 = vpop.permute.xlu2 %2768  ;;  %v2942_v1 = vpack.i.bf16 %v3126_v28, %v3125_v26 }
 0x163   : > { %v2771_v32 = vunpack.i.h.bf16 %v2769_v54  ;;  %v2770_v21 = vunpack.i.l.bf16 %v2769_v54 }
 0x164   : > { %2938 = vrot.lane.b32.xlu0 %v2937_v7, %s3159_s25  ;;  %v2719_v9 = vpop.permute.xlu1 %2718 }
 0x165   : > { %v2721_v13 = vunpack.i.h.bf16 %v2719_v9  ;;  %v2720_v8 = vunpack.i.l.bf16 %v2719_v9  ;;  %v4419_v44 = vsel %vm1752_vm7, %v1743_v52, %v2771_v32  ;;  %v4422_v33 = vsel %vm1752_vm7, %v1742_v37, %v2770_v21  ;;  %v5220_v32 = vld [vmem:[#allocation32_spill] sm:$0xff] }
 0x166   : > { %v2729_v42 = vpop.permute.xlu0 %2728  ;;  %v3127_v21 = vld [vmem:[#allocation2 + $0x168] sm:$0xff] }
 0x167   : > { %v4426_v23 = vsel %vm1752_vm7, %v4293_v49, %v2720_v8  ;;  %v4430_v46 = vsel %vm1752_vm7, %v4297_v0, %v2721_v13  ;;  %v2731_v60 = vunpack.i.h.bf16 %v2729_v42  ;;  %v2730_v17 = vunpack.i.l.bf16 %v2729_v42  ;;  %v5221_v13 = vld [vmem:[#allocation29_spill] sm:$0xff] }
 0x168   : > { %2948 = vrot.lane.b32.xlu2 %v5207_v2, %s3161_s27 }
 0x169   : > { %v4436_v37 = vsel %vm1752_vm7, %v4219_v34, %v2730_v17  ;;  %v4440_v52 = vsel %vm1752_vm7, %v4216_v50, %v2731_v60  ;;  %v3130_v60 = vld [vmem:[#allocation2 + $0x1d0] sm:$0xff] }
 0x16a   : > { %2943 = vrot.lane.b32.xlu1 %v2942_v1, %s3159_s25  ;;  %v2784_v49 = vpop.permute.xlu2 %2783  ;;  %v3129_v1 = vld [vmem:[#allocation2 + $0x1c8] sm:$0xff] }
 0x16b   : > { %v2786_v62 = vunpack.i.h.bf16 %v2784_v49  ;;  %v2785_v35 = vunpack.i.l.bf16 %v2784_v49  ;;  %v2972_v17 = vpack.i.bf16 %v3130_v60, %v3129_v1 }
 0x16c   : > { %2953 = vrot.lane.b32.xlu0 %v5210_v25, %s3161_s27  ;;  %v2734_v0 = vpop.permute.xlu1 %2733 }
 0x16d   : > { %v2736_v47 = vunpack.i.h.bf16 %v2734_v0  ;;  %v2735_v45 = vunpack.i.l.bf16 %v2734_v0  ;;  %v4446_v2 = vsel %vm1752_vm7, %v1749_v19, %v2786_v62  ;;  %v4449_v34 = vsel %vm1752_vm7, %v1748_v18, %v2785_v35  ;;  %v3128_v19 = vld [vmem:[#allocation2 + $0x170] sm:$0xff] }
 0x16e   : > { %v2744_v7 = vpop.permute.xlu0 %2743  ;;  %v2967_v9 = vpack.i.bf16 %v3128_v19, %v3127_v21  ;;  %v3132_v21 = vld [vmem:[#allocation2 + $0xb0] sm:$0xff] }
 0x16f   : > { %v4453_v50 = vsel %vm1752_vm7, %v4316_v43, %v2735_v45  ;;  %v4457_v53 = vsel %vm1752_vm7, %v4320_v22, %v2736_v47  ;;  %v2746_v54 = vunpack.i.h.bf16 %v2744_v7  ;;  %v2745_v25 = vunpack.i.l.bf16 %v2744_v7 }
 0x170   : > { %2963 = vrot.lane.b32.xlu2 %v5220_v32, %s3160_s26  ;;  %v3131_v32 = vld [vmem:[#allocation2 + $0xa8] sm:$0xff] }
 0x171   : > { %v4463_v18 = vsel %vm1752_vm7, %v4251_v56, %v2745_v25  ;;  %v4467_v43 = vsel %vm1752_vm7, %v4248_v27, %v2746_v54  ;;  %v5222_v25 = vld [vmem:[#allocation26_spill] sm:$0xff]  ;;  %v2997_v19 = vpack.i.bf16 %v3132_v21, %v3131_v32 }
 0x172   : > { %2958 = vrot.lane.b32.xlu1 %v5221_v13, %s3160_s26  ;;  %v4471_v22 = vpop.permute.xlu2 %2798  ;;  %v2439_v21 = vld [vmem:[%s5117_s3 + $0x18] sm:$0xff] }
 0x174   : > { %2968 = vrot.lane.b32.xlu0 %v2967_v9, %s3159_s25  ;;  %v2749_v8 = vpop.permute.xlu1 %2748 }
 0x175   : > { %v2751_v42 = vunpack.i.h.bf16 %v2749_v8  ;;  %v2750_v26 = vunpack.i.l.bf16 %v2749_v8 }
 0x176   : > { %v2759_v28 = vpop.permute.xlu0 %2758 }
 0x177   : > { %v1767_v56 = vsel %vm1752_vm7, %v4340_v4, %v2750_v26  ;;  %v1768_v27 = vsel %vm1752_vm7, %v4344_v41, %v2751_v42  ;;  %v2761_v49 = vunpack.i.h.bf16 %v2759_v28  ;;  %v2760_v62 = vunpack.i.l.bf16 %v2759_v28 }
 0x178   : > { %2978 = vrot.lane.b32.xlu2 %v3750_v12, %s3161_s27 }
 0x179   : > { %v4482_v35 = vsel %vm1752_vm7, %v4281_v20, %v2760_v62  ;;  %v4486_v0 = vsel %vm1752_vm7, %v4278_v57, %v2761_v49  ;;  %v3134_v49 = vld [vmem:[#allocation2 + $0x110] sm:$0xff] }
 0x17a   : > { %2973 = vrot.lane.b32.xlu1 %v2972_v17, %s3159_s25  ;;  %v4489_v47 = vpop.permute.xlu2 %2813  ;;  %v3133_v17 = vld [vmem:[#allocation2 + $0x108] sm:$0xff] }
 0x17b   : > { %v3002_v62 = vpack.i.bf16 %v3134_v49, %v3133_v17 }
 0x17c   : > { %2983 = vrot.lane.b32.xlu0 %v5213_v61, %s3161_s27  ;;  %v2764_v4 = vpop.permute.xlu1 %2763 }
 0x17d   : > { %v2766_v41 = vunpack.i.h.bf16 %v2764_v4  ;;  %v2765_v45 = vunpack.i.l.bf16 %v2764_v4 }
 0x17e   : > { %v2774_v7 = vpop.permute.xlu0 %2773 }
 0x17f   : > { %v1773_v12 = vsel %vm1752_vm7, %v4363_v59, %v2765_v45  ;;  %v1774_v20 = vsel %vm1752_vm7, %v4367_v30, %v2766_v41  ;;  %v2776_v54 = vunpack.i.h.bf16 %v2774_v7  ;;  %v2775_v57 = vunpack.i.l.bf16 %v2774_v7  ;;  %v5223_v59 = vld [vmem:[#allocation23_spill] sm:$0xff] }
 0x180   : > { %2993 = vrot.lane.b32.xlu2 %v5222_v25, %s3160_s26 }
 0x181   : > { %v4501_v61 = vsel %vm1752_vm7, %v4307_v3, %v2775_v57  ;;  %v4505_v9 = vsel %vm1752_vm7, %v4304_v40, %v2776_v54  ;;  %v1941_v40 = vld [vmem:[%s5117_s3 + $0x20] sm:$0xf] }
 0x182   : > { %2988 = vrot.lane.b32.xlu1 %v5223_v59, %s3160_s26  ;;  %v2829_v30 = vpop.permute.xlu2 %2828  ;;  %v1963_v4 = vunpack.c.l.b16 %v1941_v40 }
 0x183   : > { %v2831_v13 = vunpack.i.h.bf16 %v2829_v30  ;;  %v2830_v8 = vunpack.i.l.bf16 %v2829_v30 }
 0x184   : > { %2998 = vrot.lane.b32.xlu0 %v2997_v19, %s3159_s25  ;;  %v2779_v42 = vpop.permute.xlu1 %2778 }
 0x185   : > { %v2781_v26 = vunpack.i.h.bf16 %v2779_v42  ;;  %v2780_v28 = vunpack.i.l.bf16 %v2779_v42  ;;  %v4511_v1 = vsel %vm1785_vm8, %v1768_v27, %v2831_v13  ;;  %v4514_v3 = vsel %vm1785_vm8, %v1767_v56, %v2830_v8  ;;  %v3135_v13 = vld [vmem:[#allocation2 + $0x188] sm:$0xff]  ;;  %v3136_v8 = vld [vmem:[#allocation2 + $0x190] sm:$0xff] }
 0x186   : > { %v2789_v60 = vpop.permute.xlu0 %2788  ;;  %v1968_v56 = vpack.c.b16 %v1963_v4, %v1963_v4 }
 0x187   : > { %v1779_v41 = vsel %vm1752_vm7, %v4385_v48, %v2780_v28  ;;  %v1780_v45 = vsel %vm1752_vm7, %v4389_v6, %v2781_v26  ;;  %v2791_v27 = vunpack.i.h.bf16 %v2789_v60  ;;  %v2790_v7 = vunpack.i.l.bf16 %v2789_v60  ;;  %v2438_v26 = vld [vmem:[%s5117_s3 + $0x10] sm:$0xff]  ;;  %v5225_v28 = vld [vmem:[#allocation31_spill] sm:$0xff] }
 0x188   : > { %3008 = vrot.lane.b32.xlu2 %v5206_v15, %s3161_s27  ;;  %v2024_v25 = vsel %vm2022_vm9, %v1968_v56, 0  ;;  %v3137_v56 = vld [vmem:[#allocation2 + $0x1e8] sm:$0xff] }
 0x189   : > { %v4527_v54 = vsel %vm1752_vm7, %v4330_v10, %v2790_v7  ;;  %v4531_v57 = vsel %vm1752_vm7, %v4327_v14, %v2791_v27  ;;  %2029 = vmatpush.bf16.msra.mxu0 %v2024_v25  ;;  %2440 = vmatpush.bf16.msra.mxu1 %v2024_v25  ;;  %v2437_v27 = vld [vmem:[%s5117_s3 + $0x8] sm:$0xff] }
 0x18a   : > { %3003 = vrot.lane.b32.xlu1 %v3002_v62, %s3159_s25  ;;  %v2844_v48 = vpop.permute.xlu2 %2843  ;;  %2441 = vmatpush.bf16.msra.mxu2 %v2024_v25 }
 0x18b   : > { %v2846_v6 = vunpack.i.h.bf16 %v2844_v48  ;;  %v2845_v32 = vunpack.i.l.bf16 %v2844_v48  ;;  %2442 = vmatpush.bf16.msra.mxu3 %v2024_v25  ;;  %v3138_v48 = vld [vmem:[#allocation2 + $0x1f0] sm:$0xff] }
 0x18c   : > { %3013 = vrot.lane.b32.xlu0 %v5209_v51, %s3161_s27  ;;  %v4536_v15 = vpop.permute.xlu1 %2793  ;;  %v5224_v51 = vld [vmem:[#allocation34_spill] sm:$0xff]  ;;  %v3032_v25 = vpack.i.bf16 %v3138_v48, %v3137_v56  ;;  %v3143_v48 = vld [vmem:[#allocation2 + $0x208] sm:$0xff] }
 0x18d   : > { %v4539_v10 = vsel %vm1785_vm8, %v1774_v20, %v2846_v6  ;;  %v4542_v14 = vsel %vm1785_vm8, %v1773_v12, %v2845_v32  ;;  %2030 = vmatpush.bf16.msra.mxu0 %v2439_v21  ;;  %2443 = vmatpush.bf16.msra.mxu1 %v2439_v21  ;;  %v3027_v20 = vpack.i.bf16 %v3136_v8, %v3135_v13 }
 0x18e   : > { %v2804_v19 = vpop.permute.xlu0 %2803  ;;  %2444 = vmatpush.bf16.msra.mxu2 %v2439_v21 }
 0x18f   : > { %v2806_v59 = vunpack.i.h.bf16 %v2804_v19  ;;  %v2805_v30 = vunpack.i.l.bf16 %v2804_v19  ;;  %2445 = vmatpush.bf16.msra.mxu3 %v2439_v21 }
 0x190   : > { %3023 = vrot.lane.b32.xlu2 %v5224_v51, %s3160_s26 }
 0x191   : > { %v4551_v12 = vsel %vm1785_vm8, %v4353_v39, %v2805_v30  ;;  %v4555_v42 = vsel %vm1785_vm8, %v4350_v58, %v2806_v59  ;;  %2031 = vmatpush.bf16.msra.mxu0 %v2438_v26  ;;  %2446 = vmatpush.bf16.msra.mxu1 %v2438_v26  ;;  %v3139_v59 = vld [vmem:[#allocation2 + $0x128] sm:$0xff]  ;;  %v3140_v30 = vld [vmem:[#allocation2 + $0x130] sm:$0xff] }
 0x192   : > { %3018 = vrot.lane.b32.xlu1 %v5225_v28, %s3160_s26  ;;  %v2859_v40 = vpop.permute.xlu2 %2858  ;;  %2447 = vmatpush.bf16.msra.mxu2 %v2438_v26  ;;  %v3052_v51 = vpack.i.bf16 %v3140_v30, %v3139_v59 }
 0x193   : > { %v2861_v60 = vunpack.i.h.bf16 %v2859_v40  ;;  %v2860_v17 = vunpack.i.l.bf16 %v2859_v40  ;;  %2448 = vmatpush.bf16.msra.mxu3 %v2438_v26 }
 0x194   : > { %3028 = vrot.lane.b32.xlu0 %v3027_v20, %s3159_s25  ;;  %v2809_v39 = vpop.permute.xlu1 %2808 }
 0x195   : > { %v2811_v49 = vunpack.i.h.bf16 %v2809_v39  ;;  %v2810_v58 = vunpack.i.l.bf16 %v2809_v39  ;;  %v4564_v62 = vsel %vm1785_vm8, %v1780_v45, %v2861_v60  ;;  %v4567_v4 = vsel %vm1785_vm8, %v1779_v41, %v2860_v17  ;;  %2032 = vmatpush.bf16.msra.mxu0 %v2437_v27  ;;  %v2436_v41 = vld [vmem:[%s5117_s3] sm:$0xff]  ;;  %2449 = vmatpush.bf16.msra.mxu1 %v2437_v27 }
 0x196   : > { %v2819_v7 = vpop.permute.xlu0 %2818  ;;  %2450 = vmatpush.bf16.msra.mxu2 %v2437_v27 }
 0x197   : > { %v2821_v6 = vunpack.i.h.bf16 %v2819_v7  ;;  %v2820_v32 = vunpack.i.l.bf16 %v2819_v7  ;;  %v4574_v21 = vsel %vm1785_vm8, %v4436_v37, %v2810_v58  ;;  %v4578_v45 = vsel %vm1785_vm8, %v4440_v52, %v2811_v49  ;;  %2451 = vmatpush.bf16.msra.mxu3 %v2437_v27  ;;  %v5227_v27 = vld [vmem:[#allocation33_spill] sm:$0xff]  ;;  %v3141_v7 = vld [vmem:[#allocation2 + $0x1a8] sm:$0xff] }
 0x198   : > { %3038 = vrot.lane.b32.xlu2 %v5212_v31, %s3161_s27 }
 0x199   : > { %v4587_v19 = vsel %vm1785_vm8, %v4376_v29, %v2820_v32  ;;  %v4591_v37 = vsel %vm1785_vm8, %v4373_v24, %v2821_v6  ;;  %2033 = vmatpush.bf16.msra.mxu0 %v2436_v41  ;;  %2452 = vmatpush.bf16.msra.mxu1 %v2436_v41  ;;  %v3144_v32 = vld [vmem:[#allocation2 + $0x210] sm:$0xff] }
 0x19a   : > { %3033 = vrot.lane.b32.xlu1 %v3032_v25, %s3159_s25  ;;  %v4594_v52 = vpop.permute.xlu2 %2873  ;;  %2453 = vmatpush.bf16.msra.mxu2 %v2436_v41  ;;  %v867_v25 = vrot.slane %v3143_v48, 1 }
 0x19b   : > { %2454 = vmatpush.bf16.msra.mxu3 %v2436_v41  ;;  %v868_v41 = vrot.slane %v3144_v32, 1 }
 0x19c   : > { %3043 = vrot.lane.b32.xlu0 %v3815_v36, %s3161_s27  ;;  %v2824_v31 = vpop.permute.xlu1 %2823  ;;  %v5226_v36 = vld [vmem:[#allocation28_spill] sm:$0xff] }
 0x19d   : > { %v2826_v29 = vunpack.i.h.bf16 %v2824_v31  ;;  %v2825_v13 = vunpack.i.l.bf16 %v2824_v31  ;;  %v5228_v31 = vld [vmem:[#allocation30_spill] sm:$0xff] }
 0x19e   : > { %v4598_v24 = vpop.permute.xlu0 %2833 }
 0x19f   : > { %v4602_v8 = vsel %vm1785_vm8, %v4463_v18, %v2825_v13  ;;  %v4606_v20 = vsel %vm1785_vm8, %v4467_v43, %v2826_v29  ;;  %v595_v18 = vld [vmem:[#allocation2 + $0x218] sm:$0x1]  ;;  %v598_v29 = vld [vmem:[#allocation2 + $0x230] sm:$0xff] }
 0x1a0   : > { %3053 = vrot.lane.b32.xlu2 %v3052_v51, %s3159_s25  ;;  %v597_v51 = vld [vmem:[#allocation2 + $0x228] sm:$0xff] }
 0x1a2   : > { %3048 = vrot.lane.b32.xlu1 %v5226_v36, %s3160_s26  ;;  %v4611_v26 = vpop.permute.xlu2 %2888  ;;  %v876_v36 = vrot.slane %v597_v51, 7 }
 0x1a4   : > { %3058 = vrot.lane.b32.xlu0 %v3746_v5, %s3161_s27  ;;  %v2839_v28 = vpop.permute.xlu1 %2838  ;;  %v3142_v5 = vld [vmem:[#allocation2 + $0x1b0] sm:$0xff] }
 0x1a5   : > { %v2841_v40 = vunpack.i.h.bf16 %v2839_v28  ;;  %v2840_v60 = vunpack.i.l.bf16 %v2839_v28  ;;  %v3072_v56 = vpack.i.bf16 %v3142_v5, %v3141_v7 }
 0x1a6   : > { %v2849_v17 = vpop.permute.xlu0 %2848 }
 0x1a7   : > { %v2851_v39 = vunpack.i.h.bf16 %v2849_v17  ;;  %v2850_v49 = vunpack.i.l.bf16 %v2849_v17  ;;  %v4617_v43 = vsel %vm1785_vm8, %v4482_v35, %v2840_v60  ;;  %v4621_v58 = vsel %vm1785_vm8, %v4486_v0, %v2841_v40 }
 0x1a8   : > { %3068 = vrot.lane.b32.xlu2 %v5227_v27, %s3160_s26  ;;  %v870_v0 = vrot.slane %v595_v18, 1  ;;  %v3077_v40 = vpack.i.bf16 %v3144_v32, %v3143_v48  ;;  %v2795_v60 = vunpack.i.l.bf16 %v4536_v15  ;;  %v599_v32 = vld [vmem:[#allocation2 + $0x238] sm:$0x1] }
 0x1a9   : > { %v4627_v6 = vsel %vm1785_vm8, %v4422_v33, %v2850_v49  ;;  %v4631_v35 = vsel %vm1785_vm8, %v4419_v44, %v2851_v39  ;;  %v869_v33 = vsel %vm777_vm3, %v867_v25, %v868_v41  ;;  %v878_v44 = vrot.slane %v598_v29, 7  ;;  %v596_v39 = vld [vmem:[#allocation2 + $0x220] sm:$0xff] }
 0x1aa   : > { %3063 = vrot.lane.b32.xlu1 %v5228_v31, %s3160_s26  ;;  %v4635_v59 = vpop.permute.xlu2 %2903  ;;  %v871_v13 = vsel %vm777_vm3, %v868_v41, %v870_v0  ;;  %v2796_v49 = vunpack.i.h.bf16 %v4536_v15  ;;  %v875_v7 = vrot.slane %v596_v39, 7  ;;  %v2876_v41 = vunpack.i.h.bf16 %v4594_v52 }
 0x1ab   : > { %v3087_v27 = vpack.i.bf16 %v871_v13, %v869_v33  ;;  %v879_v48 = vsel %vm648_vm4, %v876_v36, %v878_v44 }
 0x1ac   : > { %3073 = vrot.lane.b32.xlu0 %v3072_v56, %s3159_s25  ;;  %v4638_v30 = vpop.permute.xlu1 %2853  ;;  %v877_v15 = vsel %vm648_vm4, %v875_v7, %v876_v36  ;;  %v882_v36 = vrot.slane %v598_v29, 1 }
 0x1ad   : > { %v3097_v31 = vpack.i.bf16 %v879_v48, %v877_v15  ;;  %v2800_v15 = vunpack.i.l.bf16 %v4471_v22 }
 0x1ae   : > { %v2864_v28 = vpop.permute.xlu0 %2863 }
 0x1af   : > { %v2866_v17 = vunpack.i.h.bf16 %v2864_v28  ;;  %v2865_v18 = vunpack.i.l.bf16 %v2864_v28  ;;  %v881_v28 = vrot.slane %v597_v51, 1 }
 0x1b0   : > { %3083 = vrot.lane.b32.xlu2 %v5214_v63, %s3161_s27  ;;  %v1786_v63 = vsel %vm1785_vm8, %v4409_v16, %v2795_v60  ;;  %v884_v16 = vrot.slane %v599_v32, 1 }
 0x1b1   : > { %v4648_v5 = vsel %vm1785_vm8, %v4449_v34, %v2865_v18  ;;  %v4652_v56 = vsel %vm1785_vm8, %v4446_v2, %v2866_v17  ;;  %v1787_v34 = vsel %vm1785_vm8, %v4413_v55, %v2796_v49  ;;  %v2875_v2 = vunpack.i.l.bf16 %v4594_v52 }
 0x1b2   : > { %3078 = vrot.lane.b32.xlu1 %v3077_v40, %s3159_s25  ;;  %v4656_v25 = vpop.permute.xlu2 %2918  ;;  %v3102_v18 = vpack.i.bf16 %v598_v29, %v597_v51  ;;  %v2801_v49 = vunpack.i.h.bf16 %v4471_v22  ;;  %v883_v29 = vsel %vm777_vm3, %v881_v28, %v882_v36  ;;  %v885_v32 = vsel %vm777_vm3, %v882_v36, %v884_v16 }
 0x1b3   : > { %v1788_v22 = vsel %vm1785_vm8, %v4426_v23, %v2800_v15 }
 0x1b4   : > { %3088 = vrot.lane.b32.xlu0 %v3087_v27, %s3161_s27  ;;  %v2869_v0 = vpop.permute.xlu1 %2868 }
 0x1b5   : > { %v2871_v33 = vunpack.i.h.bf16 %v2869_v0  ;;  %v2870_v13 = vunpack.i.l.bf16 %v2869_v0 }
 0x1b6   : > { %v2879_v44 = vpop.permute.xlu0 %2878 }
 0x1b7   : > { %v1819_v40 = vsel %vm1818_vm10, %v1786_v63, %v2870_v13  ;;  %v1820_v55 = vsel %vm1818_vm10, %v1787_v34, %v2871_v33  ;;  %v2881_v60 = vunpack.i.h.bf16 %v2879_v44  ;;  %v2880_v17 = vunpack.i.l.bf16 %v2879_v44 }
 0x1b8   : > { %v1852_v52 = vsel %vm1851_vm11, %v1819_v40, %v2875_v2  ;;  %v1853_v39 = vsel %vm1851_vm11, %v1820_v55, %v2876_v41  ;;  %3098 = vrot.lane.b32.xlu2 %v3097_v31, %s3160_s26  ;;  %v1789_v41 = vsel %vm1785_vm8, %v4430_v46, %v2801_v49  ;;  %v2905_v31 = vunpack.i.l.bf16 %v4635_v59 }
 0x1b9   : > { %v1885_v7 = vsel %vm1884_vm12, %v1852_v52, %v2880_v17  ;;  %v1886_v48 = vsel %vm1884_vm12, %v1853_v39, %v2881_v60  ;;  %v3107_v13 = vpack.i.bf16 %v885_v32, %v883_v29  ;;  %v2816_v40 = vunpack.i.h.bf16 %v4489_v47 }
 0x1ba   : > { %3093 = vrot.lane.b32.xlu1 %v3087_v27, %s3158_s23  ;;  %v4676_v63 = vpop.permute.xlu2 %2933  ;;  %v1917_v51 = vpack.c.bf16 %v1886_v48, %v1885_v7  ;;  %v2906_v27 = vunpack.i.h.bf16 %v4635_v59  ;;  %v2815_v46 = vunpack.i.l.bf16 %v4489_v47  ;;  %v2891_v60 = vunpack.i.h.bf16 %v4611_v26 }
 0x1bb   : > { %v2890_v59 = vunpack.i.l.bf16 %v4611_v26  ;;  %v1795_v47 = vsel %vm1785_vm8, %v4457_v53, %v2816_v40 }
 0x1bc   : > { %3103 = vrot.lane.b32.xlu0 %v3102_v18, %s3159_s25  ;;  %v2884_v34 = vpop.permute.xlu1 %2883  ;;  %2418 = vmatmul.msk.bf16.vlgmr.msra.gmra.mxu0 %vm1973_vm13, %v1917_v51  ;;  %v1794_v7 = vsel %vm1785_vm8, %v4453_v50, %v2815_v46  ;;  %v1828_v26 = vsel %vm1818_vm10, %v1795_v47, %v2891_v60  ;;  %v2835_v50 = vunpack.i.l.bf16 %v4598_v24 }
 0x1bd   : > { %v2886_v2 = vunpack.i.h.bf16 %v2884_v34  ;;  %v2885_v0 = vunpack.i.l.bf16 %v2884_v34  ;;  %v1827_v51 = vsel %vm1818_vm10, %v1794_v7, %v2890_v59 }
 0x1be   : > { %v2894_v33 = vpop.permute.xlu0 %2893 }
 0x1bf   : > { %v1821_v44 = vsel %vm1818_vm10, %v1788_v22, %v2885_v0  ;;  %v1822_v36 = vsel %vm1818_vm10, %v1789_v41, %v2886_v2  ;;  %v2896_v28 = vunpack.i.h.bf16 %v2894_v33  ;;  %v2895_v16 = vunpack.i.l.bf16 %v2894_v33 }
 0x1c0   : > { %v2836_v22 = vunpack.i.h.bf16 %v4598_v24  ;;  %v2920_v33 = vunpack.i.l.bf16 %v4656_v25 }
 0x1c1   : > { %v1854_v55 = vsel %vm1851_vm11, %v1821_v44, %v2895_v16  ;;  %v1855_v23 = vsel %vm1851_vm11, %v1822_v36, %v2896_v28  ;;  %v1802_v16 = vsel %vm1785_vm8, %v4399_v11, %v2835_v50 }
 0x1c2   : > { %3108 = vrot.lane.b32.xlu1 %v3107_v13, %s3161_s27  ;;  %v1887_v17 = vsel %vm1884_vm12, %v1854_v55, %v2905_v31  ;;  %v1888_v18 = vsel %vm1884_vm12, %v1855_v23, %v2906_v27  ;;  %v2949_v52 = vpop.permute.xlu2 %2948  ;;  %v2921_v31 = vunpack.i.h.bf16 %v4656_v25  ;;  %v1803_v24 = vsel %vm1785_vm8, %v4396_v38, %v2836_v22 }
 0x1c3   : > { %v1918_v39 = vpack.c.bf16 %v1888_v18, %v1887_v17  ;;  %v2951_v47 = vunpack.i.h.bf16 %v2949_v52  ;;  %v2950_v7 = vunpack.i.l.bf16 %v2949_v52 }
 0x1c4   : > { %v2899_v49 = vpop.permute.xlu1 %2898 }
 0x1c5   : > { %v2901_v48 = vunpack.i.h.bf16 %v2899_v49  ;;  %v2900_v15 = vunpack.i.l.bf16 %v2899_v49 }
 0x1c6   : > { %v2909_v29 = vpop.permute.xlu0 %2908 }
 0x1c7   : > { %v1860_v32 = vsel %vm1851_vm11, %v1827_v51, %v2900_v15  ;;  %v1861_v34 = vsel %vm1851_vm11, %v1828_v26, %v2901_v48  ;;  %v2911_v41 = vunpack.i.h.bf16 %v2909_v29  ;;  %v2910_v2 = vunpack.i.l.bf16 %v2909_v29 }
 0x1c9   : > { %v1893_v0 = vsel %vm1884_vm12, %v1860_v32, %v2910_v2  ;;  %v1894_v53 = vsel %vm1884_vm12, %v1861_v34, %v2911_v41  ;;  %v2936_v2 = vunpack.i.h.bf16 %v4676_v63 }
 0x1ca   : > { %v1921_v27 = vpack.c.bf16 %v1894_v53, %v1893_v0  ;;  %v4715_v28 = vpop.permute.xlu2 %2963  ;;  %v2935_v0 = vunpack.i.l.bf16 %v4676_v63 }
 0x1cc   : > { %2422 = vmatmul.msk.bf16.vlgmr.msra.gmra.mxu1 %vm1973_vm13, %v1921_v27  ;;  %v2914_v13 = vpop.permute.xlu1 %2913  ;;  %2419 = vmatmul.msk.bf16.gmra.mxu0 %vm1973_vm13, %v1918_v39 }
 0x1cd   : > { %v2916_v44 = vunpack.i.h.bf16 %v2914_v13  ;;  %v2915_v36 = vunpack.i.l.bf16 %v2914_v13 }
 0x1ce   : > { %v2924_v40 = vpop.permute.xlu0 %2923 }
 0x1cf   : > { %v1835_v46 = vsel %vm1818_vm10, %v1802_v16, %v2915_v36  ;;  %v1836_v25 = vsel %vm1818_vm10, %v1803_v24, %v2916_v44  ;;  %v2926_v55 = vunpack.i.h.bf16 %v2924_v40  ;;  %v2925_v23 = vunpack.i.l.bf16 %v2924_v40 }
 0x1d0   : > { %v1868_v60 = vsel %vm1851_vm11, %v1835_v46, %v2920_v33  ;;  %v1869_v59 = vsel %vm1851_vm11, %v1836_v25, %v2921_v31  ;;  %v1830_v31 = vsel %vm1818_vm10, %v4591_v37, %v2936_v2 }
 0x1d1   : > { %v1901_v17 = vsel %vm1884_vm12, %v1868_v60, %v2925_v23  ;;  %v1902_v18 = vsel %vm1884_vm12, %v1869_v59, %v2926_v55 }
 0x1d2   : > { %v1925_v39 = vpack.c.bf16 %v1902_v18, %v1901_v17  ;;  %v2979_v26 = vpop.permute.xlu2 %2978 }
 0x1d3   : > { %v2981_v37 = vunpack.i.h.bf16 %v2979_v26  ;;  %v2980_v23 = vunpack.i.l.bf16 %v2979_v26 }
 0x1d4   : > { %v2929_v11 = vpop.permute.xlu1 %2928  ;;  %2426 = vmatmul.msk.bf16.vlgmr.msra.gmra.mxu2 %vm1973_vm13, %v1925_v39 }
 0x1d5   : > { %v2931_v38 = vunpack.i.h.bf16 %v2929_v11  ;;  %v2930_v49 = vunpack.i.l.bf16 %v2929_v11  ;;  %v2856_v11 = vunpack.i.h.bf16 %v4638_v30 }
 0x1d6   : > { %v2939_v48 = vpop.permute.xlu0 %2938 }
 0x1d7   : > { %v1823_v15 = vsel %vm1818_vm10, %v4551_v12, %v2930_v49  ;;  %v1824_v51 = vsel %vm1818_vm10, %v4555_v42, %v2931_v38  ;;  %v2941_v29 = vunpack.i.h.bf16 %v2939_v48  ;;  %v2940_v32 = vunpack.i.l.bf16 %v2939_v48 }
 0x1d8   : > { %v1829_v42 = vsel %vm1818_vm10, %v4587_v19, %v2935_v0  ;;  %v2855_v38 = vunpack.i.l.bf16 %v4638_v30  ;;  %v2965_v48 = vunpack.i.l.bf16 %v4715_v28  ;;  %v1811_v30 = vsel %vm1785_vm8, %v4505_v9, %v2856_v11 }
 0x1d9   : > { %v1856_v34 = vsel %vm1851_vm11, %v1823_v15, %v2940_v32  ;;  %v1857_v41 = vsel %vm1851_vm11, %v1824_v51, %v2941_v29 }
 0x1da   : > { %v1889_v52 = vsel %vm1884_vm12, %v1856_v34, %v2950_v7  ;;  %v1890_v53 = vsel %vm1884_vm12, %v1857_v41, %v2951_v47  ;;  %v4745_v16 = vpop.permute.xlu2 %2993  ;;  %v2966_v7 = vunpack.i.h.bf16 %v4715_v28  ;;  %v1810_v29 = vsel %vm1785_vm8, %v4501_v61, %v2855_v38 }
 0x1db   : > { %v1919_v22 = vpack.c.bf16 %v1890_v53, %v1889_v52  ;;  %v1843_v41 = vsel %vm1818_vm10, %v1810_v29, %v2965_v48 }
 0x1dc   : > { %v2944_v12 = vpop.permute.xlu1 %2943  ;;  %v1844_v28 = vsel %vm1818_vm10, %v1811_v30, %v2966_v7 }
 0x1dd   : > { %v2946_v50 = vunpack.i.h.bf16 %v2944_v12  ;;  %v2945_v27 = vunpack.i.l.bf16 %v2944_v12  ;;  %2420 = vmatmul.msk.bf16.gmra.mxu0 %vm1973_vm13, %v1919_v22 }
 0x1de   : > { %v2954_v33 = vpop.permute.xlu0 %2953 }
 0x1df   : > { %v1862_v13 = vsel %vm1851_vm11, %v1829_v42, %v2945_v27  ;;  %v1863_v63 = vsel %vm1851_vm11, %v1830_v31, %v2946_v50  ;;  %v2956_v44 = vunpack.i.h.bf16 %v2954_v33  ;;  %v2955_v36 = vunpack.i.l.bf16 %v2954_v33 }
 0x1e1   : > { %v1895_v24 = vsel %vm1884_vm12, %v1862_v13, %v2955_v36  ;;  %v1896_v40 = vsel %vm1884_vm12, %v1863_v63, %v2956_v44 }
 0x1e2   : > { %v1922_v46 = vpack.c.bf16 %v1896_v40, %v1895_v24  ;;  %v3009_v51 = vpop.permute.xlu2 %3008 }
 0x1e3   : > { %v3011_v33 = vunpack.i.h.bf16 %v3009_v51  ;;  %v3010_v13 = vunpack.i.l.bf16 %v3009_v51 }
 0x1e4   : > { %2423 = vmatmul.msk.bf16.gmra.mxu1 %vm1973_vm13, %v1922_v46  ;;  %v2959_v19 = vpop.permute.xlu1 %2958 }
 0x1e5   : > { %v2961_v25 = vunpack.i.h.bf16 %v2959_v19  ;;  %v2960_v55 = vunpack.i.l.bf16 %v2959_v19 }
 0x1e6   : > { %v2969_v60 = vpop.permute.xlu0 %2968 }
 0x1e7   : > { %v1837_v59 = vsel %vm1818_vm10, %v4617_v43, %v2960_v55  ;;  %v1838_v17 = vsel %vm1818_vm10, %v4621_v58, %v2961_v25  ;;  %v2971_v18 = vunpack.i.h.bf16 %v2969_v60  ;;  %v2970_v39 = vunpack.i.l.bf16 %v2969_v60 }
 0x1e8   : > { %v2996_v25 = vunpack.i.h.bf16 %v4745_v16  ;;  %v2995_v55 = vunpack.i.l.bf16 %v4745_v16 }
 0x1e9   : > { %v1870_v49 = vsel %vm1851_vm11, %v1837_v59, %v2970_v39  ;;  %v1871_v47 = vsel %vm1851_vm11, %v1838_v17, %v2971_v18 }
 0x1ea   : > { %v1903_v15 = vsel %vm1884_vm12, %v1870_v49, %v2980_v23  ;;  %v1904_v43 = vsel %vm1884_vm12, %v1871_v47, %v2981_v37  ;;  %v3024_v27 = vpop.permute.xlu2 %3023  ;;  %v1832_v18 = vsel %vm1818_vm10, %v4606_v20, %v2996_v25 }
 0x1eb   : > { %v1926_v58 = vpack.c.bf16 %v1904_v43, %v1903_v15 }
 0x1ec   : > { %v2974_v26 = vpop.permute.xlu1 %2973 }
 0x1ed   : > { %v2976_v32 = vunpack.i.h.bf16 %v2974_v26  ;;  %v2975_v34 = vunpack.i.l.bf16 %v2974_v26  ;;  %2427 = vmatmul.msk.bf16.gmra.mxu2 %vm1973_vm13, %v1926_v58 }
 0x1ee   : > { %v2984_v2 = vpop.permute.xlu0 %2983 }
 0x1ef   : > { %v1876_v0 = vsel %vm1851_vm11, %v1843_v41, %v2975_v34  ;;  %v1877_v52 = vsel %vm1851_vm11, %v1844_v28, %v2976_v32  ;;  %v2986_v53 = vunpack.i.h.bf16 %v2984_v2  ;;  %v2985_v22 = vunpack.i.l.bf16 %v2984_v2 }
 0x1f1   : > { %v1909_v61 = vsel %vm1884_vm12, %v1876_v0, %v2985_v22  ;;  %v1910_v12 = vsel %vm1884_vm12, %v1877_v52, %v2986_v53  ;;  %v3026_v0 = vunpack.i.h.bf16 %v3024_v27  ;;  %v3025_v52 = vunpack.i.l.bf16 %v3024_v27 }
 0x1f2   : > { %v1929_v9 = vpack.c.bf16 %v1910_v12, %v1909_v61  ;;  %v3039_v11 = vpop.permute.xlu2 %3038 }
 0x1f3   : > { %v3041_v58 = vunpack.i.h.bf16 %v3039_v11  ;;  %v3040_v20 = vunpack.i.l.bf16 %v3039_v11 }
 0x1f4   : > { %2430 = vmatmul.msk.bf16.vlgmr.msra.gmra.mxu3 %vm1973_vm13, %v1929_v9  ;;  %v2989_v50 = vpop.permute.xlu1 %2988 }
 0x1f5   : > { %v2991_v42 = vunpack.i.h.bf16 %v2989_v50  ;;  %v2990_v31 = vunpack.i.l.bf16 %v2989_v50  ;;  %v1846_v50 = vsel %vm1818_vm10, %v4564_v62, %v3026_v0 }
 0x1f6   : > { %v2999_v63 = vpop.permute.xlu0 %2998 }
 0x1f7   : > { %v1825_v44 = vsel %vm1818_vm10, %v4574_v21, %v2990_v31  ;;  %v1826_v36 = vsel %vm1818_vm10, %v4578_v45, %v2991_v42  ;;  %v3001_v24 = vunpack.i.h.bf16 %v2999_v63  ;;  %v3000_v40 = vunpack.i.l.bf16 %v2999_v63 }
 0x1f8   : > { %v1831_v45 = vsel %vm1818_vm10, %v4602_v8, %v2995_v55 }
 0x1f9   : > { %v1858_v46 = vsel %vm1851_vm11, %v1825_v44, %v3000_v40  ;;  %v1859_v19 = vsel %vm1851_vm11, %v1826_v36, %v3001_v24 }
 0x1fa   : > { %v1891_v37 = vsel %vm1884_vm12, %v1858_v46, %v3010_v13  ;;  %v1892_v23 = vsel %vm1884_vm12, %v1859_v19, %v3011_v33  ;;  %v3054_v41 = vpop.permute.xlu2 %3053 }
 0x1fb   : > { %v1920_v60 = vpack.c.bf16 %v1892_v23, %v1891_v37  ;;  %v3056_v40 = vunpack.i.h.bf16 %v3054_v41  ;;  %v3055_v46 = vunpack.i.l.bf16 %v3054_v41 }
 0x1fc   : > { %v3004_v59 = vpop.permute.xlu1 %3003 }
 0x1fd   : > { %v3006_v21 = vunpack.i.h.bf16 %v3004_v59  ;;  %v3005_v17 = vunpack.i.l.bf16 %v3004_v59  ;;  %2421 = vmatmul.msk.bf16.gmra.mxu0 %vm1973_vm13, %v1920_v60 }
 0x1fe   : > { %v3014_v39 = vpop.permute.xlu0 %3013 }
 0x1ff   : > { %v1864_v16 = vsel %vm1851_vm11, %v1831_v45, %v3005_v17  ;;  %v1865_v38 = vsel %vm1851_vm11, %v1832_v18, %v3006_v21  ;;  %v3016_v49 = vunpack.i.h.bf16 %v3014_v39  ;;  %v3015_v47 = vunpack.i.l.bf16 %v3014_v39 }
 0x201   : > { %v1897_v7 = vsel %vm1884_vm12, %v1864_v16, %v3015_v47  ;;  %v1898_v48 = vsel %vm1884_vm12, %v1865_v38, %v3016_v49 }
 0x202   : > { %v1923_v15 = vpack.c.bf16 %v1898_v48, %v1897_v7  ;;  %v3069_v24 = vpop.permute.xlu2 %3068 }
 0x204   : > { %2424 = vmatmul.msk.bf16.gmra.mxu1 %vm1973_vm13, %v1923_v15  ;;  %v3019_v43 = vpop.permute.xlu1 %3018 }
 0x205   : > { %v3021_v8 = vunpack.i.h.bf16 %v3019_v43  ;;  %v3020_v51 = vunpack.i.l.bf16 %v3019_v43 }
 0x206   : > { %v3029_v26 = vpop.permute.xlu0 %3028 }
 0x207   : > { %v1839_v29 = vsel %vm1818_vm10, %v4542_v14, %v3020_v51  ;;  %v1840_v30 = vsel %vm1818_vm10, %v4539_v10, %v3021_v8  ;;  %v3031_v32 = vunpack.i.h.bf16 %v3029_v26  ;;  %v3030_v34 = vunpack.i.l.bf16 %v3029_v26 }
 0x208   : > { %v1845_v10 = vsel %vm1818_vm10, %v4567_v4, %v3025_v52  ;;  %v3071_v51 = vunpack.i.h.bf16 %v3069_v24 }
 0x209   : > { %v1872_v28 = vsel %vm1851_vm11, %v1839_v29, %v3030_v34  ;;  %v1873_v2 = vsel %vm1851_vm11, %v1840_v30, %v3031_v32 }
 0x20a   : > { %v1905_v53 = vsel %vm1884_vm12, %v1872_v28, %v3040_v20  ;;  %v1906_v22 = vsel %vm1884_vm12, %v1873_v2, %v3041_v58  ;;  %v3084_v39 = vpop.permute.xlu2 %3083  ;;  %v3070_v58 = vunpack.i.l.bf16 %v3069_v24 }
 0x20b   : > { %v1927_v61 = vpack.c.bf16 %v1906_v22, %v1905_v53  ;;  %v3086_v49 = vunpack.i.h.bf16 %v3084_v39 }
 0x20c   : > { %v3034_v12 = vpop.permute.xlu1 %3033 }
 0x20d   : > { %v3036_v9 = vunpack.i.h.bf16 %v3034_v12  ;;  %v3035_v14 = vunpack.i.l.bf16 %v3034_v12  ;;  %2428 = vmatmul.msk.bf16.gmra.mxu2 %vm1973_vm13, %v1927_v61 }
 0x20e   : > { %v3044_v42 = vpop.permute.xlu0 %3043 }
 0x20f   : > { %v1878_v31 = vsel %vm1851_vm11, %v1845_v10, %v3035_v14  ;;  %v1879_v27 = vsel %vm1851_vm11, %v1846_v50, %v3036_v9  ;;  %v3046_v33 = vunpack.i.h.bf16 %v3044_v42  ;;  %v3045_v13 = vunpack.i.l.bf16 %v3044_v42 }
 0x211   : > { %v1911_v63 = vsel %vm1884_vm12, %v1878_v31, %v3045_v13  ;;  %v1912_v44 = vsel %vm1884_vm12, %v1879_v27, %v3046_v33 }
 0x212   : > { %v1930_v36 = vpack.c.bf16 %v1912_v44, %v1911_v63  ;;  %v3099_v9 = vpop.permute.xlu2 %3098 }
 0x213   : > { %v3101_v10 = vunpack.i.h.bf16 %v3099_v9 }
 0x214   : > { %2431 = vmatmul.msk.bf16.gmra.mxu3 %vm1973_vm13, %v1930_v36  ;;  %v3049_v4 = vpop.permute.xlu1 %3048 }
 0x215   : > { %v3051_v19 = vunpack.i.h.bf16 %v3049_v4  ;;  %v3050_v62 = vunpack.i.l.bf16 %v3049_v4 }
 0x216   : > { %v3059_v25 = vpop.permute.xlu0 %3058 }
 0x217   : > { %v1833_v55 = vsel %vm1818_vm10, %v4514_v3, %v3050_v62  ;;  %v1834_v37 = vsel %vm1818_vm10, %v4511_v1, %v3051_v19  ;;  %v3061_v23 = vunpack.i.h.bf16 %v3059_v25  ;;  %v3060_v60 = vunpack.i.l.bf16 %v3059_v25 }
 0x218   : > { %v1866_v59 = vsel %vm1851_vm11, %v1833_v55, %v3055_v46  ;;  %v1867_v21 = vsel %vm1851_vm11, %v1834_v37, %v3056_v40  ;;  %v3085_v1 = vunpack.i.l.bf16 %v3084_v39 }
 0x219   : > { %v1899_v17 = vsel %vm1884_vm12, %v1866_v59, %v3060_v60  ;;  %v1900_v45 = vsel %vm1884_vm12, %v1867_v21, %v3061_v23 }
 0x21a   : > { %v1924_v18 = vpack.c.bf16 %v1900_v45, %v1899_v17 }
 0x21c   : > { %v3064_v11 = vpop.permute.xlu1 %3063  ;;  %2425 = vmatmul.msk.bf16.gmra.mxu1 %vm1973_vm13, %v1924_v18 }
 0x21d   : > { %v3066_v16 = vunpack.i.h.bf16 %v3064_v11  ;;  %v3065_v3 = vunpack.i.l.bf16 %v3064_v11 }
 0x21e   : > { %v3074_v38 = vpop.permute.xlu0 %3073 }
 0x21f   : > { %v1841_v47 = vsel %vm1818_vm10, %v4627_v6, %v3065_v3  ;;  %v1842_v7 = vsel %vm1818_vm10, %v4631_v35, %v3066_v16  ;;  %v3076_v48 = vunpack.i.h.bf16 %v3074_v38  ;;  %v3075_v15 = vunpack.i.l.bf16 %v3074_v38 }
 0x220   : > { %v1847_v6 = vsel %vm1818_vm10, %v4648_v5, %v3070_v58  ;;  %v1848_v35 = vsel %vm1818_vm10, %v4652_v56, %v3071_v51  ;;  %v3100_v56 = vunpack.i.l.bf16 %v3099_v9 }
 0x221   : > { %v1874_v43 = vsel %vm1851_vm11, %v1841_v47, %v3075_v15  ;;  %v1875_v8 = vsel %vm1851_vm11, %v1842_v7, %v3076_v48 }
 0x222   : > { %v1907_v20 = vsel %vm1884_vm12, %v1874_v43, %v3085_v1  ;;  %v1908_v26 = vsel %vm1884_vm12, %v1875_v8, %v3086_v49 }
 0x223   : > { %v1928_v29 = vpack.c.bf16 %v1908_v26, %v1907_v20 }
 0x224   : > { %v3079_v30 = vpop.permute.xlu1 %3078 }
 0x225   : > { %v3081_v32 = vunpack.i.h.bf16 %v3079_v30  ;;  %v3080_v34 = vunpack.i.l.bf16 %v3079_v30  ;;  %2429 = vmatmul.msk.bf16.gmra.mxu2 %vm1973_vm13, %v1928_v29 }
 0x226   : > { %v3089_v41 = vpop.permute.xlu0 %3088 }
 0x227   : > { %v1880_v28 = vsel %vm1851_vm11, %v1847_v6, %v3080_v34  ;;  %v1881_v2 = vsel %vm1851_vm11, %v1848_v35, %v3081_v32  ;;  %v3091_v0 = vunpack.i.h.bf16 %v3089_v41  ;;  %v3090_v52 = vunpack.i.l.bf16 %v3089_v41 }
 0x229   : > { %v1913_v53 = vsel %vm1884_vm12, %v1880_v28, %v3090_v52  ;;  %v1914_v22 = vsel %vm1884_vm12, %v1881_v2, %v3091_v0 }
 0x22a   : > { %v1931_v61 = vpack.c.bf16 %v1914_v22, %v1913_v53 }
 0x22c   : > { %2432 = vmatmul.msk.bf16.gmra.mxu3 %vm1973_vm13, %v1931_v61  ;;  %v3094_v12 = vpop.permute.xlu1 %3093 }
 0x22d   : > { %v3096_v5 = vunpack.i.h.bf16 %v3094_v12  ;;  %v3095_v14 = vunpack.i.l.bf16 %v3094_v12 }
 0x22e   : > { %v3104_v50 = vpop.permute.xlu0 %3103 }
 0x22f   : > { %v1816_v42 = vsel %vm1785_vm8, %v4527_v54, %v3095_v14  ;;  %v1817_v31 = vsel %vm1785_vm8, %v4531_v57, %v3096_v5  ;;  %v3106_v27 = vunpack.i.h.bf16 %v3104_v50  ;;  %v3105_v33 = vunpack.i.l.bf16 %v3104_v50  ;;  %v4850_v54 = vld [vmem:[%s5118_s4] ss:$0 sm:$0xff] }
 0x230   : > { %v1849_v13 = vsel %vm1818_vm10, %v1816_v42, %v3100_v56  ;;  %v1850_v63 = vsel %vm1818_vm10, %v1817_v31, %v3101_v10 }
 0x231   : > { %v1882_v40 = vsel %vm1851_vm11, %v1849_v13, %v3105_v33  ;;  %v1883_v46 = vsel %vm1851_vm11, %v1850_v63, %v3106_v27 }
 0x234   : > { %v3109_v44 = vpop.permute.xlu1 %3108 }
 0x235   : > { %v3111_v36 = vunpack.i.h.bf16 %v3109_v44  ;;  %v3110_v24 = vunpack.i.l.bf16 %v3109_v44 }
 0x237   : > { %v1915_v57 = vsel %vm1884_vm12, %v1882_v40, %v3110_v24  ;;  %v1916_v4 = vsel %vm1884_vm12, %v1883_v46, %v3111_v36 }
 0x238   : > { %v1932_v19 = vpack.c.bf16 %v1916_v4, %v1915_v57 }
 0x239   : > { %v2035_v62 = vpop.f32.mrf.mxu0 }
 0x23a   : > { %v2036_v25 = vadd.f32 %v4850_v54, %v2035_v62 }
 0x23c   : > { %2115 = vst.msk [vmem:[%s3218_s10] sm:$0xff] %vm495_vm2, %v2036_v25  ;;  %2433 = vmatmul.msk.bf16.gmra.mxu3 %vm1973_vm13, %v1932_v19  ;;  %v2221_v37 = vmul.f32 %v2036_v25, %v2036_v25  ;;  %v2148_v60 = vsel %vm495_vm2, %v2036_v25, 0.0 }
 0x23e   : > { %v2253_v45 = vsel %vm495_vm2, %v2221_v37, 0.0 }
 0x241   : > { %v2037_v55 = vpop.f32.mrf.mxu0 }
 0x242   : > { %v2038_v23 = vadd.f32 %v4850_v54, %v2037_v55 }
 0x244   : > { %2116 = vst.msk [vmem:[%s3218_s10 + $0x8] sm:$0xff] %vm495_vm2, %v2038_v23  ;;  %v2149_v59 = vsel %vm495_vm2, %v2038_v23, 0.0  ;;  %v2222_v21 = vmul.f32 %v2038_v23, %v2038_v23 }
 0x245   : > { %v2150_v17 = vadd.f32 %v2149_v59, %v2148_v60 }
 0x246   : > { %v2254_v18 = vsel %vm495_vm2, %v2222_v21, 0.0 }
 0x247   : > { %v2255_v39 = vadd.f32 %v2254_v18, %v2253_v45 }
 0x249   : > { %v2055_v11 = vpop.f32.mrf.mxu1  ;;  %v2040_v16 = vpop.f32.mrf.mxu0 }
 0x24a   : > { %v4866_v3 = vadd.f32 %v4850_v54, %v2055_v11  ;;  %v2041_v38 = vadd.f32 %v4850_v54, %v2040_v16 }
 0x24c   : > { %2123 = vst.msk [vmem:[%s3218_s10 + $0x40] sm:$0xff] %vm495_vm2, %v4866_v3  ;;  %v2151_v49 = vsel %vm495_vm2, %v2041_v38, 0.0  ;;  %v2223_v1 = vmul.f32 %v2041_v38, %v2041_v38  ;;  %v2229_v21 = vmul.f32 %v4866_v3, %v4866_v3  ;;  %v2163_v11 = vsel %vm495_vm2, %v4866_v3, 0.0 }
 0x24d   : > { %2117 = vst.msk [vmem:[%s3218_s10 + $0x10] sm:$0xff] %vm495_vm2, %v2041_v38  ;;  %v2152_v47 = vadd.f32 %v2151_v49, %v2150_v17 }
 0x24e   : > { %v2256_v7 = vsel %vm495_vm2, %v2223_v1, 0.0 }
 0x24f   : > { %v2257_v48 = vadd.f32 %v2256_v7, %v2255_v39 }
 0x251   : > { %v2057_v15 = vpop.f32.mrf.mxu1  ;;  %v2042_v43 = vpop.f32.mrf.mxu0 }
 0x252   : > { %v4877_v8 = vadd.f32 %v4850_v54, %v2057_v15  ;;  %v2043_v51 = vadd.f32 %v4850_v54, %v2042_v43 }
 0x254   : > { %2124 = vst.msk [vmem:[%s3218_s10 + $0x48] sm:$0xff] %vm495_vm2, %v4877_v8  ;;  %v2224_v12 = vmul.f32 %v2043_v51, %v2043_v51  ;;  %v2153_v14 = vsel %vm495_vm2, %v2043_v51, 0.0  ;;  %v2230_v16 = vmul.f32 %v4877_v8, %v4877_v8  ;;  %v2165_v7 = vsel %vm495_vm2, %v4877_v8, 0.0 }
 0x255   : > { %2118 = vst.msk [vmem:[%s3218_s10 + $0x18] sm:$0xff] %vm495_vm2, %v2043_v51  ;;  %v2154_v27 = vadd.f32 %v2153_v14, %v2152_v47  ;;  %v2268_v47 = vsel %vm495_vm2, %v2229_v21, 0.0 }
 0x256   : > { %v2258_v50 = vsel %vm495_vm2, %v2224_v12, 0.0  ;;  %v2270_v3 = vsel %vm495_vm2, %v2230_v16, 0.0 }
 0x257   : > { %v2075_v58 = vpop.f32.mrf.mxu2  ;;  %v2259_v36 = vadd.f32 %v2258_v50, %v2257_v48 }
 0x258   : > { %v4886_v20 = vadd.f32 %v4850_v54, %v2075_v58 }
 0x25a   : > { %2131 = vst.msk [vmem:[%s3218_s10 + $0x80] sm:$0xff] %vm495_vm2, %v4886_v20  ;;  %v2045_v26 = vpop.f32.mrf.mxu0 }
 0x25b   : > { %v2046_v29 = vadd.f32 %v4850_v54, %v2045_v26 }
 0x25d   : > { %2119 = vst.msk [vmem:[%s3218_s10 + $0x20] sm:$0xff] %vm495_vm2, %v2046_v29  ;;  %v2225_v10 = vmul.f32 %v2046_v29, %v2046_v29  ;;  %v2155_v42 = vsel %vm495_vm2, %v2046_v29, 0.0 }
 0x25e   : > { %v2156_v24 = vadd.f32 %v2155_v42, %v2154_v27 }
 0x25f   : > { %v2077_v30 = vpop.f32.mrf.mxu2  ;;  %v2260_v33 = vsel %vm495_vm2, %v2225_v10, 0.0 }
 0x260   : > { %v4895_v32 = vadd.f32 %v4850_v54, %v2077_v30  ;;  %v2261_v19 = vadd.f32 %v2260_v33, %v2259_v36 }
 0x261   : > { %v2060_v34 = vpop.f32.mrf.mxu1 }
 0x262   : > { %2132 = vst.msk [vmem:[%s3218_s10 + $0x88] sm:$0xff] %vm495_vm2, %v4895_v32  ;;  %v4901_v6 = vadd.f32 %v4850_v54, %v2060_v34  ;;  %v2047_v35 = vpop.f32.mrf.mxu0 }
 0x263   : > { %v2048_v41 = vadd.f32 %v4850_v54, %v2047_v35 }
 0x264   : > { %2125 = vst.msk [vmem:[%s3218_s10 + $0x50] sm:$0xff] %vm495_vm2, %v4901_v6  ;;  %v2231_v30 = vmul.f32 %v4901_v6, %v4901_v6  ;;  %v2167_v8 = vsel %vm495_vm2, %v4901_v6, 0.0 }
 0x265   : > { %2120 = vst.msk [vmem:[%s3218_s10 + $0x28] sm:$0xff] %vm495_vm2, %v2048_v41  ;;  %v2226_v31 = vmul.f32 %v2048_v41, %v2048_v41  ;;  %v2157_v13 = vsel %vm495_vm2, %v2048_v41, 0.0 }
 0x266   : > { %v2158_v62 = vadd.f32 %v2157_v13, %v2156_v24  ;;  %v2272_v35 = vsel %vm495_vm2, %v2231_v30, 0.0 }
 0x267   : > { %v2262_v46 = vsel %vm495_vm2, %v2226_v31, 0.0 }
 0x268   : > { %v2263_v60 = vadd.f32 %v2262_v46, %v2261_v19 }
 0x269   : > { %v2062_v28 = vpop.f32.mrf.mxu1 }
 0x26a   : > { %v4910_v2 = vadd.f32 %v4850_v54, %v2062_v28 }
 0x26c   : > { %2126 = vst.msk [vmem:[%s3218_s10 + $0x58] sm:$0xff] %vm495_vm2, %v4910_v2  ;;  %v2232_v41 = vmul.f32 %v4910_v2, %v4910_v2 }
 0x26e   : > { %v2274_v10 = vsel %vm495_vm2, %v2232_v41, 0.0 }
 0x270   : > { %v2080_v0 = vpop.f32.mrf.mxu2 }
 0x271   : > { %v4916_v52 = vadd.f32 %v4850_v54, %v2080_v0 }
 0x273   : > { %2133 = vst.msk [vmem:[%s3218_s10 + $0x90] sm:$0xff] %vm495_vm2, %v4916_v52 }
 0x277   : > { %v2095_v53 = vpop.f32.mrf.mxu3 }
 0x278   : > { %v4922_v22 = vadd.f32 %v4850_v54, %v2095_v53  ;;  %v2082_v61 = vpop.f32.mrf.mxu2  ;;  %v2169_v53 = vsel %vm495_vm2, %v4910_v2, 0.0 }
 0x279   : > { %v4925_v9 = vadd.f32 %v4850_v54, %v2082_v61 }
 0x27a   : > { %2139 = vst.msk [vmem:[%s3218_s10 + $0xc0] sm:$0xff] %vm495_vm2, %v4922_v22  ;;  %v2050_v5 = vpop.f32.mrf.mxu0 }
 0x27b   : > { %2134 = vst.msk [vmem:[%s3218_s10 + $0x98] sm:$0xff] %vm495_vm2, %v4925_v9  ;;  %v2051_v56 = vadd.f32 %v4850_v54, %v2050_v5 }
 0x27d   : > { %2121 = vst.msk [vmem:[%s3218_s10 + $0x30] sm:$0xff] %vm495_vm2, %v2051_v56  ;;  %v2227_v63 = vmul.f32 %v2051_v56, %v2051_v56  ;;  %v2159_v57 = vsel %vm495_vm2, %v2051_v56, 0.0 }
 0x27e   : > { %v2160_v59 = vadd.f32 %v2159_v57, %v2158_v62 }
 0x27f   : > { %v2097_v44 = vpop.f32.mrf.mxu3  ;;  %v2264_v37 = vsel %vm495_vm2, %v2227_v63, 0.0 }
 0x280   : > { %v4942_v40 = vadd.f32 %v4850_v54, %v2097_v44  ;;  %v2265_v18 = vadd.f32 %v2264_v37, %v2263_v60 }
 0x281   : > { %v2065_v4 = vpop.f32.mrf.mxu1 }
 0x282   : > { %2140 = vst.msk [vmem:[%s3218_s10 + $0xc8] sm:$0xff] %vm495_vm2, %v4942_v40  ;;  %v2066_v25 = vadd.f32 %v4850_v54, %v2065_v4  ;;  %v2052_v55 = vpop.f32.mrf.mxu0 }
 0x283   : > { %v2053_v23 = vadd.f32 %v4850_v54, %v2052_v55 }
 0x284   : > { %2127 = vst.msk [vmem:[%s3218_s10 + $0x60] sm:$0xff] %vm495_vm2, %v2066_v25  ;;  %v2233_v56 = vmul.f32 %v2066_v25, %v2066_v25  ;;  %v2171_v2 = vsel %vm495_vm2, %v2066_v25, 0.0 }
 0x285   : > { %2122 = vst.msk [vmem:[%s3218_s10 + $0x38] sm:$0xff] %vm495_vm2, %v2053_v23  ;;  %v2161_v17 = vsel %vm495_vm2, %v2053_v23, 0.0  ;;  %v2228_v45 = vmul.f32 %v2053_v23, %v2053_v23  ;;  %v2237_v23 = vmul.f32 %v4886_v20, %v4886_v20 }
 0x286   : > { %v2162_v39 = vadd.f32 %v2161_v17, %v2160_v59  ;;  %v2276_v27 = vsel %vm495_vm2, %v2233_v56, 0.0 }
 0x287   : > { %v2266_v38 = vsel %vm495_vm2, %v2228_v45, 0.0  ;;  %v2179_v45 = vsel %vm495_vm2, %v4886_v20, 0.0 }
 0x288   : > { %v2164_v49 = vadd.f32 %v2163_v11, %v2162_v39  ;;  %v2267_v1 = vadd.f32 %v2266_v38, %v2265_v18  ;;  %v2238_v18 = vmul.f32 %v4895_v32, %v4895_v32  ;;  %v2284_v38 = vsel %vm495_vm2, %v2237_v23, 0.0 }
 0x289   : > { %v2067_v48 = vpop.f32.mrf.mxu1 }
 0x28a   : > { %v2166_v15 = vadd.f32 %v2165_v7, %v2164_v49  ;;  %v2269_v43 = vadd.f32 %v2268_v47, %v2267_v1  ;;  %v2068_v51 = vadd.f32 %v4850_v54, %v2067_v48  ;;  %v2181_v49 = vsel %vm495_vm2, %v4895_v32, 0.0 }
 0x28b   : > { %v2239_v1 = vmul.f32 %v4916_v52, %v4916_v52 }
 0x28c   : > { %v2271_v58 = vadd.f32 %v2270_v3, %v2269_v43  ;;  %2128 = vst.msk [vmem:[%s3218_s10 + $0x68] sm:$0xff] %vm495_vm2, %v2068_v51  ;;  %v2168_v34 = vadd.f32 %v2167_v8, %v2166_v15  ;;  %v2234_v33 = vmul.f32 %v2068_v51, %v2068_v51  ;;  %v2173_v36 = vsel %vm495_vm2, %v2068_v51, 0.0 }
 0x28d   : > { %v2286_v15 = vsel %vm495_vm2, %v2238_v18, 0.0  ;;  %v2183_v43 = vsel %vm495_vm2, %v4916_v52, 0.0  ;;  %v2240_v51 = vmul.f32 %v4925_v9, %v4925_v9  ;;  %v2288_v32 = vsel %vm495_vm2, %v2239_v1, 0.0 }
 0x28e   : > { %v2273_v28 = vadd.f32 %v2272_v35, %v2271_v58  ;;  %v2170_v5 = vadd.f32 %v2169_v53, %v2168_v34  ;;  %v2278_v19 = vsel %vm495_vm2, %v2234_v33, 0.0 }
 0x28f   : > { %v2290_v35 = vsel %vm495_vm2, %v2240_v51, 0.0 }
 0x290   : > { %v2085_v26 = vpop.f32.mrf.mxu2  ;;  %v2275_v42 = vadd.f32 %v2274_v10, %v2273_v28  ;;  %v2172_v31 = vadd.f32 %v2171_v2, %v2170_v5 }
 0x291   : > { %v4972_v29 = vadd.f32 %v4850_v54, %v2085_v26  ;;  %v2185_v26 = vsel %vm495_vm2, %v4925_v9, 0.0 }
 0x292   : > { %v2277_v63 = vadd.f32 %v2276_v27, %v2275_v42  ;;  %v2174_v57 = vadd.f32 %v2173_v36, %v2172_v31 }
 0x293   : > { %2135 = vst.msk [vmem:[%s3218_s10 + $0xa0] sm:$0xff] %vm495_vm2, %v4972_v29  ;;  %v2241_v30 = vmul.f32 %v4972_v29, %v4972_v29  ;;  %v2187_v52 = vsel %vm495_vm2, %v4972_v29, 0.0 }
 0x294   : > { %v2279_v55 = vadd.f32 %v2278_v19, %v2277_v63 }
 0x295   : > { %v2292_v9 = vsel %vm495_vm2, %v2241_v30, 0.0 }
 0x297   : > { %v2100_v0 = vpop.f32.mrf.mxu3 }
 0x298   : > { %v4987_v61 = vadd.f32 %v4850_v54, %v2100_v0  ;;  %v2087_v12 = vpop.f32.mrf.mxu2 }
 0x299   : > { %v4990_v6 = vadd.f32 %v4850_v54, %v2087_v12  ;;  %v2070_v14 = vpop.f32.mrf.mxu1 }
 0x29a   : > { %2141 = vst.msk [vmem:[%s3218_s10 + $0xd0] sm:$0xff] %vm495_vm2, %v4987_v61  ;;  %v2071_v50 = vadd.f32 %v4850_v54, %v2070_v14  ;;  %v2247_v23 = vmul.f32 %v4987_v61, %v4987_v61 }
 0x29b   : > { %2136 = vst.msk [vmem:[%s3218_s10 + $0xa8] sm:$0xff] %vm495_vm2, %v4990_v6  ;;  %v2242_v41 = vmul.f32 %v4990_v6, %v4990_v6  ;;  %v2189_v12 = vsel %vm495_vm2, %v4990_v6, 0.0  ;;  %v2245_v6 = vmul.f32 %v4922_v22, %v4922_v22 }
 0x29c   : > { %2129 = vst.msk [vmem:[%s3218_s10 + $0x70] sm:$0xff] %vm495_vm2, %v2071_v50  ;;  %v2235_v13 = vmul.f32 %v2071_v50, %v2071_v50  ;;  %v2175_v24 = vsel %vm495_vm2, %v2071_v50, 0.0 }
 0x29d   : > { %v2176_v37 = vadd.f32 %v2175_v24, %v2174_v57  ;;  %v2294_v42 = vsel %vm495_vm2, %v2242_v41, 0.0  ;;  %v2195_v24 = vsel %vm495_vm2, %v4922_v22, 0.0  ;;  %v2246_v57 = vmul.f32 %v4942_v40, %v4942_v40 }
 0x29e   : > { %v2280_v62 = vsel %vm495_vm2, %v2235_v13, 0.0 }
 0x29f   : > { %v2102_v44 = vpop.f32.mrf.mxu3  ;;  %v2281_v21 = vadd.f32 %v2280_v62, %v2279_v55  ;;  %v2300_v55 = vsel %vm495_vm2, %v2245_v6, 0.0  ;;  %v2220_v6 = vld [vmem:[%s5121_s7] sm:$0x1] }
 0x2a0   : > { %v5007_v46 = vadd.f32 %v4850_v54, %v2102_v44 }
 0x2a1   : > { %v2072_v4 = vpop.f32.mrf.mxu1 }
 0x2a2   : > { %2142 = vst.msk [vmem:[%s3218_s10 + $0xd8] sm:$0xff] %vm495_vm2, %v5007_v46  ;;  %v2073_v25 = vadd.f32 %v4850_v54, %v2072_v4 }
 0x2a4   : > { %2130 = vst.msk [vmem:[%s3218_s10 + $0x78] sm:$0xff] %vm495_vm2, %v2073_v25  ;;  %v2177_v60 = vsel %vm495_vm2, %v2073_v25, 0.0  ;;  %v2236_v59 = vmul.f32 %v2073_v25, %v2073_v25 }
 0x2a5   : > { %v2178_v17 = vadd.f32 %v2177_v60, %v2176_v37  ;;  %v2197_v37 = vsel %vm495_vm2, %v4942_v40, 0.0 }
 0x2a6   : > { %v2282_v39 = vsel %vm495_vm2, %v2236_v59, 0.0 }
 0x2a7   : > { %v2180_v11 = vadd.f32 %v2179_v45, %v2178_v17  ;;  %v2283_v16 = vadd.f32 %v2282_v39, %v2281_v21  ;;  %v2302_v21 = vsel %vm495_vm2, %v2246_v57, 0.0  ;;  %v2199_v17 = vsel %vm495_vm2, %v4987_v61, 0.0 }
 0x2a8   : > { %v2090_v47 = vpop.f32.mrf.mxu2  ;;  %v2248_v45 = vmul.f32 %v5007_v46, %v5007_v46  ;;  %v2304_v39 = vsel %vm495_vm2, %v2247_v23, 0.0 }
 0x2a9   : > { %v2182_v7 = vadd.f32 %v2181_v49, %v2180_v11  ;;  %v2285_v48 = vadd.f32 %v2284_v38, %v2283_v16  ;;  %v2091_v20 = vadd.f32 %v4850_v54, %v2090_v47  ;;  %v2201_v11 = vsel %vm495_vm2, %v5007_v46, 0.0 }
 0x2aa   : > { %v2306_v49 = vsel %vm495_vm2, %v2248_v45, 0.0 }
 0x2ab   : > { %v2184_v3 = vadd.f32 %v2183_v43, %v2182_v7  ;;  %v2287_v58 = vadd.f32 %v2286_v15, %v2285_v48  ;;  %2137 = vst.msk [vmem:[%s3218_s10 + $0xb0] sm:$0xff] %vm495_vm2, %v2091_v20  ;;  %v2243_v5 = vmul.f32 %v2091_v20, %v2091_v20  ;;  %v2191_v2 = vsel %vm495_vm2, %v2091_v20, 0.0 }
 0x2ad   : > { %v2289_v8 = vadd.f32 %v2288_v32, %v2287_v58  ;;  %v2186_v34 = vadd.f32 %v2185_v26, %v2184_v3  ;;  %v2296_v13 = vsel %vm495_vm2, %v2243_v5, 0.0 }
 0x2af   : > { %v2188_v28 = vadd.f32 %v2187_v52, %v2186_v34  ;;  %v2291_v0 = vadd.f32 %v2290_v35, %v2289_v8  ;;  %v2105_v53 = vpop.f32.mrf.mxu3 }
 0x2b0   : > { %v2106_v14 = vadd.f32 %v4850_v54, %v2105_v53  ;;  %v2092_v10 = vpop.f32.mrf.mxu2 }
 0x2b1   : > { %v2190_v56 = vadd.f32 %v2189_v12, %v2188_v28  ;;  %v2293_v50 = vadd.f32 %v2292_v9, %v2291_v0  ;;  %v2093_v29 = vadd.f32 %v4850_v54, %v2092_v10 }
 0x2b2   : > { %2143 = vst.msk [vmem:[%s3218_s10 + $0xe0] sm:$0xff] %vm495_vm2, %v2106_v14  ;;  %v2249_v1 = vmul.f32 %v2106_v14, %v2106_v14  ;;  %v2203_v7 = vsel %vm495_vm2, %v2106_v14, 0.0 }
 0x2b3   : > { %v2192_v31 = vadd.f32 %v2191_v2, %v2190_v56  ;;  %v2295_v27 = vadd.f32 %v2294_v42, %v2293_v50  ;;  %2138 = vst.msk [vmem:[%s3218_s10 + $0xb8] sm:$0xff] %vm495_vm2, %v2093_v29  ;;  %v2244_v33 = vmul.f32 %v2093_v29, %v2093_v29  ;;  %v2193_v63 = vsel %vm495_vm2, %v2093_v29, 0.0 }
 0x2b4   : > { %v2308_v15 = vsel %vm495_vm2, %v2249_v1, 0.0 }
 0x2b5   : > { %v2297_v44 = vadd.f32 %v2296_v13, %v2295_v27  ;;  %v2194_v36 = vadd.f32 %v2193_v63, %v2192_v31  ;;  %v2298_v4 = vsel %vm495_vm2, %v2244_v33, 0.0  ;;  %v2147_v31 = vld [vmem:[%s5120_s6] sm:$0x1] }
 0x2b7   : > { %v2196_v19 = vadd.f32 %v2195_v24, %v2194_v36  ;;  %v2299_v62 = vadd.f32 %v2298_v4, %v2297_v44  ;;  %v2107_v25 = vpop.f32.mrf.mxu3 }
 0x2b8   : > { %v2108_v60 = vadd.f32 %v4850_v54, %v2107_v25 }
 0x2b9   : > { %v2198_v59 = vadd.f32 %v2197_v37, %v2196_v19  ;;  %v2301_v22 = vadd.f32 %v2300_v55, %v2299_v62 }
 0x2ba   : > { %2144 = vst.msk [vmem:[%s3218_s10 + $0xe8] sm:$0xff] %vm495_vm2, %v2108_v60  ;;  %v2250_v43 = vmul.f32 %v2108_v60, %v2108_v60  ;;  %v2205_v46 = vsel %vm495_vm2, %v2108_v60, 0.0 }
 0x2bb   : > { %v2303_v18 = vadd.f32 %v2302_v21, %v2301_v22  ;;  %v2200_v40 = vadd.f32 %v2199_v17, %v2198_v59 }
 0x2bc   : > { %v2310_v32 = vsel %vm495_vm2, %v2250_v43, 0.0 }
 0x2bd   : > { %v2202_v16 = vadd.f32 %v2201_v11, %v2200_v40  ;;  %v2305_v38 = vadd.f32 %v2304_v39, %v2303_v18 }
 0x2bf   : > { %v2307_v47 = vadd.f32 %v2306_v49, %v2305_v38  ;;  %v2110_v61 = vpop.f32.mrf.mxu3  ;;  %v2204_v20 = vadd.f32 %v2203_v7, %v2202_v16 }
 0x2c0   : > { %v2111_v48 = vadd.f32 %v4850_v54, %v2110_v61 }
 0x2c1   : > { %v2309_v51 = vadd.f32 %v2308_v15, %v2307_v47  ;;  %v2206_v58 = vadd.f32 %v2205_v46, %v2204_v20 }
 0x2c2   : > { %2145 = vst.msk [vmem:[%s3218_s10 + $0xf0] sm:$0xff] %vm495_vm2, %v2111_v48  ;;  %v2251_v3 = vmul.f32 %v2111_v48, %v2111_v48  ;;  %v2207_v26 = vsel %vm495_vm2, %v2111_v48, 0.0 }
 0x2c3   : > { %v2311_v30 = vadd.f32 %v2310_v32, %v2309_v51  ;;  %v2208_v52 = vadd.f32 %v2207_v26, %v2206_v58 }
 0x2c4   : > { %v2312_v34 = vsel %vm495_vm2, %v2251_v3, 0.0 }
 0x2c5   : > { %v2313_v0 = vadd.f32 %v2312_v34, %v2311_v30 }
 0x2c7   : > { %v2112_v8 = vpop.f32.mrf.mxu3 }
 0x2c8   : > { %v2113_v35 = vadd.f32 %v4850_v54, %v2112_v8 }
 0x2ca   : > { %2146 = vst.msk [vmem:[%s3218_s10 + $0xf8] sm:$0xff] %vm495_vm2, %v2113_v35  ;;  %v2209_v41 = vsel %vm495_vm2, %v2113_v35, 0.0  ;;  %v2252_v28 = vmul.f32 %v2113_v35, %v2113_v35 }
 0x2cb   : > { %v2210_v53 = vadd.f32 %v2209_v41, %v2208_v52 }
 0x2cc   : > { %v2314_v9 = vsel %vm495_vm2, %v2252_v28, 0.0 }
 0x2cd   : > { %v2211_v12 = vrot.slane %v2210_v53, 4  ;;  %v2315_v5 = vadd.f32 %v2314_v9, %v2313_v0 }
 0x2cf   : > { %v2212_v14 = vadd.f32 %v2211_v12, %v2210_v53  ;;  %v2316_v10 = vrot.slane %v2315_v5, 4 }
 0x2d1   : > { %v2213_v56 = vrot.slane %v2212_v14, 2  ;;  %v2317_v50 = vadd.f32 %v2316_v10, %v2315_v5 }
 0x2d3   : > { %v2214_v29 = vadd.f32 %v2213_v56, %v2212_v14  ;;  %v2318_v42 = vrot.slane %v2317_v50, 2 }
 0x2d5   : > { %v2215_v2 = vrot.slane %v2214_v29, 1  ;;  %v2319_v54 = vadd.f32 %v2318_v42, %v2317_v50 }
 0x2d7   : > { %v2216_v27 = vadd.f32 %v2215_v2, %v2214_v29  ;;  %v2320_v33 = vrot.slane %v2319_v54, 1 }
 0x2d9   : > { %v2217_v13 = vadd.f32 %v2216_v27, %v2147_v31  ;;  %v2321_v63 = vadd.f32 %v2320_v33, %v2319_v54 }
 0x2db   : > { %2219 = vst.msk [vmem:[%s5120_s6] sm:$0x1] %vm2218_vm14, %v2217_v13  ;;  %v2322_v44 = vadd.f32 %v2321_v63, %v2220_v6 }
 0x2dd   : > { %2323 = vst.msk [vmem:[%s5121_s7] sm:$0x1] %vm2218_vm14, %v2322_v44 }
 0x2de PF: > { %s18_s24 = sadd.s32 1, %s3151_s24  }
 0x2df   : > { %p15_p5 = scmp.ge.s32.totalorder %s18_s24, 4  }
 0x2e1   :  { %17 = sbr.rel (!%p15_p5) target bundleno = 1 (0x1), region = 91 }

// kernel: upblock_forward.3
= control target key start
LH: loop header
LB: loop body
LE: loop exit
PB: predicated region body
PF: predicated region fallthrough
CT: control target
= control target key end

     0   :  { %s3065_s24 = smov 0   ;;  %s4895_s0 = inlined_call_operand.vmem [shape: f32[512,4], index: 0, kind: input, shape index: {}]   ;;  %s4896_s1 = inlined_call_operand.vmem [shape: f32[1,4], index: 1, kind: input, shape index: {}]   ;;  %s4897_s2 = inlined_call_operand.vmem [shape: f32[1,4], index: 2, kind: input, shape index: {}]   ;;  %s4898_s3 = inlined_call_operand.vmem [shape: bf16[36,8], index: 3, kind: input, shape index: {}]   ;;  %s4899_s4 = inlined_call_operand.vmem [shape: f32[1,8], index: 4, kind: input, shape index: {}]   ;;  %s4900_s5 = inlined_call_operand.vmem [shape: f32[512,8], index: 5, kind: output, shape index: {0}]   ;;  %s4901_s6 = inlined_call_operand.vmem [shape: f32[1,8], index: 6, kind: output, shape index: {1}]   ;;  %s4902_s7 = inlined_call_operand.vmem [shape: f32[1,8], index: 7, kind: output, shape index: {2}]  }
   0x1 LB: > { %s2273_s1 = sadd.s32 4294967295, %s3014_s24   ;;  %p2277_p0 = scmp.ge.s32.totalorder %s3014_s24, 1  ;;  %s3014_s24 = sphi %s3065_s24, %s18_s24  }
   0x2   : > { %p233_p1 = scmp.lt.s32.totalorder %s3014_s24, 3 }
   0x4   : > { %p234_p2 = pnand %p2277_p0, %p233_p1 }
   0x6   : > { %237 = sbr.rel (%p234_p2) target bundleno = 727 (0x2d7), region = 40 }
   0xb   : > { %s2278_s2 = sshll.u32 %s2273_s1, 5  ;;  %p2282_p4 = scmp.ne.s32.totalorder %s2273_s1, 0 }
   0xc   : > { %p266_p3 = scmp.lt.s32.totalorder %s2278_s2, 63 }
   0xd   : > { %281 = sbr.rel (%p2282_p4) target bundleno = 93 (0x5d), region = 44 }
   0xe   : > { %s5014_s2 = smov (!%p266_p3, %s2278_s2), 63 }
   0xf   : > { %s2279_s25 = sshll.u32 %s5014_s2, 3 }
  0x10   : > { %s3076_s28 = scalar_lea.vmem %s4895_s0, %s2279_s25  ;;  %s3081_s8 = scalar_lea.vmem %s4900_s5, %s2279_s25 }
  0x12   : > { %vm282_vm0 = vcmask 31744   ;;  %v3016_v0 = vmov 0.0   ;;  %vm286_vm1 = vcmask 24576   ;;  %vm356_vm2 = vcmask 57344  }
  0x13   : > { %283 = vst.msk [vmem:[#allocation2] sm:$0xff] %vm282_vm0, %v3016_v0 }
  0x14   : > { %284 = vst.msk [vmem:[#allocation2 + $0x8] sm:$0xff] %vm282_vm0, %v3016_v0 }
  0x15   : > { %285 = vst.msk [vmem:[#allocation2 + $0x10] sm:$0xff] %vm282_vm0, %v3016_v0 }
  0x16   : > { %288 = vst.msk [vmem:[#allocation2 + $0x20] sm:$0xff] %vm282_vm0, %v3016_v0 }
  0x17   : > { %289 = vst.msk [vmem:[#allocation2 + $0x28] sm:$0xff] %vm282_vm0, %v3016_v0 }
  0x18   : > { %290 = vst.msk [vmem:[#allocation2 + $0x30] sm:$0xff] %vm282_vm0, %v3016_v0 }
  0x19   : > { %292 = vst.msk [vmem:[#allocation2 + $0x40] sm:$0xff] %vm282_vm0, %v3016_v0 }
  0x1a   : > { %293 = vst.msk [vmem:[#allocation2 + $0x48] sm:$0xff] %vm282_vm0, %v3016_v0 }
  0x1b   : > { %294 = vst.msk [vmem:[#allocation2 + $0x50] sm:$0xff] %vm282_vm0, %v3016_v0 }
  0x1c   : > { %296 = vst.msk [vmem:[#allocation2 + $0x60] sm:$0xff] %vm282_vm0, %v3016_v0 }
  0x1d   : > { %297 = vst.msk [vmem:[#allocation2 + $0x68] sm:$0xff] %vm282_vm0, %v3016_v0 }
  0x1e   : > { %298 = vst.msk [vmem:[#allocation2 + $0x70] sm:$0xff] %vm282_vm0, %v3016_v0 }
  0x1f   : > { %300 = vst.msk [vmem:[#allocation2 + $0x80] sm:$0xff] %vm282_vm0, %v3016_v0 }
  0x20   : > { %301 = vst.msk [vmem:[#allocation2 + $0x88] sm:$0xff] %vm282_vm0, %v3016_v0 }
  0x21   : > { %302 = vst.msk [vmem:[#allocation2 + $0x90] sm:$0xff] %vm282_vm0, %v3016_v0 }
  0x22   : > { %304 = vst.msk [vmem:[#allocation2 + $0xa0] sm:$0xff] %vm282_vm0, %v3016_v0 }
  0x23   : > { %305 = vst.msk [vmem:[#allocation2 + $0xa8] sm:$0xff] %vm282_vm0, %v3016_v0 }
  0x24   : > { %306 = vst.msk [vmem:[#allocation2 + $0xb0] sm:$0xff] %vm282_vm0, %v3016_v0 }
  0x25   : > { %308 = vst.msk [vmem:[#allocation2 + $0xc0] sm:$0xff] %vm282_vm0, %v3016_v0 }
  0x26   : > { %309 = vst.msk [vmem:[#allocation2 + $0xc8] sm:$0xff] %vm282_vm0, %v3016_v0 }
  0x27   : > { %310 = vst.msk [vmem:[#allocation2 + $0xd0] sm:$0xff] %vm282_vm0, %v3016_v0 }
  0x28   : > { %312 = vst.msk [vmem:[#allocation2 + $0xe0] sm:$0xff] %vm282_vm0, %v3016_v0 }
  0x29   : > { %313 = vst.msk [vmem:[#allocation2 + $0xe8] sm:$0xff] %vm282_vm0, %v3016_v0 }
  0x2a   : > { %314 = vst.msk [vmem:[#allocation2 + $0xf0] sm:$0xff] %vm282_vm0, %v3016_v0 }
  0x2b   : > { %316 = vst.msk [vmem:[#allocation2 + $0x100] sm:$0xff] %vm282_vm0, %v3016_v0 }
  0x2c   : > { %317 = vst.msk [vmem:[#allocation2 + $0x108] sm:$0xff] %vm282_vm0, %v3016_v0 }
  0x2d   : > { %318 = vst.msk [vmem:[#allocation2 + $0x110] sm:$0xff] %vm282_vm0, %v3016_v0 }
  0x2e   : > { %320 = vst.msk [vmem:[#allocation2 + $0x120] sm:$0xff] %vm282_vm0, %v3016_v0 }
  0x2f   : > { %321 = vst.msk [vmem:[#allocation2 + $0x128] sm:$0xff] %vm282_vm0, %v3016_v0 }
  0x30   : > { %322 = vst.msk [vmem:[#allocation2 + $0x130] sm:$0xff] %vm282_vm0, %v3016_v0 }
  0x31   : > { %324 = vst.msk [vmem:[#allocation2 + $0x140] sm:$0xff] %vm282_vm0, %v3016_v0 }
  0x32   : > { %325 = vst.msk [vmem:[#allocation2 + $0x148] sm:$0xff] %vm282_vm0, %v3016_v0 }
  0x33   : > { %326 = vst.msk [vmem:[#allocation2 + $0x150] sm:$0xff] %vm282_vm0, %v3016_v0 }
  0x34   : > { %328 = vst.msk [vmem:[#allocation2 + $0x160] sm:$0xff] %vm282_vm0, %v3016_v0 }
  0x35   : > { %329 = vst.msk [vmem:[#allocation2 + $0x168] sm:$0xff] %vm282_vm0, %v3016_v0 }
  0x36   : > { %330 = vst.msk [vmem:[#allocation2 + $0x170] sm:$0xff] %vm282_vm0, %v3016_v0 }
  0x37   : > { %332 = vst.msk [vmem:[#allocation2 + $0x180] sm:$0xff] %vm282_vm0, %v3016_v0 }
  0x38   : > { %333 = vst.msk [vmem:[#allocation2 + $0x188] sm:$0xff] %vm282_vm0, %v3016_v0 }
  0x39   : > { %334 = vst.msk [vmem:[#allocation2 + $0x190] sm:$0xff] %vm282_vm0, %v3016_v0 }
  0x3a   : > { %336 = vst.msk [vmem:[#allocation2 + $0x1a0] sm:$0xff] %vm282_vm0, %v3016_v0 }
  0x3b   : > { %337 = vst.msk [vmem:[#allocation2 + $0x1a8] sm:$0xff] %vm282_vm0, %v3016_v0 }
  0x3c   : > { %338 = vst.msk [vmem:[#allocation2 + $0x1b0] sm:$0xff] %vm282_vm0, %v3016_v0 }
  0x3d   : > { %340 = vst.msk [vmem:[#allocation2 + $0x1c0] sm:$0xff] %vm282_vm0, %v3016_v0 }
  0x3e   : > { %341 = vst.msk [vmem:[#allocation2 + $0x1c8] sm:$0xff] %vm282_vm0, %v3016_v0 }
  0x3f   : > { %342 = vst.msk [vmem:[#allocation2 + $0x1d0] sm:$0xff] %vm282_vm0, %v3016_v0 }
  0x40   : > { %344 = vst.msk [vmem:[#allocation2 + $0x1e0] sm:$0xff] %vm282_vm0, %v3016_v0 }
  0x41   : > { %345 = vst.msk [vmem:[#allocation2 + $0x1e8] sm:$0xff] %vm282_vm0, %v3016_v0 }
  0x42   : > { %346 = vst.msk [vmem:[#allocation2 + $0x1f0] sm:$0xff] %vm282_vm0, %v3016_v0 }
  0x43   : > { %348 = vst.msk [vmem:[#allocation2 + $0x200] sm:$0xff] %vm282_vm0, %v3016_v0 }
  0x44   : > { %349 = vst.msk [vmem:[#allocation2 + $0x208] sm:$0xff] %vm282_vm0, %v3016_v0 }
  0x45   : > { %350 = vst.msk [vmem:[#allocation2 + $0x210] sm:$0xff] %vm282_vm0, %v3016_v0 }
  0x46   : > { %352 = vst.msk [vmem:[#allocation2 + $0x220] sm:$0xff] %vm282_vm0, %v3016_v0 }
  0x47   : > { %353 = vst.msk [vmem:[#allocation2 + $0x228] sm:$0xff] %vm282_vm0, %v3016_v0 }
  0x48   : > { %354 = vst.msk [vmem:[#allocation2 + $0x230] sm:$0xff] %vm282_vm0, %v3016_v0 }
  0x49   : > { %287 = vst.msk [vmem:[#allocation2 + $0x18] sm:$0x1] %vm286_vm1, %v3016_v0 }
  0x4a   : > { %291 = vst.msk [vmem:[#allocation2 + $0x38] sm:$0x1] %vm286_vm1, %v3016_v0 }
  0x4b   : > { %295 = vst.msk [vmem:[#allocation2 + $0x58] sm:$0x1] %vm286_vm1, %v3016_v0 }
  0x4c   : > { %299 = vst.msk [vmem:[#allocation2 + $0x78] sm:$0x1] %vm286_vm1, %v3016_v0 }
  0x4d   : > { %303 = vst.msk [vmem:[#allocation2 + $0x98] sm:$0x1] %vm286_vm1, %v3016_v0 }
  0x4e   : > { %307 = vst.msk [vmem:[#allocation2 + $0xb8] sm:$0x1] %vm286_vm1, %v3016_v0 }
  0x4f   : > { %311 = vst.msk [vmem:[#allocation2 + $0xd8] sm:$0x1] %vm286_vm1, %v3016_v0 }
  0x50   : > { %315 = vst.msk [vmem:[#allocation2 + $0xf8] sm:$0x1] %vm286_vm1, %v3016_v0 }
  0x51   : > { %319 = vst.msk [vmem:[#allocation2 + $0x118] sm:$0x1] %vm286_vm1, %v3016_v0 }
  0x52   : > { %323 = vst.msk [vmem:[#allocation2 + $0x138] sm:$0x1] %vm286_vm1, %v3016_v0 }
  0x53   : > { %327 = vst.msk [vmem:[#allocation2 + $0x158] sm:$0x1] %vm286_vm1, %v3016_v0 }
  0x54   : > { %331 = vst.msk [vmem:[#allocation2 + $0x178] sm:$0x1] %vm286_vm1, %v3016_v0 }
  0x55   : > { %335 = vst.msk [vmem:[#allocation2 + $0x198] sm:$0x1] %vm286_vm1, %v3016_v0 }
  0x56   : > { %339 = vst.msk [vmem:[#allocation2 + $0x1b8] sm:$0x1] %vm286_vm1, %v3016_v0 }
  0x57   : > { %343 = vst.msk [vmem:[#allocation2 + $0x1d8] sm:$0x1] %vm286_vm1, %v3016_v0 }
  0x58   : > { %347 = vst.msk [vmem:[#allocation2 + $0x1f8] sm:$0x1] %vm286_vm1, %v3016_v0 }
  0x59   : > { %351 = vst.msk [vmem:[#allocation2 + $0x218] sm:$0x1] %vm286_vm1, %v3016_v0 }
  0x5a   : > { %355 = vst.msk [vmem:[#allocation2 + $0x238] sm:$0x1] %vm286_vm1, %v3016_v0 }
  0x5b   : > { %357 = vst.msk [vmem:[%s4901_s6] sm:$0x1] %vm356_vm2, %v3016_v0 }
  0x5c   : > { %358 = vst.msk [vmem:[%s4902_s7] sm:$0x1] %vm356_vm2, %v3016_v0 }
  0x5d PF: > { %v3235_v1 = vld [vmem:[#allocation2 + $0x8] sm:$0xff]  ;;  %v3237_v2 = vld [vmem:[#allocation2 + $0x10] sm:$0xff]  ;;  %vm392_vm3 = vcmask 31744   ;;  %v366_v5 = vld [vmem:[%s3076_s28 + $0x38] sm:$0xff]  ;;  %s3017_s13 = smov 4   ;;  %vm674_vm4 = vcmask 1046528  }
  0x5e   : > { %v365_v3 = vld [vmem:[%s3076_s28 + $0x30] sm:$0xff]  ;;  %v2337_v4 = vpack.i.bf16 %v3237_v2, %v3235_v1  ;;  %400 = vst.msk [vmem:[#allocation2 + $0x90] sm:$0xff] %vm392_vm3, %v366_v5  ;;  %v362_v7 = vld [vmem:[%s3076_s28 + $0x18] sm:$0xff]  ;;  %v359_v8 = vld [vmem:[%s3076_s28] sm:$0xff]  ;;  %s3018_s14 = smov 8   ;;  %vm545_vm5 = vcmask 1040384  }
  0x5f   : > { %399 = vst.msk [vmem:[#allocation2 + $0x88] sm:$0xff] %vm392_vm3, %v365_v3  ;;  %v361_v6 = vld [vmem:[%s3076_s28 + $0x10] sm:$0xff]  ;;  %v360_v9 = vld [vmem:[%s3076_s28 + $0x8] sm:$0xff]  ;;  %v367_v10 = vld [vmem:[%s3076_s28 + $0x40] sm:$0xff]  ;;  %s3019_s15 = smov 12   ;;  %s3020_s16 = smov 16  }
  0x60   : > { %2338 = vrot.lane.b32.xlu0 %v2337_v4, %s3017_s13  ;;  %395 = vst.msk [vmem:[#allocation2 + $0x48] sm:$0xff] %vm392_vm3, %v361_v6  ;;  %v368_v11 = vld [vmem:[%s3076_s28 + $0x48] sm:$0xff]  ;;  %v363_v12 = vld [vmem:[%s3076_s28 + $0x20] sm:$0xff]  ;;  %v369_v15 = vld [vmem:[%s3076_s28 + $0x50] sm:$0xff]  ;;  %vm1583_vm6 = vcmask 64512   ;;  %s3021_s17 = smov 20  }
  0x61   : > { %396 = vst.msk [vmem:[#allocation2 + $0x50] sm:$0xff] %vm392_vm3, %v362_v7  ;;  %v364_v13 = vld [vmem:[%s3076_s28 + $0x28] sm:$0xff]  ;;  %v370_v17 = vld [vmem:[%s3076_s28 + $0x58] sm:$0xff]  ;;  %v373_v20 = vld [vmem:[%s3076_s28 + $0x70] sm:$0xff]  ;;  %vm1616_vm7 = vcmask 97280   ;;  %s3022_s18 = smov 28  }
  0x62   : > { %393 = vst.msk [vmem:[#allocation2 + $0x28] sm:$0xff] %vm392_vm3, %v359_v8  ;;  %v374_v22 = vld [vmem:[%s3076_s28 + $0x78] sm:$0xff]  ;;  %v371_v25 = vld [vmem:[%s3076_s28 + $0x60] sm:$0xff]  ;;  %v372_v27 = vld [vmem:[%s3076_s28 + $0x68] sm:$0xff]  ;;  %s3023_s19 = smov 24   ;;  %s3024_s20 = smov 32  }
  0x63   : > { %394 = vst.msk [vmem:[#allocation2 + $0x30] sm:$0xff] %vm392_vm3, %v360_v9  ;;  %v375_v30 = vld [vmem:[%s3076_s28 + $0x80] sm:$0xff]  ;;  %v376_v32 = vld [vmem:[%s3076_s28 + $0x88] sm:$0xff]  ;;  %v377_v40 = vld [vmem:[%s3076_s28 + $0x90] sm:$0xff]  ;;  %vm1649_vm8 = vcmask 130048   ;;  %vm1682_vm9 = vcmask 162816  }
  0x64   : > { %401 = vst.msk [vmem:[#allocation2 + $0xa8] sm:$0xff] %vm392_vm3, %v367_v10  ;;  %v379_v35 = vld [vmem:[%s3076_s28 + $0xa0] sm:$0xff]  ;;  %v380_v37 = vld [vmem:[%s3076_s28 + $0xa8] sm:$0xff]  ;;  %v378_v42 = vld [vmem:[%s3076_s28 + $0x98] sm:$0xff]  ;;  %vm1903_vm10 = vcmask 1041408   ;;  %vm1715_vm11 = vcmask 195584  }
  0x65   : > { %402 = vst.msk [vmem:[#allocation2 + $0xb0] sm:$0xff] %vm392_vm3, %v368_v11  ;;  %v3263_v16 = vld [vmem:[#allocation2 + $0x90] sm:$0xff]  ;;  %v382_v47 = vld [vmem:[%s3076_s28 + $0xb8] sm:$0xff]  ;;  %v383_v53 = vld [vmem:[%s3076_s28 + $0xc0] sm:$0xff]  ;;  %vm1748_vm12 = vcmask 228352   ;;  %vm1781_vm13 = vcmask 261120  }
  0x66   : > { %v3259_v14 = vld [vmem:[#allocation2 + $0x88] sm:$0xff]  ;;  %397 = vst.msk [vmem:[#allocation2 + $0x68] sm:$0xff] %vm392_vm3, %v363_v12  ;;  %v381_v44 = vld [vmem:[%s3076_s28 + $0xb0] sm:$0xff]  ;;  %v386_v51 = vld [vmem:[%s3076_s28 + $0xd8] sm:$0xff]  ;;  %vm1854_vm14 = vcmask 293888   ;;  %vm2099_vm15 = vcmask 57344  }
  0x67   : > { %v3269_v18 = vpack.i.bf16 %v3263_v16, %v3259_v14  ;;  %v3271_v19 = vld [vmem:[#allocation2 + $0x48] sm:$0xff]  ;;  %398 = vst.msk [vmem:[#allocation2 + $0x70] sm:$0xff] %vm392_vm3, %v364_v13  ;;  %v385_v48 = vld [vmem:[%s3076_s28 + $0xd0] sm:$0xff]  ;;  %v387_v58 = vld [vmem:[%s3076_s28 + $0xe0] sm:$0xff] }
  0x68   : > { %v3275_v21 = vld [vmem:[#allocation2 + $0x50] sm:$0xff]  ;;  %403 = vst.msk [vmem:[#allocation2 + $0xc8] sm:$0xff] %vm392_vm3, %v369_v15  ;;  %v384_v56 = vld [vmem:[%s3076_s28 + $0xc8] sm:$0xff]  ;;  %v432_v10 = vld [vmem:[#allocation2 + $0x38] sm:$0x1] }
  0x69   : > { %2358 = vrot.lane.b32.xlu2 %v3269_v18, %s3017_s13  ;;  %v3283_v23 = vpack.i.bf16 %v3275_v21, %v3271_v19  ;;  %v3285_v24 = vld [vmem:[#allocation2 + $0x28] sm:$0xff]  ;;  %404 = vst.msk [vmem:[#allocation2 + $0xd0] sm:$0xff] %vm392_vm3, %v370_v17  ;;  %v428_v15 = vld [vmem:[#allocation2 + $0x18] sm:$0x1] }
  0x6a   : > { %v3289_v26 = vld [vmem:[#allocation2 + $0x30] sm:$0xff]  ;;  %407 = vst.msk [vmem:[#allocation2 + $0x108] sm:$0xff] %vm392_vm3, %v373_v20  ;;  %v388_v59 = vld [vmem:[%s3076_s28 + $0xe8] sm:$0xff] }
  0x6b   : > { %2348 = vrot.lane.b32.xlu1 %v3283_v23, %s3017_s13  ;;  %v3297_v28 = vpack.i.bf16 %v3289_v26, %v3285_v24  ;;  %v3299_v29 = vld [vmem:[#allocation2 + $0xa8] sm:$0xff]  ;;  %408 = vst.msk [vmem:[#allocation2 + $0x110] sm:$0xff] %vm392_vm3, %v374_v22  ;;  %v680_v22 = vrot.slane %v3285_v24, 1 }
  0x6c   : > { %v3303_v31 = vld [vmem:[#allocation2 + $0xb0] sm:$0xff]  ;;  %405 = vst.msk [vmem:[#allocation2 + $0xe8] sm:$0xff] %vm392_vm3, %v371_v25  ;;  %v681_v25 = vrot.slane %v3289_v26, 1 }
  0x6d   : > { %2343 = vrot.lane.b32.xlu0 %v3297_v28, %s3017_s13  ;;  %v3311_v33 = vpack.i.bf16 %v3303_v31, %v3299_v29  ;;  %v3313_v34 = vld [vmem:[#allocation2 + $0x68] sm:$0xff]  ;;  %406 = vst.msk [vmem:[#allocation2 + $0xf0] sm:$0xff] %vm392_vm3, %v372_v27  ;;  %v683_v27 = vrot.slane %v432_v10, 1 }
  0x6e   : > { %v3317_v36 = vld [vmem:[#allocation2 + $0x70] sm:$0xff]  ;;  %409 = vst.msk [vmem:[#allocation2 + $0x128] sm:$0xff] %vm392_vm3, %v375_v30 }
  0x6f   : > { %v3323_v38 = vpack.i.bf16 %v3317_v36, %v3313_v34  ;;  %v3325_v39 = vld [vmem:[#allocation2 + $0xc8] sm:$0xff]  ;;  %410 = vst.msk [vmem:[#allocation2 + $0x130] sm:$0xff] %vm392_vm3, %v376_v32  ;;  %v436_v32 = vld [vmem:[#allocation2 + $0x58] sm:$0x1] }
  0x70   : > { %v3329_v41 = vld [vmem:[#allocation2 + $0xd0] sm:$0xff]  ;;  %413 = vst.msk [vmem:[#allocation2 + $0x168] sm:$0xff] %vm392_vm3, %v379_v35  ;;  %v676_v35 = vrot.slane %v3237_v2, 1 }
  0x71   : > { %2363 = vrot.lane.b32.xlu2 %v3311_v33, %s3017_s13  ;;  %v3337_v43 = vpack.i.bf16 %v3329_v41, %v3325_v39  ;;  %414 = vst.msk [vmem:[#allocation2 + $0x170] sm:$0xff] %vm392_vm3, %v380_v37  ;;  %v3341_v45 = vld [vmem:[#allocation2 + $0x108] sm:$0xff]  ;;  %v675_v37 = vrot.slane %v3235_v1, 1 }
  0x72   : > { %v3343_v46 = vld [vmem:[#allocation2 + $0x110] sm:$0xff]  ;;  %411 = vst.msk [vmem:[#allocation2 + $0x148] sm:$0xff] %vm392_vm3, %v377_v40  ;;  %v678_v40 = vrot.slane %v428_v15, 1 }
  0x73   : > { %2353 = vrot.lane.b32.xlu1 %v3323_v38, %s3017_s13  ;;  %412 = vst.msk [vmem:[#allocation2 + $0x150] sm:$0xff] %vm392_vm3, %v378_v42  ;;  %v3351_v49 = vld [vmem:[#allocation2 + $0xe8] sm:$0xff]  ;;  %v3361_v52 = vpack.i.bf16 %v3343_v46, %v3341_v45 }
  0x74   : > { %v3353_v50 = vld [vmem:[#allocation2 + $0xf0] sm:$0xff]  ;;  %415 = vst.msk [vmem:[#allocation2 + $0x188] sm:$0xff] %vm392_vm3, %v381_v44  ;;  %v685_v44 = vrot.slane %v3271_v19, 1 }
  0x75   : > { %2368 = vrot.lane.b32.xlu0 %v3337_v43, %s3017_s13  ;;  %416 = vst.msk [vmem:[#allocation2 + $0x190] sm:$0xff] %vm392_vm3, %v382_v47  ;;  %v3365_v54 = vld [vmem:[#allocation2 + $0x128] sm:$0xff]  ;;  %v3373_v57 = vpack.i.bf16 %v3353_v50, %v3351_v49  ;;  %v686_v47 = vrot.slane %v3275_v21, 1 }
  0x76   : > { %v3367_v55 = vld [vmem:[#allocation2 + $0x130] sm:$0xff]  ;;  %419 = vst.msk [vmem:[#allocation2 + $0x1c8] sm:$0xff] %vm392_vm3, %v385_v48  ;;  %v688_v48 = vrot.slane %v436_v32, 1  ;;  %v440_v32 = vld [vmem:[#allocation2 + $0x78] sm:$0x1] }
  0x77   : > { %420 = vst.msk [vmem:[#allocation2 + $0x1d0] sm:$0xff] %vm392_vm3, %v386_v51  ;;  %v3383_v60 = vpack.i.bf16 %v3367_v55, %v3365_v54  ;;  %v3386_v61 = vld [vmem:[#allocation2 + $0x168] sm:$0xff]  ;;  %v682_v51 = vsel %vm674_vm4, %v680_v22, %v681_v25  ;;  %v687_v10 = vsel %vm674_vm4, %v685_v44, %v686_v47  ;;  %v700_v44 = vrot.slane %v3299_v29, 1 }
  0x78   : > { %417 = vst.msk [vmem:[#allocation2 + $0x1a8] sm:$0xff] %vm392_vm3, %v383_v53  ;;  %v3388_v62 = vld [vmem:[#allocation2 + $0x170] sm:$0xff]  ;;  %v684_v53 = vsel %vm674_vm4, %v681_v25, %v683_v27  ;;  %v689_v22 = vsel %vm674_vm4, %v686_v47, %v688_v48  ;;  %v695_v25 = vrot.slane %v3259_v14, 1  ;;  %v696_v27 = vrot.slane %v3263_v16, 1 }
  0x79   : > { %2378 = vrot.lane.b32.xlu2 %v3361_v52, %s3017_s13  ;;  %418 = vst.msk [vmem:[#allocation2 + $0x1b0] sm:$0xff] %vm392_vm3, %v384_v56  ;;  %v3394_v63 = vld [vmem:[#allocation2 + $0x148] sm:$0xff]  ;;  %v3402_v3 = vpack.i.bf16 %v3388_v62, %v3386_v61  ;;  %v444_v56 = vld [vmem:[#allocation2 + $0x98] sm:$0x1]  ;;  %v3463_v15 = vpack.i.bf16 %v684_v53, %v682_v51  ;;  %v701_v47 = vrot.slane %v3303_v31, 1 }
  0x7a   : > { %421 = vst.msk [vmem:[#allocation2 + $0x1e8] sm:$0xff] %vm392_vm3, %v387_v58  ;;  %v3396_v0 = vld [vmem:[#allocation2 + $0x150] sm:$0xff]  ;;  %v677_v58 = vsel %vm674_vm4, %v675_v37, %v676_v35  ;;  %v690_v37 = vrot.slane %v3313_v34, 1  ;;  %v697_v51 = vsel %vm674_vm4, %v695_v25, %v696_v27  ;;  %v710_v25 = vrot.slane %v3351_v49, 1 }
  0x7b   : > { %2373 = vrot.lane.b32.xlu1 %v3373_v57, %s3017_s13  ;;  %422 = vst.msk [vmem:[#allocation2 + $0x1f0] sm:$0xff] %vm392_vm3, %v388_v59  ;;  %v3404_v4 = vld [vmem:[#allocation2 + $0x188] sm:$0xff]  ;;  %v3410_v6 = vpack.i.bf16 %v3396_v0, %v3394_v63  ;;  %v679_v59 = vsel %vm674_vm4, %v676_v35, %v678_v40  ;;  %v691_v35 = vrot.slane %v3317_v36, 1  ;;  %v693_v40 = vrot.slane %v440_v32, 1 }
  0x7c   : > { %4948 = vst [vmem:[#allocation3_spill] sm:$0xff] %v3402_v3  ;;  %v3406_v5 = vld [vmem:[#allocation2 + $0x190] sm:$0xff] }
  0x7d   : > { %2383 = vrot.lane.b32.xlu0 %v3383_v60, %s3017_s13  ;;  %v3416_v7 = vpack.i.bf16 %v3406_v5, %v3404_v4  ;;  %v3418_v8 = vld [vmem:[#allocation2 + $0x1c8] sm:$0xff]  ;;  %4952 = vst [vmem:[#allocation7_spill] sm:$0xff] %v3463_v15 }
  0x7e   : > { %v3420_v9 = vld [vmem:[#allocation2 + $0x1d0] sm:$0xff] }
  0x7f   : > { %v3424_v11 = vld [vmem:[#allocation2 + $0x1a8] sm:$0xff]  ;;  %v3432_v13 = vpack.i.bf16 %v3420_v9, %v3418_v8 }
  0x80   : > { %v3426_v12 = vld [vmem:[#allocation2 + $0x1b0] sm:$0xff] }
  0x81   : > { %2393 = vrot.lane.b32.xlu2 %v3402_v3, %s3017_s13  ;;  %4949 = vst [vmem:[#allocation4_spill] sm:$0xff] %v3432_v13  ;;  %v3434_v17 = vld [vmem:[#allocation2 + $0x1e8] sm:$0xff]  ;;  %v3442_v30 = vpack.i.bf16 %v3426_v12, %v3424_v11  ;;  %v448_v3 = vld [vmem:[#allocation2 + $0xb8] sm:$0x1] }
  0x82   : > { %v3436_v20 = vld [vmem:[#allocation2 + $0x1f0] sm:$0xff]  ;;  %v703_v48 = vrot.slane %v448_v3, 1 }
  0x83   : > { %2388 = vrot.lane.b32.xlu1 %v3410_v6, %s3017_s13  ;;  %4950 = vst [vmem:[#allocation5_spill] sm:$0xff] %v3442_v30  ;;  %v3450_v42 = vpack.i.bf16 %v3436_v20, %v3434_v17 }
  0x84   : > { %v704_v3 = vsel %vm674_vm4, %v701_v47, %v703_v48 }
  0x85   : > { %2398 = vrot.lane.b32.xlu0 %v3416_v7, %s3017_s13  ;;  %4951 = vst [vmem:[#allocation6_spill] sm:$0xff] %v3450_v42 }
  0x89   : > { %2408 = vrot.lane.b32.xlu2 %v3432_v13, %s3017_s13  ;;  %v698_v13 = vrot.slane %v444_v56, 1  ;;  %v456_v56 = vld [vmem:[#allocation2 + $0xf8] sm:$0x1] }
  0x8b   : > { %2403 = vrot.lane.b32.xlu1 %v3442_v30, %s3017_s13  ;;  %v2417_v30 = vpack.i.bf16 %v679_v59, %v677_v58  ;;  %v699_v53 = vsel %vm674_vm4, %v696_v27, %v698_v13  ;;  %v692_v58 = vsel %vm674_vm4, %v690_v37, %v691_v35  ;;  %v694_v59 = vsel %vm674_vm4, %v691_v35, %v693_v40  ;;  %v460_v37 = vld [vmem:[#allocation2 + $0x118] sm:$0x1] }
  0x8c   : > { %v3484_v32 = vpack.i.bf16 %v699_v53, %v697_v51  ;;  %v711_v13 = vrot.slane %v3353_v50, 1  ;;  %v3489_v27 = vpack.i.bf16 %v694_v59, %v692_v58  ;;  %v705_v35 = vrot.slane %v3325_v39, 1 }
  0x8d   : > { %2413 = vrot.lane.b32.xlu0 %v3450_v42, %s3017_s13  ;;  %v3470_v42 = vpack.i.bf16 %v689_v22, %v687_v10  ;;  %v702_v10 = vsel %vm674_vm4, %v700_v44, %v701_v47  ;;  %v452_v22 = vld [vmem:[#allocation2 + $0xd8] sm:$0x1]  ;;  %v706_v40 = vrot.slane %v3329_v41, 1  ;;  %v715_v44 = vrot.slane %v3341_v45, 1 }
  0x8e   : > { %4954 = vst [vmem:[#allocation9_spill] sm:$0xff] %v3484_v32  ;;  %v716_v47 = vrot.slane %v3343_v46, 1  ;;  %v718_v48 = vrot.slane %v460_v37, 1  ;;  %v712_v51 = vsel %vm674_vm4, %v710_v25, %v711_v13 }
  0x8f   : > { %4953 = vst [vmem:[#allocation8_spill] sm:$0xff] %v3470_v42  ;;  %v707_v58 = vsel %vm674_vm4, %v705_v35, %v706_v40  ;;  %v472_v35 = vld [vmem:[#allocation2 + $0x178] sm:$0x1] }
  0x90   : > { %4955 = vst [vmem:[#allocation10_spill] sm:$0xff] %v3489_v27  ;;  %v719_v25 = vsel %vm674_vm4, %v716_v47, %v718_v48  ;;  %v733_v48 = vrot.slane %v472_v35, 1 }
  0x91   : > { %2423 = vrot.lane.b32.xlu2 %v3463_v15, %s3018_s14  ;;  %v708_v15 = vrot.slane %v452_v22, 1 }
  0x93   : > { %2418 = vrot.lane.b32.xlu1 %v2417_v30, %s3018_s14  ;;  %v713_v30 = vrot.slane %v456_v56, 1  ;;  %v468_v56 = vld [vmem:[#allocation2 + $0x158] sm:$0x1]  ;;  %v709_v59 = vsel %vm674_vm4, %v706_v40, %v708_v15  ;;  %v720_v15 = vrot.slane %v3365_v54, 1  ;;  %v721_v40 = vrot.slane %v3367_v55, 1 }
  0x94   : > { %v728_v37 = vrot.slane %v468_v56, 1  ;;  %v480_v56 = vld [vmem:[#allocation2 + $0x1b8] sm:$0x1] }
  0x95   : > { %2428 = vrot.lane.b32.xlu0 %v3470_v42, %s3018_s14  ;;  %v3493_v42 = vpack.i.bf16 %v704_v3, %v702_v10  ;;  %v714_v53 = vsel %vm674_vm4, %v711_v13, %v713_v30  ;;  %v717_v10 = vsel %vm674_vm4, %v715_v44, %v716_v47  ;;  %v464_v3 = vld [vmem:[#allocation2 + $0x138] sm:$0x1]  ;;  %v725_v13 = vrot.slane %v3394_v63, 1 }
  0x96   : > { %v3508_v22 = vpack.i.bf16 %v714_v53, %v712_v51  ;;  %v726_v30 = vrot.slane %v3396_v0, 1  ;;  %v730_v44 = vrot.slane %v3386_v61, 1  ;;  %v731_v47 = vrot.slane %v3388_v62, 1 }
  0x97   : > { %4956 = vst [vmem:[#allocation11_spill] sm:$0xff] %v3493_v42  ;;  %v743_v35 = vrot.slane %v480_v56, 1  ;;  %v429_v56 = vld [vmem:[#allocation2 + $0x20] sm:$0xff] }
  0x98   : > { %4957 = vst [vmem:[#allocation12_spill] sm:$0xff] %v3508_v22  ;;  %v727_v51 = vsel %vm674_vm4, %v725_v13, %v726_v30  ;;  %v729_v53 = vsel %vm674_vm4, %v726_v30, %v728_v37  ;;  %v734_v13 = vsel %vm674_vm4, %v731_v47, %v733_v48  ;;  %v740_v30 = vrot.slane %v3424_v11, 1 }
  0x99   : > { %2438 = vrot.lane.b32.xlu2 %v3484_v32, %s3018_s14  ;;  %v3513_v32 = vpack.i.bf16 %v709_v59, %v707_v58  ;;  %v722_v58 = vsel %vm674_vm4, %v720_v15, %v721_v40  ;;  %v741_v37 = vrot.slane %v3426_v12, 1  ;;  %v484_v15 = vld [vmem:[#allocation2 + $0x1d8] sm:$0x1] }
  0x9a   : > { %v748_v48 = vrot.slane %v484_v15, 1  ;;  %v433_v15 = vld [vmem:[#allocation2 + $0x40] sm:$0xff] }
  0x9b   : > { %2433 = vrot.lane.b32.xlu1 %v3489_v27, %s3018_s14  ;;  %4958 = vst [vmem:[#allocation13_spill] sm:$0xff] %v3513_v32  ;;  %v3517_v27 = vpack.i.bf16 %v719_v25, %v717_v10  ;;  %v732_v10 = vsel %vm674_vm4, %v730_v44, %v731_v47  ;;  %v476_v25 = vld [vmem:[#allocation2 + $0x198] sm:$0x1]  ;;  %v745_v44 = vrot.slane %v3418_v8, 1  ;;  %v746_v47 = vrot.slane %v3420_v9, 1 }
  0x9d   : > { %2443 = vrot.lane.b32.xlu0 %v3493_v42, %s3018_s14  ;;  %v723_v42 = vrot.slane %v464_v3, 1  ;;  %4959 = vst [vmem:[#allocation14_spill] sm:$0xff] %v3517_v27  ;;  %v3532_v3 = vpack.i.bf16 %v729_v53, %v727_v51  ;;  %v742_v51 = vsel %vm674_vm4, %v740_v30, %v741_v37  ;;  %v744_v53 = vsel %vm674_vm4, %v741_v37, %v743_v35 }
  0x9e   : > { %v749_v30 = vsel %vm674_vm4, %v746_v47, %v748_v48  ;;  %v551_v37 = vrot.slane %v429_v56, 7  ;;  %v552_v35 = vrot.slane %v3285_v24, 7  ;;  %v556_v24 = vrot.slane %v433_v15, 7  ;;  %v441_v56 = vld [vmem:[#allocation2 + $0x80] sm:$0xff] }
  0x9f   : > { %v724_v59 = vsel %vm674_vm4, %v721_v40, %v723_v42  ;;  %4960 = vst [vmem:[#allocation15_spill] sm:$0xff] %v3532_v3  ;;  %v735_v42 = vrot.slane %v3404_v4, 1  ;;  %v736_v40 = vrot.slane %v3406_v5, 1  ;;  %v566_v15 = vrot.slane %v441_v56, 7 }
  0xa0   : > { %v3574_v48 = vsel %vm545_vm5, %v551_v37, %v552_v35  ;;  %v567_v37 = vrot.slane %v3259_v14, 7 }
  0xa1   : > { %2453 = vrot.lane.b32.xlu2 %v3508_v22, %s3018_s14  ;;  %v3537_v22 = vpack.i.bf16 %v724_v59, %v722_v58  ;;  %v737_v58 = vsel %vm674_vm4, %v735_v42, %v736_v40  ;;  %v750_v42 = vrot.slane %v3434_v17, 1 }
  0xa3   : > { %2448 = vrot.lane.b32.xlu1 %v3513_v32, %s3018_s14  ;;  %4961 = vst [vmem:[#allocation16_spill] sm:$0xff] %v3537_v22  ;;  %v3541_v32 = vpack.i.bf16 %v734_v13, %v732_v10  ;;  %v747_v10 = vsel %vm674_vm4, %v745_v44, %v746_v47  ;;  %v488_v13 = vld [vmem:[#allocation2 + $0x1f8] sm:$0x1]  ;;  %v559_v47 = vrot.slane %v3275_v21, 7 }
  0xa4   : > { %v753_v44 = vrot.slane %v488_v13, 1 }
  0xa5   : > { %2458 = vrot.lane.b32.xlu0 %v3517_v27, %s3018_s14  ;;  %v738_v27 = vrot.slane %v476_v25, 1  ;;  %v3556_v25 = vpack.i.bf16 %v744_v53, %v742_v51  ;;  %v4930_v51 = vrot.slane %v3235_v1, 7  ;;  %v3567_v53 = vpack.i.bf16 %v749_v30, %v747_v10  ;;  %v445_v30 = vld [vmem:[#allocation2 + $0xa0] sm:$0xff] }
  0xa6   : > { %v571_v14 = vrot.slane %v445_v30, 7  ;;  %v582_v30 = vrot.slane %v3351_v49, 7  ;;  %v587_v49 = vrot.slane %v3341_v45, 7 }
  0xa7   : > { %v739_v59 = vsel %vm674_vm4, %v736_v40, %v738_v27  ;;  %4962 = vst [vmem:[#allocation17_spill] sm:$0xff] %v3556_v25  ;;  %v549_v27 = vrot.slane %v3237_v2, 7  ;;  %v751_v40 = vrot.slane %v3436_v20, 1 }
  0xa8   : > { %4963 = vst [vmem:[#allocation18_spill] sm:$0xff] %v3567_v53 }
  0xa9   : > { %2468 = vrot.lane.b32.xlu2 %v3532_v3, %s3018_s14  ;;  %v554_v3 = vrot.slane %v3289_v26, 7  ;;  %v557_v26 = vrot.slane %v3271_v19, 7  ;;  %v3593_v10 = vsel %vm545_vm5, %v4930_v51, %v549_v27  ;;  %v594_v51 = vrot.slane %v3367_v55, 7  ;;  %v425_v55 = vld [vmem:[#allocation2] sm:$0xff] }
  0xab   : > { %2463 = vrot.lane.b32.xlu1 %v3537_v22, %s3018_s14  ;;  %v3561_v22 = vpack.i.bf16 %v739_v59, %v737_v58  ;;  %v3577_v2 = vsel %vm545_vm5, %v552_v35, %v554_v3  ;;  %v752_v58 = vsel %vm674_vm4, %v750_v42, %v751_v40  ;;  %v754_v59 = vsel %vm674_vm4, %v751_v40, %v753_v44  ;;  %v437_v3 = vld [vmem:[#allocation2 + $0x60] sm:$0xff]  ;;  %v389_v40 = vld [vmem:[%s3076_s28 + $0xf0] sm:$0xff] }
  0xac   : > { %v3586_v19 = vsel %vm545_vm5, %v556_v24, %v557_v26  ;;  %v2497_v21 = vpack.i.bf16 %v3577_v2, %v3574_v48  ;;  %v3596_v13 = vsel %vm545_vm5, %v557_v26, %v559_v47  ;;  %v569_v35 = vrot.slane %v3263_v16, 7  ;;  %423 = vst.msk [vmem:[#allocation2 + $0x208] sm:$0xff] %vm392_vm3, %v389_v40  ;;  %v453_v47 = vld [vmem:[#allocation2 + $0xe0] sm:$0xff] }
  0xad   : > { %2473 = vrot.lane.b32.xlu0 %v3541_v32, %s3018_s14  ;;  %v3600_v42 = vpack.i.bf16 %v754_v59, %v752_v58  ;;  %v561_v44 = vrot.slane %v437_v3, 7  ;;  %v562_v24 = vrot.slane %v3313_v34, 7  ;;  %v3609_v27 = vpack.i.bf16 %v3596_v13, %v3586_v19 }
  0xae   : > { %v572_v16 = vrot.slane %v3299_v29, 7  ;;  %v574_v26 = vrot.slane %v3303_v31, 7  ;;  %v3616_v34 = vsel %vm545_vm5, %v566_v15, %v567_v37  ;;  %v581_v3 = vrot.slane %v453_v47, 7 }
  0xaf   : > { %4964 = vst [vmem:[#allocation19_spill] sm:$0xff] %v3600_v42  ;;  %v3624_v56 = vsel %vm545_vm5, %v561_v44, %v562_v24  ;;  %v579_v40 = vrot.slane %v3329_v41, 7  ;;  %v465_v41 = vld [vmem:[#allocation2 + $0x140] sm:$0xff] }
  0xb0   : > { %4965 = vst [vmem:[#allocation20_spill] sm:$0xff] %v3609_v27  ;;  %v3632_v29 = vsel %vm545_vm5, %v571_v14, %v572_v16  ;;  %v3639_v59 = vsel %vm545_vm5, %v572_v16, %v574_v26  ;;  %v3658_v14 = vsel %vm545_vm5, %v581_v3, %v582_v30  ;;  %v469_v3 = vld [vmem:[#allocation2 + $0x160] sm:$0xff] }
  0xb1   : > { %2483 = vrot.lane.b32.xlu2 %v3556_v25, %s3018_s14  ;;  %v564_v25 = vrot.slane %v3317_v36, 7  ;;  %v3619_v36 = vsel %vm545_vm5, %v567_v37, %v569_v35  ;;  %v577_v35 = vrot.slane %v3325_v39, 7  ;;  %v3651_v44 = vpack.i.bf16 %v3639_v59, %v3632_v29 }
  0xb2   : > { %v3636_v31 = vpack.i.bf16 %v3619_v36, %v3616_v34 }
  0xb3   : > { %2478 = vrot.lane.b32.xlu1 %v3561_v22, %s3018_s14  ;;  %v3627_v58 = vsel %vm545_vm5, %v562_v24, %v564_v25  ;;  %v584_v25 = vrot.slane %v3353_v50, 7  ;;  %4968 = vst [vmem:[#allocation23_spill] sm:$0xff] %v3651_v44  ;;  %v589_v50 = vrot.slane %v3343_v46, 7  ;;  %v3671_v47 = vsel %vm545_vm5, %v577_v35, %v579_v40 }
  0xb4   : > { %4966 = vst [vmem:[#allocation21_spill] sm:$0xff] %v3636_v31  ;;  %v3645_v15 = vpack.i.bf16 %v3627_v58, %v3624_v56 }
  0xb5   : > { %2488 = vrot.lane.b32.xlu0 %v3567_v53, %s3018_s14  ;;  %v390_v53 = vld [vmem:[%s3076_s28 + $0xf8] sm:$0xff]  ;;  %v3661_v16 = vsel %vm545_vm5, %v582_v30, %v584_v25  ;;  %v596_v30 = vrot.slane %v465_v41, 7  ;;  %v597_v25 = vrot.slane %v3394_v63, 7  ;;  %v602_v63 = vrot.slane %v3386_v61, 7 }
  0xb6   : > { %424 = vst.msk [vmem:[#allocation2 + $0x210] sm:$0xff] %vm392_vm3, %v390_v53  ;;  %v449_v53 = vld [vmem:[#allocation2 + $0xc0] sm:$0xff]  ;;  %v3680_v46 = vpack.i.bf16 %v3661_v16, %v3658_v14 }
  0xb7   : > { %4967 = vst [vmem:[#allocation22_spill] sm:$0xff] %v3645_v15  ;;  %v576_v37 = vrot.slane %v449_v53, 7  ;;  %v461_v53 = vld [vmem:[#allocation2 + $0x120] sm:$0xff] }
  0xb8   : > { %4969 = vst [vmem:[#allocation24_spill] sm:$0xff] %v3680_v46  ;;  %v591_v40 = vrot.slane %v461_v53, 7  ;;  %v477_v53 = vld [vmem:[#allocation2 + $0x1a0] sm:$0xff] }
  0xb9   : > { %2498 = vrot.lane.b32.xlu2 %v2497_v21, %s3019_s15  ;;  %v457_v21 = vld [vmem:[#allocation2 + $0x100] sm:$0xff]  ;;  %v3668_v26 = vsel %vm545_vm5, %v576_v37, %v577_v35  ;;  %v599_v37 = vrot.slane %v3396_v0, 7  ;;  %v604_v0 = vrot.slane %v3388_v62, 7 }
  0xba   : > { %v586_v24 = vrot.slane %v457_v21, 7  ;;  %v3683_v21 = vsel %vm545_vm5, %v587_v49, %v589_v50  ;;  %v3689_v35 = vpack.i.bf16 %v3671_v47, %v3668_v26  ;;  %v3702_v50 = vsel %vm545_vm5, %v596_v30, %v597_v25 }
  0xbb   : > { %2493 = vrot.lane.b32.xlu1 %v3600_v42, %s3018_s14  ;;  %v3705_v41 = vsel %vm545_vm5, %v597_v25, %v599_v37  ;;  %v473_v25 = vld [vmem:[#allocation2 + $0x180] sm:$0xff]  ;;  %v546_v37 = vrot.slane %v425_v55, 7  ;;  %v3758_v42 = vld [vmem:[#allocation2 + $0x208] sm:$0xff] }
  0xbc   : > { %v3676_v45 = vsel %vm545_vm5, %v586_v24, %v587_v49  ;;  %4970 = vst [vmem:[#allocation25_spill] sm:$0xff] %v3689_v35  ;;  %v592_v24 = vrot.slane %v3365_v54, 7  ;;  %v601_v49 = vrot.slane %v469_v3, 7  ;;  %v3723_v3 = vsel %vm545_vm5, %v602_v63, %v604_v0 }
  0xbd   : > { %2503 = vrot.lane.b32.xlu0 %v3609_v27, %s3019_s15  ;;  %v3727_v30 = vpack.i.bf16 %v3705_v41, %v3702_v50  ;;  %v609_v0 = vrot.slane %v3406_v5, 7 }
  0xbe   : > { %v3715_v61 = vsel %vm545_vm5, %v592_v24, %v594_v51  ;;  %v3720_v62 = vsel %vm545_vm5, %v601_v49, %v602_v63  ;;  %v612_v51 = vrot.slane %v3424_v11, 7  ;;  %v606_v49 = vrot.slane %v473_v25, 7 }
  0xbf   : > { %4972 = vst [vmem:[#allocation27_spill] sm:$0xff] %v3727_v30  ;;  %v607_v63 = vrot.slane %v3404_v4, 7  ;;  %v617_v11 = vrot.slane %v3418_v8, 7  ;;  %v619_v25 = vrot.slane %v3420_v9, 7  ;;  %v489_v8 = vld [vmem:[#allocation2 + $0x200] sm:$0xff] }
  0xc1   : > { %2513 = vrot.lane.b32.xlu2 %v3636_v31, %s3019_s15  ;;  %v3712_v31 = vsel %vm545_vm5, %v591_v40, %v592_v24  ;;  %v481_v40 = vld [vmem:[#allocation2 + $0x1c0] sm:$0xff]  ;;  %v614_v24 = vrot.slane %v3426_v12, 7  ;;  %v3763_v9 = vsel %vm545_vm5, %v606_v49, %v607_v63 }
  0xc2   : > { %v616_v55 = vrot.slane %v481_v40, 7 }
  0xc3   : > { %2508 = vrot.lane.b32.xlu1 %v3645_v15, %s3019_s15  ;;  %v3665_v39 = vpop.permute.xlu2 %2358  ;;  %v3739_v15 = vpack.i.bf16 %v3723_v3, %v3720_v62  ;;  %v3752_v5 = vsel %vm545_vm5, %v612_v51, %v614_v24 }
  0xc4   : > { %v3778_v24 = vsel %vm545_vm5, %v616_v55, %v617_v11  ;;  %v622_v55 = vrot.slane %v3434_v17, 7 }
  0xc5   : > { %2518 = vrot.lane.b32.xlu0 %v3651_v44, %s3019_s15  ;;  %v3695_v44 = vpack.i.bf16 %v3683_v21, %v3676_v45  ;;  %4974 = vst [vmem:[#allocation29_spill] sm:$0xff] %v3739_v15 }
  0xc7   : > { %4971 = vst [vmem:[#allocation26_spill] sm:$0xff] %v3695_v44 }
  0xc9   : > { %2528 = vrot.lane.b32.xlu2 %v3680_v46, %s3019_s15  ;;  %v611_v46 = vrot.slane %v477_v53, 7  ;;  %v4975_v53 = vrot.slane %v3235_v1, 7  ;;  %v3760_v1 = vld [vmem:[#allocation2 + $0x210] sm:$0xff] }
  0xcb   : > { %2523 = vrot.lane.b32.xlu1 %v3689_v35, %s3019_s15  ;;  %v3709_v54 = vpop.permute.xlu2 %2363  ;;  %v548_v35 = vsel %vm545_vm5, %v546_v37, %v4975_v53  ;;  %v3749_v4 = vsel %vm545_vm5, %v611_v46, %v612_v51  ;;  %v3766_v46 = vsel %vm545_vm5, %v607_v63, %v609_v0  ;;  %v3785_v63 = vsel %vm545_vm5, %v617_v11, %v619_v25 }
  0xcc   : > { %v3782_v49 = vpack.i.bf16 %v3752_v5, %v3749_v4  ;;  %v758_v0 = vrot.slane %v489_v8, 7  ;;  %v759_v53 = vrot.slane %v3758_v42, 7 }
  0xcd   : > { %2533 = vrot.lane.b32.xlu0 %v3695_v44, %s3019_s15  ;;  %v3733_v44 = vpack.i.bf16 %v3715_v61, %v3712_v31 }
  0xce   : > { %4976 = vst [vmem:[#allocation30_spill] sm:$0xff] %v3782_v49  ;;  %v760_v11 = vsel %vm545_vm5, %v758_v0, %v759_v53 }
  0xcf   : > { %4973 = vst [vmem:[#allocation28_spill] sm:$0xff] %v3733_v44 }
  0xd1   : > { %2543 = vrot.lane.b32.xlu2 %v3727_v30, %s3019_s15 }
  0xd2   : > { %v2339_v12 = vpop.permute.xlu0 %2338 }
  0xd3   : > { %2538 = vrot.lane.b32.xlu1 %v3733_v44, %s3019_s15  ;;  %v2341_v30 = vunpack.i.h.bf16 %v2339_v12  ;;  %v2340_v40 = vunpack.i.l.bf16 %v2339_v12  ;;  %v3756_v27 = vpop.permute.xlu2 %2378  ;;  %v485_v12 = vld [vmem:[#allocation2 + $0x1e0] sm:$0xff]  ;;  %v3797_v44 = vpack.i.bf16 %v3785_v63, %v3778_v24 }
  0xd5   : > { %2548 = vrot.lane.b32.xlu0 %v3739_v15, %s3019_s15  ;;  %v3771_v37 = vsel %vm392_vm3, %v548_v35, %v2340_v40  ;;  %v3775_v51 = vsel %vm392_vm3, %v3593_v10, %v2341_v30  ;;  %v761_v35 = vrot.slane %v3760_v1, 7  ;;  %v3791_v10 = vpack.i.bf16 %v3766_v46, %v3763_v9  ;;  %4978 = vst [vmem:[#allocation32_spill] sm:$0xff] %v3797_v44 }
  0xd6   : > { %v621_v30 = vrot.slane %v485_v12, 7  ;;  %v624_v40 = vrot.slane %v3436_v20, 7 }
  0xd7   : > { %4977 = vst [vmem:[#allocation31_spill] sm:$0xff] %v3791_v10  ;;  %v762_v25 = vsel %vm545_vm5, %v759_v53, %v761_v35 }
  0xd8   : > { %v3808_v17 = vsel %vm545_vm5, %v621_v30, %v622_v55  ;;  %v3811_v20 = vsel %vm545_vm5, %v622_v55, %v624_v40 }
  0xd9   : > { %2558 = vrot.lane.b32.xlu2 %v3782_v49, %s3019_s15  ;;  %v3817_v49 = vpack.i.bf16 %v762_v25, %v760_v11  ;;  %v3821_v53 = vpack.i.bf16 %v3811_v20, %v3808_v17 }
  0xdb   : > { %2553 = vrot.lane.b32.xlu1 %v3791_v10, %s3019_s15  ;;  %v3805_v8 = vpop.permute.xlu2 %2393  ;;  %4979 = vst [vmem:[#allocation33_spill] sm:$0xff] %v3817_v49 }
  0xdc   : > { %4980 = vst [vmem:[#allocation34_spill] sm:$0xff] %v3821_v53 }
  0xdd   : > { %2563 = vrot.lane.b32.xlu0 %v3797_v44, %s3019_s15  ;;  %v3815_v12 = vpop.permute.xlu1 %2348  ;;  %v2360_v44 = vunpack.i.l.bf16 %v3665_v39 }
  0xdf   : > { %v2344_v0 = vpop.permute.xlu0 %2343 }
  0xe0   : > { %v2346_v40 = vunpack.i.h.bf16 %v2344_v0  ;;  %v2345_v11 = vunpack.i.l.bf16 %v2344_v0 }
  0xe1   : > { %2573 = vrot.lane.b32.xlu2 %v3817_v49, %s3019_s15 }
  0xe3   : > { %2568 = vrot.lane.b32.xlu1 %v3821_v53, %s3019_s15  ;;  %v3827_v35 = vpop.permute.xlu2 %2408  ;;  %v1553_v53 = vsel %vm392_vm3, %v3574_v48, %v2345_v11 }
  0xe5   : > { %2578 = vrot.lane.b32.xlu0 %v3297_v28, %s3020_s16  ;;  %v3831_v30 = vpop.permute.xlu1 %2353  ;;  %v1554_v28 = vsel %vm392_vm3, %v3577_v2, %v2346_v40 }
  0xe7   : > { %v3833_v55 = vpop.permute.xlu0 %2368 }
  0xe9   : > { %2588 = vrot.lane.b32.xlu2 %v3323_v38, %s3020_s16 }
  0xeb   : > { %2583 = vrot.lane.b32.xlu1 %v3283_v23, %s3020_s16  ;;  %v2424_v25 = vpop.permute.xlu2 %2423 }
  0xec   : > { %v2426_v49 = vunpack.i.h.bf16 %v2424_v25  ;;  %v2425_v10 = vunpack.i.l.bf16 %v2424_v25  ;;  %v2361_v25 = vunpack.i.h.bf16 %v3665_v39 }
  0xed   : > { %2593 = vrot.lane.b32.xlu0 %v3269_v18, %s3020_s16  ;;  %v2374_v0 = vpop.permute.xlu1 %2373 }
  0xee   : > { %v3846_v15 = vsel %vm1583_vm6, %v1553_v53, %v2425_v10  ;;  %v3849_v38 = vsel %vm1583_vm6, %v1554_v28, %v2426_v49  ;;  %v1559_v10 = vsel %vm392_vm3, %v3616_v34, %v2360_v44  ;;  %v1560_v49 = vsel %vm392_vm3, %v3619_v36, %v2361_v25 }
  0xef   : > { %v3851_v23 = vpop.permute.xlu0 %2383  ;;  %v2376_v40 = vunpack.i.h.bf16 %v2374_v0  ;;  %v2375_v11 = vunpack.i.l.bf16 %v2374_v0 }
  0xf1   : > { %2603 = vrot.lane.b32.xlu2 %v3337_v43, %s3020_s16  ;;  %v1566_v44 = vsel %vm392_vm3, %v3661_v16, %v2376_v40  ;;  %v1565_v28 = vsel %vm392_vm3, %v3658_v14, %v2375_v11  ;;  %v2350_v16 = vunpack.i.l.bf16 %v3815_v12  ;;  %v4981_v14 = vld [vmem:[#allocation3_spill] sm:$0xff] }
  0xf3   : > { %2598 = vrot.lane.b32.xlu1 %v3311_v33, %s3020_s16  ;;  %v2439_v18 = vpop.permute.xlu2 %2438 }
  0xf4   : > { %v2441_v48 = vunpack.i.h.bf16 %v2439_v18  ;;  %v2440_v2 = vunpack.i.l.bf16 %v2439_v18 }
  0xf5   : > { %2608 = vrot.lane.b32.xlu0 %v3373_v57, %s3020_s16  ;;  %v2389_v53 = vpop.permute.xlu1 %2388 }
  0xf6   : > { %v3866_v39 = vsel %vm1583_vm6, %v1560_v49, %v2441_v48  ;;  %v3869_v43 = vsel %vm1583_vm6, %v1559_v10, %v2440_v2  ;;  %v2391_v18 = vunpack.i.h.bf16 %v2389_v53  ;;  %v2390_v48 = vunpack.i.l.bf16 %v2389_v53  ;;  %v4982_v53 = vld [vmem:[#allocation5_spill] sm:$0xff] }
  0xf7   : > { %v3871_v33 = vpop.permute.xlu0 %2398  ;;  %v2351_v49 = vunpack.i.h.bf16 %v3815_v12  ;;  %v1555_v12 = vsel %vm392_vm3, %v3586_v19, %v2350_v16  ;;  %v2355_v16 = vunpack.i.l.bf16 %v3831_v30 }
  0xf8   : > { %v1572_v40 = vsel %vm392_vm3, %v3705_v41, %v2391_v18  ;;  %v1571_v11 = vsel %vm392_vm3, %v3702_v50, %v2390_v48 }
  0xf9   : > { %2618 = vrot.lane.b32.xlu2 %v3383_v60, %s3020_s16 }
  0xfb   : > { %2613 = vrot.lane.b32.xlu1 %v3361_v52, %s3020_s16  ;;  %v2454_v34 = vpop.permute.xlu2 %2453 }
  0xfc   : > { %v2456_v36 = vunpack.i.h.bf16 %v2454_v34  ;;  %v2455_v57 = vunpack.i.l.bf16 %v2454_v34 }
  0xfd   : > { %2623 = vrot.lane.b32.xlu0 %v3410_v6, %s3020_s16  ;;  %v2404_v25 = vpop.permute.xlu1 %2403 }
  0xfe   : > { %v3884_v0 = vsel %vm1583_vm6, %v1566_v44, %v2456_v36  ;;  %v3887_v60 = vsel %vm1583_vm6, %v1565_v28, %v2455_v57 }
  0xff   : > { %v3889_v52 = vpop.permute.xlu0 %2413 }
 0x101   : > { %2633 = vrot.lane.b32.xlu2 %v3416_v7, %s3020_s16 }
 0x103   : > { %2628 = vrot.lane.b32.xlu1 %v4981_v14, %s3020_s16  ;;  %v2469_v6 = vpop.permute.xlu2 %2468  ;;  %v1556_v14 = vsel %vm392_vm3, %v3596_v13, %v2351_v49  ;;  %v4984_v13 = vld [vmem:[#allocation4_spill] sm:$0xff]  ;;  %v2366_v49 = vunpack.i.h.bf16 %v3709_v54 }
 0x104   : > { %v2471_v2 = vunpack.i.h.bf16 %v2469_v6  ;;  %v2470_v10 = vunpack.i.l.bf16 %v2469_v6  ;;  %v2406_v6 = vunpack.i.h.bf16 %v2404_v25 }
 0x105   : > { %2638 = vrot.lane.b32.xlu0 %v4982_v53, %s3020_s16  ;;  %v2419_v7 = vpop.permute.xlu1 %2418 }
 0x106   : > { %v2421_v34 = vunpack.i.h.bf16 %v2419_v7  ;;  %v2420_v36 = vunpack.i.l.bf16 %v2419_v7  ;;  %v3904_v57 = vsel %vm1583_vm6, %v1572_v40, %v2471_v2  ;;  %v3907_v44 = vsel %vm1583_vm6, %v1571_v11, %v2470_v10  ;;  %v4983_v40 = vld [vmem:[#allocation6_spill] sm:$0xff] }
 0x107   : > { %v2429_v28 = vpop.permute.xlu0 %2428  ;;  %v2405_v2 = vunpack.i.l.bf16 %v2404_v25  ;;  %v2652_v10 = vpack.i.bf16 %v3760_v1, %v3758_v42  ;;  %v2365_v11 = vunpack.i.l.bf16 %v3709_v54  ;;  %v1578_v53 = vsel %vm392_vm3, %v3752_v5, %v2406_v6 }
 0x108   : > { %v1585_v41 = vsel %vm1583_vm6, %v3775_v51, %v2421_v34  ;;  %v1584_v50 = vsel %vm1583_vm6, %v3771_v37, %v2420_v36  ;;  %v2431_v18 = vunpack.i.h.bf16 %v2429_v28  ;;  %v2430_v48 = vunpack.i.l.bf16 %v2429_v28 }
 0x109   : > { %2648 = vrot.lane.b32.xlu2 %v4983_v40, %s3020_s16  ;;  %v2356_v37 = vunpack.i.h.bf16 %v3831_v30  ;;  %v1577_v7 = vsel %vm392_vm3, %v3749_v4, %v2405_v2  ;;  %v1557_v5 = vsel %vm392_vm3, %v3624_v56, %v2355_v16  ;;  %v1562_v2 = vsel %vm392_vm3, %v3639_v59, %v2366_v49  ;;  %v4985_v40 = vld [vmem:[#allocation8_spill] sm:$0xff] }
 0x10a   : > { %v3922_v19 = vsel %vm1583_vm6, %v1556_v14, %v2431_v18  ;;  %v3925_v51 = vsel %vm1583_vm6, %v1555_v12, %v2430_v48  ;;  %v2370_v16 = vunpack.i.l.bf16 %v3833_v55  ;;  %v2381_v49 = vunpack.i.h.bf16 %v3756_v27 }
 0x10b   : > { %2643 = vrot.lane.b32.xlu1 %v4984_v13, %s3020_s16  ;;  %v2484_v25 = vpop.permute.xlu2 %2483  ;;  %v1558_v54 = vsel %vm392_vm3, %v3627_v58, %v2356_v37  ;;  %v2371_v37 = vunpack.i.h.bf16 %v3833_v55  ;;  %v4986_v13 = vld [vmem:[#allocation7_spill] sm:$0xff] }
 0x10c   : > { %v2486_v42 = vunpack.i.h.bf16 %v2484_v25  ;;  %v2485_v1 = vunpack.i.l.bf16 %v2484_v25 }
 0x10d   : > { %2653 = vrot.lane.b32.xlu0 %v2652_v10, %s3020_s16  ;;  %v2434_v34 = vpop.permute.xlu1 %2433  ;;  %v1561_v10 = vsel %vm392_vm3, %v3632_v29, %v2365_v11 }
 0x10e   : > { %v2436_v30 = vunpack.i.h.bf16 %v2434_v34  ;;  %v2435_v36 = vunpack.i.l.bf16 %v2434_v34  ;;  %v3939_v12 = vsel %vm1583_vm6, %v1578_v53, %v2486_v42  ;;  %v3942_v28 = vsel %vm1583_vm6, %v1577_v7, %v2485_v1  ;;  %v4987_v1 = vld [vmem:[#allocation10_spill] sm:$0xff] }
 0x10f   : > { %v2444_v18 = vpop.permute.xlu0 %2443  ;;  %v2380_v42 = vunpack.i.l.bf16 %v3756_v27 }
 0x110   : > { %v1590_v4 = vsel %vm1583_vm6, %v1557_v5, %v2435_v36  ;;  %v1591_v48 = vsel %vm1583_vm6, %v1558_v54, %v2436_v30  ;;  %v2446_v14 = vunpack.i.h.bf16 %v2444_v18  ;;  %v2445_v6 = vunpack.i.l.bf16 %v2444_v18 }
 0x111   : > { %2663 = vrot.lane.b32.xlu2 %v4985_v40, %s3021_s17  ;;  %v1564_v30 = vsel %vm392_vm3, %v3671_v47, %v2371_v37  ;;  %v1563_v36 = vsel %vm392_vm3, %v3668_v26, %v2370_v16  ;;  %v4989_v37 = vld [vmem:[#allocation9_spill] sm:$0xff] }
 0x112   : > { %v3957_v58 = vsel %vm1583_vm6, %v1562_v2, %v2446_v14  ;;  %v3960_v56 = vsel %vm1583_vm6, %v1561_v10, %v2445_v6  ;;  %v4988_v6 = vld [vmem:[#allocation11_spill] sm:$0xff]  ;;  %v2386_v2 = vunpack.i.h.bf16 %v3851_v23  ;;  %v2385_v10 = vunpack.i.l.bf16 %v3851_v23 }
 0x113   : > { %2658 = vrot.lane.b32.xlu1 %v4986_v13, %s3021_s17  ;;  %v2499_v59 = vpop.permute.xlu2 %2498 }
 0x114   : > { %v2501_v29 = vunpack.i.h.bf16 %v2499_v59  ;;  %v2500_v25 = vunpack.i.l.bf16 %v2499_v59  ;;  %v2395_v59 = vunpack.i.l.bf16 %v3805_v8 }
 0x115   : > { %2668 = vrot.lane.b32.xlu0 %v4987_v1, %s3021_s17  ;;  %v2449_v11 = vpop.permute.xlu1 %2448 }
 0x116   : > { %v2451_v53 = vunpack.i.h.bf16 %v2449_v11  ;;  %v2450_v7 = vunpack.i.l.bf16 %v2449_v11  ;;  %v3971_v34 = vsel %vm1616_vm7, %v1585_v41, %v2501_v29  ;;  %v3974_v55 = vsel %vm1616_vm7, %v1584_v50, %v2500_v25  ;;  %v4990_v29 = vld [vmem:[#allocation13_spill] sm:$0xff] }
 0x117   : > { %v2459_v54 = vpop.permute.xlu0 %2458  ;;  %v1568_v41 = vsel %vm392_vm3, %v3683_v21, %v2381_v49  ;;  %v1567_v50 = vsel %vm392_vm3, %v3676_v45, %v2380_v42  ;;  %v2396_v45 = vunpack.i.h.bf16 %v3805_v8 }
 0x118   : > { %v1596_v27 = vsel %vm1583_vm6, %v1563_v36, %v2450_v7  ;;  %v1597_v5 = vsel %vm1583_vm6, %v1564_v30, %v2451_v53  ;;  %v2461_v18 = vunpack.i.h.bf16 %v2459_v54  ;;  %v2460_v14 = vunpack.i.l.bf16 %v2459_v54 }
 0x119   : > { %2678 = vrot.lane.b32.xlu2 %v4988_v6, %s3021_s17  ;;  %v1570_v53 = vsel %vm392_vm3, %v3715_v61, %v2386_v2  ;;  %v1569_v7 = vsel %vm392_vm3, %v3712_v31, %v2385_v10  ;;  %v4992_v2 = vld [vmem:[#allocation12_spill] sm:$0xff] }
 0x11a   : > { %v3989_v47 = vsel %vm1583_vm6, %v1568_v41, %v2461_v18  ;;  %v3992_v26 = vsel %vm1583_vm6, %v1567_v50, %v2460_v14  ;;  %v4991_v14 = vld [vmem:[#allocation14_spill] sm:$0xff]  ;;  %v2401_v41 = vunpack.i.h.bf16 %v3871_v33  ;;  %v2400_v50 = vunpack.i.l.bf16 %v3871_v33 }
 0x11b   : > { %2673 = vrot.lane.b32.xlu1 %v4989_v37, %s3021_s17  ;;  %v2514_v21 = vpop.permute.xlu2 %2513 }
 0x11c   : > { %v2516_v16 = vunpack.i.h.bf16 %v2514_v21  ;;  %v2515_v13 = vunpack.i.l.bf16 %v2514_v21 }
 0x11d   : > { %2683 = vrot.lane.b32.xlu0 %v4990_v29, %s3021_s17  ;;  %v2464_v25 = vpop.permute.xlu1 %2463 }
 0x11e   : > { %v2466_v49 = vunpack.i.h.bf16 %v2464_v25  ;;  %v2465_v42 = vunpack.i.l.bf16 %v2464_v25  ;;  %v4003_v11 = vsel %vm1616_vm7, %v1591_v48, %v2516_v16  ;;  %v4006_v23 = vsel %vm1616_vm7, %v1590_v4, %v2515_v13  ;;  %v4993_v13 = vld [vmem:[#allocation16_spill] sm:$0xff] }
 0x11f   : > { %v2474_v30 = vpop.permute.xlu0 %2473  ;;  %v1574_v48 = vsel %vm392_vm3, %v3723_v3, %v2396_v45  ;;  %v1573_v4 = vsel %vm392_vm3, %v3720_v62, %v2395_v59  ;;  %v2411_v62 = vunpack.i.h.bf16 %v3827_v35  ;;  %v2410_v16 = vunpack.i.l.bf16 %v3827_v35 }
 0x120   : > { %v1602_v8 = vsel %vm1583_vm6, %v1569_v7, %v2465_v42  ;;  %v1603_v36 = vsel %vm1583_vm6, %v1570_v53, %v2466_v49  ;;  %v2476_v54 = vunpack.i.h.bf16 %v2474_v30  ;;  %v2475_v18 = vunpack.i.l.bf16 %v2474_v30 }
 0x121   : > { %2693 = vrot.lane.b32.xlu2 %v4991_v14, %s3021_s17  ;;  %v1576_v42 = vsel %vm392_vm3, %v3766_v46, %v2401_v41  ;;  %v1575_v53 = vsel %vm392_vm3, %v3763_v9, %v2400_v50  ;;  %v4994_v41 = vld [vmem:[#allocation15_spill] sm:$0xff] }
 0x122   : > { %v4021_v61 = vsel %vm1583_vm6, %v1574_v48, %v2476_v54  ;;  %v4024_v31 = vsel %vm1583_vm6, %v1573_v4, %v2475_v18  ;;  %v2416_v48 = vunpack.i.h.bf16 %v3889_v52  ;;  %v2415_v4 = vunpack.i.l.bf16 %v3889_v52 }
 0x123   : > { %2688 = vrot.lane.b32.xlu1 %v4992_v2, %s3021_s17  ;;  %v2529_v3 = vpop.permute.xlu2 %2528 }
 0x124   : > { %v2531_v10 = vunpack.i.h.bf16 %v2529_v3  ;;  %v2530_v21 = vunpack.i.l.bf16 %v2529_v3  ;;  %v1582_v52 = vsel %vm392_vm3, %v3811_v20, %v2416_v48 }
 0x125   : > { %2698 = vrot.lane.b32.xlu0 %v4993_v13, %s3021_s17  ;;  %v2479_v45 = vpop.permute.xlu1 %2478 }
 0x126   : > { %v2481_v59 = vunpack.i.h.bf16 %v2479_v45  ;;  %v2480_v25 = vunpack.i.l.bf16 %v2479_v45  ;;  %v4035_v49 = vsel %vm1616_vm7, %v1597_v5, %v2531_v10  ;;  %v4038_v33 = vsel %vm1616_vm7, %v1596_v27, %v2530_v21 }
 0x127   : > { %v2489_v7 = vpop.permute.xlu0 %2488  ;;  %v1580_v5 = vsel %vm392_vm3, %v3785_v63, %v2411_v62  ;;  %v1579_v27 = vsel %vm392_vm3, %v3778_v24, %v2410_v16  ;;  %v1581_v45 = vsel %vm392_vm3, %v3808_v17, %v2415_v4  ;;  %v4996_v17 = vld [vmem:[#allocation17_spill] sm:$0xff]  ;;  %v2978_v4 = vld [vmem:[#allocation2 + $0x48] sm:$0xff] }
 0x128   : > { %v1608_v35 = vsel %vm1583_vm6, %v1575_v53, %v2480_v25  ;;  %v1609_v30 = vsel %vm1583_vm6, %v1576_v42, %v2481_v59  ;;  %v2491_v54 = vunpack.i.h.bf16 %v2489_v7  ;;  %v2490_v18 = vunpack.i.l.bf16 %v2489_v7 }
 0x129   : > { %2708 = vrot.lane.b32.xlu2 %v3541_v32, %s3021_s17 }
 0x12a   : > { %v4053_v46 = vsel %vm1583_vm6, %v1580_v5, %v2491_v54  ;;  %v4056_v9 = vsel %vm1583_vm6, %v1579_v27, %v2490_v18  ;;  %v4995_v54 = vld [vmem:[#allocation18_spill] sm:$0xff]  ;;  %v4997_v27 = vld [vmem:[#allocation19_spill] sm:$0xff] }
 0x12b   : > { %2703 = vrot.lane.b32.xlu1 %v4994_v41, %s3021_s17  ;;  %v2544_v63 = vpop.permute.xlu2 %2543 }
 0x12c   : > { %v2546_v50 = vunpack.i.h.bf16 %v2544_v63  ;;  %v2545_v3 = vunpack.i.l.bf16 %v2544_v63  ;;  %v2979_v63 = vld [vmem:[#allocation2 + $0x50] sm:$0xff] }
 0x12d   : > { %2713 = vrot.lane.b32.xlu0 %v3561_v22, %s3021_s17  ;;  %v2494_v24 = vpop.permute.xlu1 %2493 }
 0x12e   : > { %v2496_v10 = vunpack.i.h.bf16 %v2494_v24  ;;  %v2495_v21 = vunpack.i.l.bf16 %v2494_v24  ;;  %v4065_v62 = vsel %vm1616_vm7, %v1603_v36, %v2546_v50  ;;  %v4068_v16 = vsel %vm1616_vm7, %v1602_v8, %v2545_v3 }
 0x12f   : > { %v2504_v59 = vpop.permute.xlu0 %2503  ;;  %v2737_v50 = vpack.i.bf16 %v2979_v63, %v2978_v4 }
 0x130   : > { %v1614_v25 = vsel %vm1583_vm6, %v1581_v45, %v2495_v21  ;;  %v1615_v42 = vsel %vm1583_vm6, %v1582_v52, %v2496_v10  ;;  %v2506_v53 = vunpack.i.h.bf16 %v2504_v59  ;;  %v2505_v7 = vunpack.i.l.bf16 %v2504_v59 }
 0x131   : > { %2723 = vrot.lane.b32.xlu2 %v4995_v54, %s3021_s17 }
 0x132   : > { %v4080_v8 = vsel %vm1616_vm7, %v3846_v15, %v2505_v7  ;;  %v4084_v20 = vsel %vm1616_vm7, %v3849_v38, %v2506_v53 }
 0x133   : > { %2718 = vrot.lane.b32.xlu1 %v4996_v17, %s3021_s17  ;;  %v2559_v36 = vpop.permute.xlu2 %2558 }
 0x134   : > { %v2561_v18 = vunpack.i.h.bf16 %v2559_v36  ;;  %v2560_v5 = vunpack.i.l.bf16 %v2559_v36 }
 0x135   : > { %2728 = vrot.lane.b32.xlu0 %v4997_v27, %s3021_s17  ;;  %v2509_v48 = vpop.permute.xlu1 %2508 }
 0x136   : > { %v2511_v3 = vunpack.i.h.bf16 %v2509_v48  ;;  %v2510_v15 = vunpack.i.l.bf16 %v2509_v48  ;;  %v4091_v24 = vsel %vm1616_vm7, %v1609_v30, %v2561_v18  ;;  %v4094_v38 = vsel %vm1616_vm7, %v1608_v35, %v2560_v5  ;;  %v4998_v30 = vld [vmem:[#allocation20_spill] sm:$0xff] }
 0x137   : > { %v2519_v10 = vpop.permute.xlu0 %2518 }
 0x138   : > { %v1621_v21 = vsel %vm1616_vm7, %v3925_v51, %v2510_v15  ;;  %v1622_v52 = vsel %vm1616_vm7, %v3922_v19, %v2511_v3  ;;  %v2521_v45 = vunpack.i.h.bf16 %v2519_v10  ;;  %v2520_v59 = vunpack.i.l.bf16 %v2519_v10  ;;  %v2980_v15 = vld [vmem:[#allocation2 + $0x68] sm:$0xff]  ;;  %v2981_v10 = vld [vmem:[#allocation2 + $0x70] sm:$0xff] }
 0x139   : > { %2738 = vrot.lane.b32.xlu2 %v2737_v50, %s3022_s18 }
 0x13a   : > { %v4103_v53 = vsel %vm1616_vm7, %v3869_v43, %v2520_v59  ;;  %v4107_v35 = vsel %vm1616_vm7, %v3866_v39, %v2521_v45  ;;  %v2757_v45 = vpack.i.bf16 %v2981_v10, %v2980_v15 }
 0x13b   : > { %2733 = vrot.lane.b32.xlu1 %v4998_v30, %s3023_s19  ;;  %v2574_v51 = vpop.permute.xlu2 %2573 }
 0x13c   : > { %v2576_v7 = vunpack.i.h.bf16 %v2574_v51  ;;  %v2575_v19 = vunpack.i.l.bf16 %v2574_v51 }
 0x13d   : > { %2743 = vrot.lane.b32.xlu0 %v4985_v40, %s3024_s20  ;;  %v2524_v36 = vpop.permute.xlu1 %2523  ;;  %v4999_v40 = vld [vmem:[#allocation25_spill] sm:$0xff] }
 0x13e   : > { %v2526_v18 = vunpack.i.h.bf16 %v2524_v36  ;;  %v2525_v5 = vunpack.i.l.bf16 %v2524_v36  ;;  %v4114_v43 = vsel %vm1616_vm7, %v1615_v42, %v2576_v7  ;;  %v4117_v39 = vsel %vm1616_vm7, %v1614_v25, %v2575_v19 }
 0x13f   : > { %v2534_v48 = vpop.permute.xlu0 %2533 }
 0x140   : > { %v1627_v4 = vsel %vm1616_vm7, %v3960_v56, %v2525_v5  ;;  %v1628_v63 = vsel %vm1616_vm7, %v3957_v58, %v2526_v18  ;;  %v2536_v50 = vunpack.i.h.bf16 %v2534_v48  ;;  %v2535_v3 = vunpack.i.l.bf16 %v2534_v48  ;;  %v5000_v56 = vld [vmem:[#allocation22_spill] sm:$0xff]  ;;  %v2982_v18 = vld [vmem:[#allocation2 + $0xc8] sm:$0xff]  ;;  %v2983_v5 = vld [vmem:[#allocation2 + $0xd0] sm:$0xff] }
 0x141   : > { %2753 = vrot.lane.b32.xlu2 %v4999_v40, %s3023_s19  ;;  %v2762_v48 = vpack.i.bf16 %v2983_v5, %v2982_v18 }
 0x142   : > { %v4127_v42 = vsel %vm1616_vm7, %v3887_v60, %v2535_v3  ;;  %v4131_v25 = vsel %vm1616_vm7, %v3884_v0, %v2536_v50 }
 0x143   : > { %2748 = vrot.lane.b32.xlu1 %v5000_v56, %s3023_s19  ;;  %v2589_v58 = vpop.permute.xlu2 %2588  ;;  %v2984_v56 = vld [vmem:[#allocation2 + $0x148] sm:$0xff] }
 0x144   : > { %v2591_v59 = vunpack.i.h.bf16 %v2589_v58  ;;  %v2590_v30 = vunpack.i.l.bf16 %v2589_v58  ;;  %v2985_v58 = vld [vmem:[#allocation2 + $0x150] sm:$0xff] }
 0x145   : > { %2758 = vrot.lane.b32.xlu0 %v2757_v45, %s3022_s18  ;;  %v2539_v51 = vpop.permute.xlu1 %2538 }
 0x146   : > { %v2541_v7 = vunpack.i.h.bf16 %v2539_v51  ;;  %v2540_v19 = vunpack.i.l.bf16 %v2539_v51  ;;  %v4137_v36 = vsel %vm1649_vm8, %v1622_v52, %v2591_v59  ;;  %v4140_v60 = vsel %vm1649_vm8, %v1621_v21, %v2590_v30 }
 0x147   : > { %v2549_v0 = vpop.permute.xlu0 %2548 }
 0x148   : > { %v1633_v50 = vsel %vm1616_vm7, %v3992_v26, %v2540_v19  ;;  %v1634_v3 = vsel %vm1616_vm7, %v3989_v47, %v2541_v7  ;;  %v2551_v40 = vunpack.i.h.bf16 %v2549_v0  ;;  %v2550_v15 = vunpack.i.l.bf16 %v2549_v0 }
 0x149   : > { %2768 = vrot.lane.b32.xlu2 %v4987_v1, %s3024_s20  ;;  %v2782_v1 = vpack.i.bf16 %v2985_v58, %v2984_v56  ;;  %v2986_v58 = vld [vmem:[#allocation2 + $0x88] sm:$0xff] }
 0x14a   : > { %v4150_v52 = vsel %vm1616_vm7, %v3907_v44, %v2550_v15  ;;  %v4154_v21 = vsel %vm1616_vm7, %v3904_v57, %v2551_v40 }
 0x14b   : > { %2763 = vrot.lane.b32.xlu1 %v2762_v48, %s3022_s18  ;;  %v2604_v10 = vpop.permute.xlu2 %2603 }
 0x14c   : > { %v2606_v26 = vunpack.i.h.bf16 %v2604_v10  ;;  %v2605_v45 = vunpack.i.l.bf16 %v2604_v10 }
 0x14d   : > { %2773 = vrot.lane.b32.xlu0 %v4990_v29, %s3024_s20  ;;  %v2554_v47 = vpop.permute.xlu1 %2553 }
 0x14e   : > { %v2556_v59 = vunpack.i.h.bf16 %v2554_v47  ;;  %v2555_v30 = vunpack.i.l.bf16 %v2554_v47  ;;  %v4160_v44 = vsel %vm1649_vm8, %v1628_v63, %v2606_v26  ;;  %v4163_v57 = vsel %vm1649_vm8, %v1627_v4, %v2605_v45  ;;  %v5001_v4 = vld [vmem:[#allocation27_spill] sm:$0xff] }
 0x14f   : > { %v2564_v51 = vpop.permute.xlu0 %2563 }
 0x150   : > { %v1639_v7 = vsel %vm1616_vm7, %v4024_v31, %v2555_v30  ;;  %v1640_v19 = vsel %vm1616_vm7, %v4021_v61, %v2556_v59  ;;  %v2566_v29 = vunpack.i.h.bf16 %v2564_v51  ;;  %v2565_v0 = vunpack.i.l.bf16 %v2564_v51 }
 0x151   : > { %2783 = vrot.lane.b32.xlu2 %v2782_v1, %s3022_s18  ;;  %v2987_v1 = vld [vmem:[#allocation2 + $0x90] sm:$0xff] }
 0x152   : > { %v4172_v18 = vsel %vm1616_vm7, %v3942_v28, %v2565_v0  ;;  %v4176_v63 = vsel %vm1616_vm7, %v3939_v12, %v2566_v29  ;;  %v2802_v59 = vpack.i.bf16 %v2987_v1, %v2986_v58 }
 0x153   : > { %2778 = vrot.lane.b32.xlu1 %v5001_v4, %s3023_s19  ;;  %v2619_v5 = vpop.permute.xlu2 %2618 }
 0x154   : > { %v2621_v31 = vunpack.i.h.bf16 %v2619_v5  ;;  %v2620_v48 = vunpack.i.l.bf16 %v2619_v5 }
 0x155   : > { %2788 = vrot.lane.b32.xlu0 %v4994_v41, %s3024_s20  ;;  %v2569_v61 = vpop.permute.xlu1 %2568  ;;  %v5002_v41 = vld [vmem:[#allocation24_spill] sm:$0xff] }
 0x156   : > { %v2571_v40 = vunpack.i.h.bf16 %v2569_v61  ;;  %v2570_v15 = vunpack.i.l.bf16 %v2569_v61  ;;  %v4183_v10 = vsel %vm1649_vm8, %v1634_v3, %v2621_v31  ;;  %v4186_v28 = vsel %vm1649_vm8, %v1633_v50, %v2620_v48  ;;  %v2989_v48 = vld [vmem:[#allocation2 + $0xf0] sm:$0xff] }
 0x157   : > { %v2579_v12 = vpop.permute.xlu0 %2578 }
 0x158   : > { %v1645_v26 = vsel %vm1616_vm7, %v4056_v9, %v2570_v15  ;;  %v1646_v45 = vsel %vm1616_vm7, %v4053_v46, %v2571_v40  ;;  %v2581_v47 = vunpack.i.h.bf16 %v2579_v12  ;;  %v2580_v56 = vunpack.i.l.bf16 %v2579_v12  ;;  %v5003_v9 = vld [vmem:[#allocation21_spill] sm:$0xff] }
 0x159   : > { %2798 = vrot.lane.b32.xlu2 %v5002_v41, %s3023_s19 }
 0x15a   : > { %v4196_v3 = vsel %vm1649_vm8, %v3974_v55, %v2580_v56  ;;  %v4200_v50 = vsel %vm1649_vm8, %v3971_v34, %v2581_v47  ;;  %v2988_v34 = vld [vmem:[#allocation2 + $0xe8] sm:$0xff] }
 0x15b   : > { %2793 = vrot.lane.b32.xlu1 %v5003_v9, %s3023_s19  ;;  %v2634_v46 = vpop.permute.xlu2 %2633  ;;  %v2807_v61 = vpack.i.bf16 %v2989_v48, %v2988_v34 }
 0x15c   : > { %v2636_v30 = vunpack.i.h.bf16 %v2634_v46  ;;  %v2635_v51 = vunpack.i.l.bf16 %v2634_v46 }
 0x15d   : > { %2803 = vrot.lane.b32.xlu0 %v2802_v59, %s3022_s18  ;;  %v2584_v29 = vpop.permute.xlu1 %2583 }
 0x15e   : > { %v2586_v0 = vunpack.i.h.bf16 %v2584_v29  ;;  %v2585_v4 = vunpack.i.l.bf16 %v2584_v29  ;;  %v4206_v5 = vsel %vm1649_vm8, %v1640_v19, %v2636_v30  ;;  %v4209_v55 = vsel %vm1649_vm8, %v1639_v7, %v2635_v51  ;;  %v5004_v30 = vld [vmem:[#allocation32_spill] sm:$0xff] }
 0x15f   : > { %v2594_v31 = vpop.permute.xlu0 %2593  ;;  %v2990_v51 = vld [vmem:[#allocation2 + $0x168] sm:$0xff] }
 0x160   : > { %v4213_v40 = vsel %vm1649_vm8, %v4080_v8, %v2585_v4  ;;  %v4217_v15 = vsel %vm1649_vm8, %v4084_v20, %v2586_v0  ;;  %v2596_v12 = vunpack.i.h.bf16 %v2594_v31  ;;  %v2595_v47 = vunpack.i.l.bf16 %v2594_v31  ;;  %v5005_v0 = vld [vmem:[#allocation29_spill] sm:$0xff] }
 0x161   : > { %2813 = vrot.lane.b32.xlu2 %v4989_v37, %s3024_s20 }
 0x162   : > { %v4223_v7 = vsel %vm1649_vm8, %v4006_v23, %v2595_v47  ;;  %v4227_v19 = vsel %vm1649_vm8, %v4003_v11, %v2596_v12  ;;  %v2993_v12 = vld [vmem:[#allocation2 + $0x1d0] sm:$0xff] }
 0x163   : > { %2808 = vrot.lane.b32.xlu1 %v2807_v61, %s3022_s18  ;;  %v2649_v8 = vpop.permute.xlu2 %2648  ;;  %v2992_v61 = vld [vmem:[#allocation2 + $0x1c8] sm:$0xff] }
 0x164   : > { %v2651_v56 = vunpack.i.h.bf16 %v2649_v8  ;;  %v2650_v41 = vunpack.i.l.bf16 %v2649_v8  ;;  %v2837_v47 = vpack.i.bf16 %v2993_v12, %v2992_v61  ;;  %v2996_v12 = vld [vmem:[#allocation2 + $0x108] sm:$0xff] }
 0x165   : > { %2818 = vrot.lane.b32.xlu0 %v4992_v2, %s3024_s20  ;;  %v2599_v20 = vpop.permute.xlu1 %2598 }
 0x166   : > { %v2601_v58 = vunpack.i.h.bf16 %v2599_v20  ;;  %v2600_v1 = vunpack.i.l.bf16 %v2599_v20  ;;  %v4233_v37 = vsel %vm1649_vm8, %v1646_v45, %v2651_v56  ;;  %v4236_v23 = vsel %vm1649_vm8, %v1645_v26, %v2650_v41  ;;  %v2991_v45 = vld [vmem:[#allocation2 + $0x170] sm:$0xff] }
 0x167   : > { %v2609_v59 = vpop.permute.xlu0 %2608  ;;  %v2832_v29 = vpack.i.bf16 %v2991_v45, %v2990_v51  ;;  %v2995_v51 = vld [vmem:[#allocation2 + $0xb0] sm:$0xff] }
 0x168   : > { %v4240_v11 = vsel %vm1649_vm8, %v4103_v53, %v2600_v1  ;;  %v4244_v9 = vsel %vm1649_vm8, %v4107_v35, %v2601_v58  ;;  %v2611_v46 = vunpack.i.h.bf16 %v2609_v59  ;;  %v2610_v2 = vunpack.i.l.bf16 %v2609_v59 }
 0x169   : > { %2828 = vrot.lane.b32.xlu2 %v5004_v30, %s3023_s19  ;;  %v2994_v30 = vld [vmem:[#allocation2 + $0xa8] sm:$0xff] }
 0x16a   : > { %v4250_v26 = vsel %vm1649_vm8, %v4038_v33, %v2610_v2  ;;  %v4254_v53 = vsel %vm1649_vm8, %v4035_v49, %v2611_v46  ;;  %v5006_v2 = vld [vmem:[#allocation26_spill] sm:$0xff]  ;;  %v2862_v45 = vpack.i.bf16 %v2995_v51, %v2994_v30 }
 0x16b   : > { %2823 = vrot.lane.b32.xlu1 %v5005_v0, %s3023_s19  ;;  %v4258_v35 = vpop.permute.xlu2 %2663 }
 0x16d   : > { %2833 = vrot.lane.b32.xlu0 %v2832_v29, %s3022_s18  ;;  %v2614_v4 = vpop.permute.xlu1 %2613 }
 0x16e   : > { %v2616_v31 = vunpack.i.h.bf16 %v2614_v4  ;;  %v2615_v34 = vunpack.i.l.bf16 %v2614_v4 }
 0x16f   : > { %v2624_v48 = vpop.permute.xlu0 %2623 }
 0x170   : > { %v1664_v33 = vsel %vm1649_vm8, %v4127_v42, %v2615_v34  ;;  %v1665_v49 = vsel %vm1649_vm8, %v4131_v25, %v2616_v31  ;;  %v2626_v8 = vunpack.i.h.bf16 %v2624_v48  ;;  %v2625_v56 = vunpack.i.l.bf16 %v2624_v48 }
 0x171   : > { %2843 = vrot.lane.b32.xlu2 %v3541_v32, %s3024_s20 }
 0x172   : > { %v4269_v41 = vsel %vm1649_vm8, %v4068_v16, %v2625_v56  ;;  %v4273_v20 = vsel %vm1649_vm8, %v4065_v62, %v2626_v8 }
 0x173   : > { %2838 = vrot.lane.b32.xlu1 %v2837_v47, %s3022_s18  ;;  %v4276_v58 = vpop.permute.xlu2 %2678  ;;  %v2997_v47 = vld [vmem:[#allocation2 + $0x110] sm:$0xff] }
 0x174   : > { %v2867_v8 = vpack.i.bf16 %v2997_v47, %v2996_v12 }
 0x175   : > { %2848 = vrot.lane.b32.xlu0 %v4995_v54, %s3024_s20  ;;  %v2629_v42 = vpop.permute.xlu1 %2628 }
 0x176   : > { %v2631_v25 = vunpack.i.h.bf16 %v2629_v42  ;;  %v2630_v1 = vunpack.i.l.bf16 %v2629_v42 }
 0x177   : > { %v2639_v59 = vpop.permute.xlu0 %2638 }
 0x178   : > { %v1670_v32 = vsel %vm1649_vm8, %v4150_v52, %v2630_v1  ;;  %v1671_v16 = vsel %vm1649_vm8, %v4154_v21, %v2631_v25  ;;  %v2641_v46 = vunpack.i.h.bf16 %v2639_v59  ;;  %v2640_v62 = vunpack.i.l.bf16 %v2639_v59  ;;  %v5007_v52 = vld [vmem:[#allocation23_spill] sm:$0xff] }
 0x179   : > { %2858 = vrot.lane.b32.xlu2 %v5006_v2, %s3023_s19 }
 0x17a   : > { %v4288_v54 = vsel %vm1649_vm8, %v4094_v38, %v2640_v62  ;;  %v4292_v29 = vsel %vm1649_vm8, %v4091_v24, %v2641_v46 }
 0x17b   : > { %2853 = vrot.lane.b32.xlu1 %v5007_v52, %s3023_s19  ;;  %v2694_v21 = vpop.permute.xlu2 %2693  ;;  %v2999_v52 = vld [vmem:[#allocation2 + $0x190] sm:$0xff] }
 0x17c   : > { %v2696_v0 = vunpack.i.h.bf16 %v2694_v21  ;;  %v2695_v4 = vunpack.i.l.bf16 %v2694_v21 }
 0x17d   : > { %2863 = vrot.lane.b32.xlu0 %v2862_v45, %s3022_s18  ;;  %v2644_v31 = vpop.permute.xlu1 %2643  ;;  %v5008_v45 = vld [vmem:[#allocation34_spill] sm:$0xff] }
 0x17e   : > { %v2646_v34 = vunpack.i.h.bf16 %v2644_v31  ;;  %v2645_v48 = vunpack.i.l.bf16 %v2644_v31  ;;  %v4298_v61 = vsel %vm1682_vm9, %v1665_v49, %v2696_v0  ;;  %v4301_v38 = vsel %vm1682_vm9, %v1664_v33, %v2695_v4  ;;  %v5009_v4 = vld [vmem:[#allocation31_spill] sm:$0xff] }
 0x17f   : > { %v2654_v24 = vpop.permute.xlu0 %2653 }
 0x180   : > { %v1676_v56 = vsel %vm1649_vm8, %v4172_v18, %v2645_v48  ;;  %v1677_v42 = vsel %vm1649_vm8, %v4176_v63, %v2646_v34  ;;  %v2656_v25 = vunpack.i.h.bf16 %v2654_v24  ;;  %v2655_v1 = vunpack.i.l.bf16 %v2654_v24 }
 0x181   : > { %2873 = vrot.lane.b32.xlu2 %v4988_v6, %s3024_s20 }
 0x182   : > { %v4311_v49 = vsel %vm1649_vm8, %v4117_v39, %v2655_v1  ;;  %v4315_v33 = vsel %vm1649_vm8, %v4114_v43, %v2656_v25  ;;  %v1834_v43 = vld [vmem:[%s4898_s3 + $0x10] sm:$0x3]  ;;  %v2310_v25 = vld [vmem:[%s4898_s3 + $0x8] sm:$0xff] }
 0x183   : > { %2868 = vrot.lane.b32.xlu1 %v2867_v8, %s3022_s18  ;;  %v2709_v59 = vpop.permute.xlu2 %2708  ;;  %v1848_v2 = vunpack.c.l.b16 %v1834_v43 }
 0x184   : > { %v2711_v18 = vunpack.i.h.bf16 %v2709_v59  ;;  %v2710_v46 = vunpack.i.l.bf16 %v2709_v59  ;;  %v3000_v59 = vld [vmem:[#allocation2 + $0x1e8] sm:$0xff] }
 0x185   : > { %2878 = vrot.lane.b32.xlu0 %v4991_v14, %s3024_s20  ;;  %v4320_v63 = vpop.permute.xlu1 %2658  ;;  %v2998_v14 = vld [vmem:[#allocation2 + $0x188] sm:$0xff]  ;;  %v1851_v0 = vpack.c.b16 %v1848_v2, %v1848_v2 }
 0x186   : > { %v4323_v6 = vsel %vm1682_vm9, %v1671_v16, %v2711_v18  ;;  %v4326_v39 = vsel %vm1682_vm9, %v1670_v32, %v2710_v46  ;;  %v2892_v21 = vpack.i.bf16 %v2999_v52, %v2998_v14  ;;  %v3001_v18 = vld [vmem:[#allocation2 + $0x1f0] sm:$0xff] }
 0x187   : > { %v2669_v62 = vpop.permute.xlu0 %2668  ;;  %v1905_v34 = vsel %vm1903_vm10, %v1851_v0, 0  ;;  %v2897_v46 = vpack.i.bf16 %v3001_v18, %v3000_v59  ;;  %v3006_v18 = vld [vmem:[#allocation2 + $0x208] sm:$0xff] }
 0x188   : > { %v2671_v30 = vunpack.i.h.bf16 %v2669_v62  ;;  %v2670_v51 = vunpack.i.l.bf16 %v2669_v62  ;;  %1912 = vmatpush.bf16.msra.mxu0 %v1905_v34  ;;  %2311 = vmatpush.bf16.msra.mxu1 %v1905_v34 }
 0x189   : > { %2888 = vrot.lane.b32.xlu2 %v5008_v45, %s3023_s19  ;;  %2312 = vmatpush.bf16.msra.mxu2 %v1905_v34  ;;  %v3003_v45 = vld [vmem:[#allocation2 + $0x130] sm:$0xff] }
 0x18a   : > { %v4335_v16 = vsel %vm1682_vm9, %v4140_v60, %v2670_v51  ;;  %v4339_v32 = vsel %vm1682_vm9, %v4137_v36, %v2671_v30  ;;  %2313 = vmatpush.bf16.msra.mxu3 %v1905_v34  ;;  %v3002_v51 = vld [vmem:[#allocation2 + $0x128] sm:$0xff] }
 0x18b   : > { %2883 = vrot.lane.b32.xlu1 %v5009_v4, %s3023_s19  ;;  %v2724_v31 = vpop.permute.xlu2 %2723  ;;  %v2917_v14 = vpack.i.bf16 %v3003_v45, %v3002_v51 }
 0x18c   : > { %v2726_v48 = vunpack.i.h.bf16 %v2724_v31  ;;  %v2725_v24 = vunpack.i.l.bf16 %v2724_v31  ;;  %1913 = vmatpush.bf16.msra.mxu0 %v2310_v25  ;;  %2314 = vmatpush.bf16.msra.mxu1 %v2310_v25 }
 0x18d   : > { %2893 = vrot.lane.b32.xlu0 %v2892_v21, %s3022_s18  ;;  %v2674_v12 = vpop.permute.xlu1 %2673  ;;  %2315 = vmatpush.bf16.msra.mxu2 %v2310_v25 }
 0x18e   : > { %v2676_v60 = vunpack.i.h.bf16 %v2674_v12  ;;  %v2675_v47 = vunpack.i.l.bf16 %v2674_v12  ;;  %v4345_v8 = vsel %vm1682_vm9, %v1677_v42, %v2726_v48  ;;  %v4348_v36 = vsel %vm1682_vm9, %v1676_v56, %v2725_v24  ;;  %v2309_v56 = vld [vmem:[%s4898_s3] sm:$0xff]  ;;  %2316 = vmatpush.bf16.msra.mxu3 %v2310_v25  ;;  %v5011_v25 = vld [vmem:[#allocation33_spill] sm:$0xff] }
 0x18f   : > { %v2684_v1 = vpop.permute.xlu0 %2683 }
 0x190   : > { %v2686_v43 = vunpack.i.h.bf16 %v2684_v1  ;;  %v2685_v62 = vunpack.i.l.bf16 %v2684_v1  ;;  %v4355_v2 = vsel %vm1682_vm9, %v4223_v7, %v2675_v47  ;;  %v4359_v42 = vsel %vm1682_vm9, %v4227_v19, %v2676_v60  ;;  %1914 = vmatpush.bf16.msra.mxu0 %v2309_v56  ;;  %2317 = vmatpush.bf16.msra.mxu1 %v2309_v56  ;;  %v3004_v1 = vld [vmem:[#allocation2 + $0x1a8] sm:$0xff] }
 0x191   : > { %2903 = vrot.lane.b32.xlu2 %v3561_v22, %s3024_s20  ;;  %2318 = vmatpush.bf16.msra.mxu2 %v2309_v56 }
 0x192   : > { %v4368_v30 = vsel %vm1682_vm9, %v4163_v57, %v2685_v62  ;;  %v4372_v7 = vsel %vm1682_vm9, %v4160_v44, %v2686_v43  ;;  %2319 = vmatpush.bf16.msra.mxu3 %v2309_v56  ;;  %v3007_v62 = vld [vmem:[#allocation2 + $0x210] sm:$0xff] }
 0x193   : > { %2898 = vrot.lane.b32.xlu1 %v2897_v46, %s3022_s18  ;;  %v4375_v19 = vpop.permute.xlu2 %2738  ;;  %v764_v46 = vrot.slane %v3006_v18, 1  ;;  %v765_v56 = vrot.slane %v3007_v62, 1 }
 0x195   : > { %2908 = vrot.lane.b32.xlu0 %v4997_v27, %s3024_s20  ;;  %v2689_v22 = vpop.permute.xlu1 %2688  ;;  %v5010_v27 = vld [vmem:[#allocation28_spill] sm:$0xff] }
 0x196   : > { %v2691_v57 = vunpack.i.h.bf16 %v2689_v22  ;;  %v2690_v52 = vunpack.i.l.bf16 %v2689_v22  ;;  %v5012_v22 = vld [vmem:[#allocation30_spill] sm:$0xff] }
 0x197   : > { %v4379_v44 = vpop.permute.xlu0 %2698 }
 0x198   : > { %v4383_v21 = vsel %vm1682_vm9, %v4250_v26, %v2690_v52  ;;  %v4387_v0 = vsel %vm1682_vm9, %v4254_v53, %v2691_v57  ;;  %v492_v26 = vld [vmem:[#allocation2 + $0x218] sm:$0x1]  ;;  %v495_v57 = vld [vmem:[#allocation2 + $0x230] sm:$0xff] }
 0x199   : > { %2918 = vrot.lane.b32.xlu2 %v2917_v14, %s3022_s18  ;;  %v494_v14 = vld [vmem:[#allocation2 + $0x228] sm:$0xff] }
 0x19b   : > { %2913 = vrot.lane.b32.xlu1 %v5010_v27, %s3023_s19  ;;  %v4392_v4 = vpop.permute.xlu2 %2753  ;;  %v773_v27 = vrot.slane %v494_v14, 7 }
 0x19d   : > { %2923 = vrot.lane.b32.xlu0 %v4993_v13, %s3024_s20  ;;  %v2704_v31 = vpop.permute.xlu1 %2703  ;;  %v3005_v13 = vld [vmem:[#allocation2 + $0x1b0] sm:$0xff] }
 0x19e   : > { %v2706_v34 = vunpack.i.h.bf16 %v2704_v31  ;;  %v2705_v48 = vunpack.i.l.bf16 %v2704_v31  ;;  %v2937_v59 = vpack.i.bf16 %v3005_v13, %v3004_v1 }
 0x19f   : > { %v2714_v24 = vpop.permute.xlu0 %2713 }
 0x1a0   : > { %v2716_v12 = vunpack.i.h.bf16 %v2714_v24  ;;  %v2715_v60 = vunpack.i.l.bf16 %v2714_v24  ;;  %v4398_v53 = vsel %vm1682_vm9, %v4269_v41, %v2705_v48  ;;  %v4402_v47 = vsel %vm1682_vm9, %v4273_v20, %v2706_v34 }
 0x1a1   : > { %2933 = vrot.lane.b32.xlu2 %v5011_v25, %s3023_s19  ;;  %v767_v20 = vrot.slane %v492_v26, 1  ;;  %v2942_v34 = vpack.i.bf16 %v3007_v62, %v3006_v18  ;;  %v2660_v48 = vunpack.i.l.bf16 %v4320_v63  ;;  %v496_v62 = vld [vmem:[#allocation2 + $0x238] sm:$0x1] }
 0x1a2   : > { %v4408_v43 = vsel %vm1682_vm9, %v4209_v55, %v2715_v60  ;;  %v4412_v41 = vsel %vm1682_vm9, %v4206_v5, %v2716_v12  ;;  %v766_v55 = vsel %vm674_vm4, %v764_v46, %v765_v56  ;;  %v775_v5 = vrot.slane %v495_v57, 7  ;;  %v493_v12 = vld [vmem:[#allocation2 + $0x220] sm:$0xff] }
 0x1a3   : > { %2928 = vrot.lane.b32.xlu1 %v5012_v22, %s3023_s19  ;;  %v4416_v51 = vpop.permute.xlu2 %2768  ;;  %v768_v52 = vsel %vm674_vm4, %v765_v56, %v767_v20  ;;  %v2661_v60 = vunpack.i.h.bf16 %v4320_v63  ;;  %v772_v1 = vrot.slane %v493_v12, 7  ;;  %v2741_v56 = vunpack.i.h.bf16 %v4375_v19 }
 0x1a4   : > { %v2952_v25 = vpack.i.bf16 %v768_v52, %v766_v55  ;;  %v776_v18 = vsel %vm545_vm5, %v773_v27, %v775_v5 }
 0x1a5   : > { %2938 = vrot.lane.b32.xlu0 %v2937_v59, %s3022_s18  ;;  %v4419_v45 = vpop.permute.xlu1 %2718  ;;  %v774_v63 = vsel %vm545_vm5, %v772_v1, %v773_v27  ;;  %v779_v27 = vrot.slane %v495_v57, 1 }
 0x1a6   : > { %v2962_v22 = vpack.i.bf16 %v776_v18, %v774_v63  ;;  %v2665_v63 = vunpack.i.l.bf16 %v4258_v35 }
 0x1a7   : > { %v2729_v31 = vpop.permute.xlu0 %2728 }
 0x1a8   : > { %v2731_v24 = vunpack.i.h.bf16 %v2729_v31  ;;  %v2730_v26 = vunpack.i.l.bf16 %v2729_v31  ;;  %v778_v31 = vrot.slane %v494_v14, 1 }
 0x1a9   : > { %2948 = vrot.lane.b32.xlu2 %v4996_v17, %s3024_s20  ;;  %v1683_v17 = vsel %vm1682_vm9, %v4196_v3, %v2660_v48  ;;  %v781_v3 = vrot.slane %v496_v62, 1 }
 0x1aa   : > { %v4429_v13 = vsel %vm1682_vm9, %v4236_v23, %v2730_v26  ;;  %v4433_v59 = vsel %vm1682_vm9, %v4233_v37, %v2731_v24  ;;  %v1684_v23 = vsel %vm1682_vm9, %v4200_v50, %v2661_v60  ;;  %v2740_v37 = vunpack.i.l.bf16 %v4375_v19 }
 0x1ab   : > { %2943 = vrot.lane.b32.xlu1 %v2942_v34, %s3022_s18  ;;  %v4437_v46 = vpop.permute.xlu2 %2783  ;;  %v2967_v26 = vpack.i.bf16 %v495_v57, %v494_v14  ;;  %v2666_v60 = vunpack.i.h.bf16 %v4258_v35  ;;  %v780_v57 = vsel %vm674_vm4, %v778_v31, %v779_v27  ;;  %v782_v62 = vsel %vm674_vm4, %v779_v27, %v781_v3 }
 0x1ac   : > { %v1685_v35 = vsel %vm1682_vm9, %v4213_v40, %v2665_v63 }
 0x1ad   : > { %2953 = vrot.lane.b32.xlu0 %v2952_v25, %s3024_s20  ;;  %v2734_v20 = vpop.permute.xlu1 %2733 }
 0x1ae   : > { %v2736_v55 = vunpack.i.h.bf16 %v2734_v20  ;;  %v2735_v52 = vunpack.i.l.bf16 %v2734_v20 }
 0x1af   : > { %v2744_v5 = vpop.permute.xlu0 %2743 }
 0x1b0   : > { %v1716_v34 = vsel %vm1715_vm11, %v1683_v17, %v2735_v52  ;;  %v1717_v50 = vsel %vm1715_vm11, %v1684_v23, %v2736_v55  ;;  %v2746_v48 = vunpack.i.h.bf16 %v2744_v5  ;;  %v2745_v24 = vunpack.i.l.bf16 %v2744_v5 }
 0x1b1   : > { %v1749_v19 = vsel %vm1748_vm12, %v1716_v34, %v2740_v37  ;;  %v1750_v12 = vsel %vm1748_vm12, %v1717_v50, %v2741_v56  ;;  %2963 = vrot.lane.b32.xlu2 %v2962_v22, %s3023_s19  ;;  %v1686_v56 = vsel %vm1682_vm9, %v4217_v15, %v2666_v60  ;;  %v2770_v22 = vunpack.i.l.bf16 %v4416_v51 }
 0x1b2   : > { %v1782_v1 = vsel %vm1781_vm13, %v1749_v19, %v2745_v24  ;;  %v1783_v18 = vsel %vm1781_vm13, %v1750_v12, %v2746_v48  ;;  %v2972_v52 = vpack.i.bf16 %v782_v62, %v780_v57  ;;  %v2681_v34 = vunpack.i.h.bf16 %v4276_v58 }
 0x1b3   : > { %2958 = vrot.lane.b32.xlu1 %v2952_v25, %s3021_s17  ;;  %v4457_v17 = vpop.permute.xlu2 %2798  ;;  %v1814_v14 = vpack.c.bf16 %v1783_v18, %v1782_v1  ;;  %v2771_v25 = vunpack.i.h.bf16 %v4416_v51  ;;  %v2680_v15 = vunpack.i.l.bf16 %v4276_v58  ;;  %v2756_v48 = vunpack.i.h.bf16 %v4392_v4 }
 0x1b4   : > { %v2755_v51 = vunpack.i.l.bf16 %v4392_v4  ;;  %v1692_v58 = vsel %vm1682_vm9, %v4244_v9, %v2681_v34 }
 0x1b5   : > { %2968 = vrot.lane.b32.xlu0 %v2967_v26, %s3022_s18  ;;  %v2749_v23 = vpop.permute.xlu1 %2748  ;;  %2291 = vmatmul.msk.bf16.vlgmr.msra.gmra.mxu0 %vm1854_vm14, %v1814_v14  ;;  %v1691_v1 = vsel %vm1682_vm9, %v4240_v11, %v2680_v15  ;;  %v1725_v4 = vsel %vm1715_vm11, %v1692_v58, %v2756_v48  ;;  %v2700_v11 = vunpack.i.l.bf16 %v4379_v44 }
 0x1b6   : > { %v2751_v37 = vunpack.i.h.bf16 %v2749_v23  ;;  %v2750_v20 = vunpack.i.l.bf16 %v2749_v23  ;;  %v1724_v14 = vsel %vm1715_vm11, %v1691_v1, %v2755_v51 }
 0x1b7   : > { %v2759_v55 = vpop.permute.xlu0 %2758 }
 0x1b8   : > { %v1718_v5 = vsel %vm1715_vm11, %v1685_v35, %v2750_v20  ;;  %v1719_v27 = vsel %vm1715_vm11, %v1686_v56, %v2751_v37  ;;  %v2761_v31 = vunpack.i.h.bf16 %v2759_v55  ;;  %v2760_v3 = vunpack.i.l.bf16 %v2759_v55 }
 0x1b9   : > { %v2701_v35 = vunpack.i.h.bf16 %v4379_v44  ;;  %v2785_v55 = vunpack.i.l.bf16 %v4437_v46 }
 0x1ba   : > { %v1751_v50 = vsel %vm1748_vm12, %v1718_v5, %v2760_v3  ;;  %v1752_v40 = vsel %vm1748_vm12, %v1719_v27, %v2761_v31  ;;  %v1699_v3 = vsel %vm1682_vm9, %v4186_v28, %v2700_v11 }
 0x1bb   : > { %2973 = vrot.lane.b32.xlu1 %v2972_v52, %s3024_s20  ;;  %v1784_v24 = vsel %vm1781_vm13, %v1751_v50, %v2770_v22  ;;  %v1785_v26 = vsel %vm1781_vm13, %v1752_v40, %v2771_v25  ;;  %v2814_v19 = vpop.permute.xlu2 %2813  ;;  %v2786_v22 = vunpack.i.h.bf16 %v4437_v46  ;;  %v1700_v44 = vsel %vm1682_vm9, %v4183_v10, %v2701_v35 }
 0x1bc   : > { %v1815_v12 = vpack.c.bf16 %v1785_v26, %v1784_v24  ;;  %v2816_v58 = vunpack.i.h.bf16 %v2814_v19  ;;  %v2815_v1 = vunpack.i.l.bf16 %v2814_v19 }
 0x1bd   : > { %v2764_v60 = vpop.permute.xlu1 %2763 }
 0x1be   : > { %v2766_v18 = vunpack.i.h.bf16 %v2764_v60  ;;  %v2765_v63 = vunpack.i.l.bf16 %v2764_v60 }
 0x1bf   : > { %v2774_v57 = vpop.permute.xlu0 %2773 }
 0x1c0   : > { %v1757_v62 = vsel %vm1748_vm12, %v1724_v14, %v2765_v63  ;;  %v1758_v23 = vsel %vm1748_vm12, %v1725_v4, %v2766_v18  ;;  %v2776_v56 = vunpack.i.h.bf16 %v2774_v57  ;;  %v2775_v37 = vunpack.i.l.bf16 %v2774_v57 }
 0x1c2   : > { %v1790_v20 = vsel %vm1781_vm13, %v1757_v62, %v2775_v37  ;;  %v1791_v9 = vsel %vm1781_vm13, %v1758_v23, %v2776_v56  ;;  %v2801_v37 = vunpack.i.h.bf16 %v4457_v17 }
 0x1c3   : > { %v1818_v25 = vpack.c.bf16 %v1791_v9, %v1790_v20  ;;  %v4496_v31 = vpop.permute.xlu2 %2828  ;;  %v2800_v20 = vunpack.i.l.bf16 %v4457_v17 }
 0x1c5   : > { %2295 = vmatmul.msk.bf16.vlgmr.msra.gmra.mxu1 %vm1854_vm14, %v1818_v25  ;;  %v2779_v52 = vpop.permute.xlu1 %2778  ;;  %2292 = vmatmul.msk.bf16.gmra.mxu0 %vm1854_vm14, %v1815_v12 }
 0x1c6   : > { %v2781_v5 = vunpack.i.h.bf16 %v2779_v52  ;;  %v2780_v27 = vunpack.i.l.bf16 %v2779_v52 }
 0x1c7   : > { %v2789_v34 = vpop.permute.xlu0 %2788 }
 0x1c8   : > { %v1732_v15 = vsel %vm1715_vm11, %v1699_v3, %v2780_v27  ;;  %v1733_v46 = vsel %vm1715_vm11, %v1700_v44, %v2781_v5  ;;  %v2791_v50 = vunpack.i.h.bf16 %v2789_v34  ;;  %v2790_v40 = vunpack.i.l.bf16 %v2789_v34 }
 0x1c9   : > { %v1765_v48 = vsel %vm1748_vm12, %v1732_v15, %v2785_v55  ;;  %v1766_v51 = vsel %vm1748_vm12, %v1733_v46, %v2786_v22  ;;  %v1727_v22 = vsel %vm1715_vm11, %v4372_v7, %v2801_v37 }
 0x1ca   : > { %v1798_v24 = vsel %vm1781_vm13, %v1765_v48, %v2790_v40  ;;  %v1799_v26 = vsel %vm1781_vm13, %v1766_v51, %v2791_v50 }
 0x1cb   : > { %v1822_v12 = vpack.c.bf16 %v1799_v26, %v1798_v24  ;;  %v2844_v4 = vpop.permute.xlu2 %2843 }
 0x1cc   : > { %v2846_v7 = vunpack.i.h.bf16 %v2844_v4  ;;  %v2845_v40 = vunpack.i.l.bf16 %v2844_v4 }
 0x1cd   : > { %v2794_v28 = vpop.permute.xlu1 %2793  ;;  %2299 = vmatmul.msk.bf16.vlgmr.msra.gmra.mxu2 %vm1854_vm14, %v1822_v12 }
 0x1ce   : > { %v2796_v10 = vunpack.i.h.bf16 %v2794_v28  ;;  %v2795_v60 = vunpack.i.l.bf16 %v2794_v28  ;;  %v2721_v28 = vunpack.i.h.bf16 %v4419_v45 }
 0x1cf   : > { %v2804_v18 = vpop.permute.xlu0 %2803 }
 0x1d0   : > { %v1720_v63 = vsel %vm1715_vm11, %v4335_v16, %v2795_v60  ;;  %v1721_v14 = vsel %vm1715_vm11, %v4339_v32, %v2796_v10  ;;  %v2806_v57 = vunpack.i.h.bf16 %v2804_v18  ;;  %v2805_v62 = vunpack.i.l.bf16 %v2804_v18 }
 0x1d1   : > { %v1726_v32 = vsel %vm1715_vm11, %v4368_v30, %v2800_v20  ;;  %v2720_v10 = vunpack.i.l.bf16 %v4419_v45  ;;  %v2830_v18 = vunpack.i.l.bf16 %v4496_v31  ;;  %v1708_v45 = vsel %vm1682_vm9, %v4292_v29, %v2721_v28 }
 0x1d2   : > { %v1753_v23 = vsel %vm1748_vm12, %v1720_v63, %v2805_v62  ;;  %v1754_v56 = vsel %vm1748_vm12, %v1721_v14, %v2806_v57 }
 0x1d3   : > { %v1786_v19 = vsel %vm1781_vm13, %v1753_v23, %v2815_v1  ;;  %v1787_v9 = vsel %vm1781_vm13, %v1754_v56, %v2816_v58  ;;  %v4526_v3 = vpop.permute.xlu2 %2858  ;;  %v2831_v1 = vunpack.i.h.bf16 %v4496_v31  ;;  %v1707_v57 = vsel %vm1682_vm9, %v4288_v54, %v2720_v10 }
 0x1d4   : > { %v1816_v35 = vpack.c.bf16 %v1787_v9, %v1786_v19  ;;  %v1740_v56 = vsel %vm1715_vm11, %v1707_v57, %v2830_v18 }
 0x1d5   : > { %v2809_v16 = vpop.permute.xlu1 %2808  ;;  %v1741_v31 = vsel %vm1715_vm11, %v1708_v45, %v2831_v1 }
 0x1d6   : > { %v2811_v11 = vunpack.i.h.bf16 %v2809_v16  ;;  %v2810_v25 = vunpack.i.l.bf16 %v2809_v16  ;;  %2293 = vmatmul.msk.bf16.gmra.mxu0 %vm1854_vm14, %v1816_v35 }
 0x1d7   : > { %v2819_v55 = vpop.permute.xlu0 %2818 }
 0x1d8   : > { %v1759_v52 = vsel %vm1748_vm12, %v1726_v32, %v2810_v25  ;;  %v1760_v17 = vsel %vm1748_vm12, %v1727_v22, %v2811_v11  ;;  %v2821_v5 = vunpack.i.h.bf16 %v2819_v55  ;;  %v2820_v27 = vunpack.i.l.bf16 %v2819_v55 }
 0x1da   : > { %v1792_v44 = vsel %vm1781_vm13, %v1759_v52, %v2820_v27  ;;  %v1793_v34 = vsel %vm1781_vm13, %v1760_v17, %v2821_v5 }
 0x1db   : > { %v1819_v15 = vpack.c.bf16 %v1793_v34, %v1792_v44  ;;  %v2874_v14 = vpop.permute.xlu2 %2873 }
 0x1dc   : > { %v2876_v55 = vunpack.i.h.bf16 %v2874_v14  ;;  %v2875_v52 = vunpack.i.l.bf16 %v2874_v14 }
 0x1dd   : > { %2296 = vmatmul.msk.bf16.gmra.mxu1 %vm1854_vm14, %v1819_v15  ;;  %v2824_v30 = vpop.permute.xlu1 %2823 }
 0x1de   : > { %v2826_v46 = vunpack.i.h.bf16 %v2824_v30  ;;  %v2825_v50 = vunpack.i.l.bf16 %v2824_v30 }
 0x1df   : > { %v2834_v48 = vpop.permute.xlu0 %2833 }
 0x1e0   : > { %v1734_v51 = vsel %vm1715_vm11, %v4398_v53, %v2825_v50  ;;  %v1735_v24 = vsel %vm1715_vm11, %v4402_v47, %v2826_v46  ;;  %v2836_v26 = vunpack.i.h.bf16 %v2834_v48  ;;  %v2835_v12 = vunpack.i.l.bf16 %v2834_v48 }
 0x1e1   : > { %v2861_v46 = vunpack.i.h.bf16 %v4526_v3  ;;  %v2860_v50 = vunpack.i.l.bf16 %v4526_v3 }
 0x1e2   : > { %v1767_v60 = vsel %vm1748_vm12, %v1734_v51, %v2835_v12  ;;  %v1768_v58 = vsel %vm1748_vm12, %v1735_v24, %v2836_v26 }
 0x1e3   : > { %v1800_v63 = vsel %vm1781_vm13, %v1767_v60, %v2845_v40  ;;  %v1801_v53 = vsel %vm1781_vm13, %v1768_v58, %v2846_v7  ;;  %v2889_v25 = vpop.permute.xlu2 %2888  ;;  %v1729_v26 = vsel %vm1715_vm11, %v4387_v0, %v2861_v46 }
 0x1e4   : > { %v1823_v47 = vpack.c.bf16 %v1801_v53, %v1800_v63 }
 0x1e5   : > { %v2839_v4 = vpop.permute.xlu1 %2838 }
 0x1e6   : > { %v2841_v62 = vunpack.i.h.bf16 %v2839_v4  ;;  %v2840_v23 = vunpack.i.l.bf16 %v2839_v4  ;;  %2300 = vmatmul.msk.bf16.gmra.mxu2 %vm1854_vm14, %v1823_v47 }
 0x1e7   : > { %v2849_v37 = vpop.permute.xlu0 %2848 }
 0x1e8   : > { %v1773_v20 = vsel %vm1748_vm12, %v1740_v56, %v2840_v23  ;;  %v1774_v19 = vsel %vm1748_vm12, %v1741_v31, %v2841_v62  ;;  %v2851_v9 = vunpack.i.h.bf16 %v2849_v37  ;;  %v2850_v35 = vunpack.i.l.bf16 %v2849_v37 }
 0x1ea   : > { %v1806_v54 = vsel %vm1781_vm13, %v1773_v20, %v2850_v35  ;;  %v1807_v16 = vsel %vm1781_vm13, %v1774_v19, %v2851_v9  ;;  %v2891_v20 = vunpack.i.h.bf16 %v2889_v25  ;;  %v2890_v19 = vunpack.i.l.bf16 %v2889_v25 }
 0x1eb   : > { %v1826_v29 = vpack.c.bf16 %v1807_v16, %v1806_v54  ;;  %v2904_v28 = vpop.permute.xlu2 %2903 }
 0x1ec   : > { %v2906_v47 = vunpack.i.h.bf16 %v2904_v28  ;;  %v2905_v0 = vunpack.i.l.bf16 %v2904_v28 }
 0x1ed   : > { %2303 = vmatmul.msk.bf16.vlgmr.msra.gmra.mxu3 %vm1854_vm14, %v1826_v29  ;;  %v2854_v11 = vpop.permute.xlu1 %2853 }
 0x1ee   : > { %v2856_v32 = vunpack.i.h.bf16 %v2854_v11  ;;  %v2855_v22 = vunpack.i.l.bf16 %v2854_v11  ;;  %v1743_v11 = vsel %vm1715_vm11, %v4345_v8, %v2891_v20 }
 0x1ef   : > { %v2864_v17 = vpop.permute.xlu0 %2863 }
 0x1f0   : > { %v1722_v5 = vsel %vm1715_vm11, %v4355_v2, %v2855_v22  ;;  %v1723_v27 = vsel %vm1715_vm11, %v4359_v42, %v2856_v32  ;;  %v2866_v44 = vunpack.i.h.bf16 %v2864_v17  ;;  %v2865_v34 = vunpack.i.l.bf16 %v2864_v17 }
 0x1f1   : > { %v1728_v42 = vsel %vm1715_vm11, %v4383_v21, %v2860_v50 }
 0x1f2   : > { %v1755_v15 = vsel %vm1748_vm12, %v1722_v5, %v2865_v34  ;;  %v1756_v30 = vsel %vm1748_vm12, %v1723_v27, %v2866_v44 }
 0x1f3   : > { %v1788_v7 = vsel %vm1781_vm13, %v1755_v15, %v2875_v52  ;;  %v1789_v40 = vsel %vm1781_vm13, %v1756_v30, %v2876_v55  ;;  %v2919_v56 = vpop.permute.xlu2 %2918 }
 0x1f4   : > { %v1817_v48 = vpack.c.bf16 %v1789_v40, %v1788_v7  ;;  %v2921_v34 = vunpack.i.h.bf16 %v2919_v56  ;;  %v2920_v15 = vunpack.i.l.bf16 %v2919_v56 }
 0x1f5   : > { %v2869_v51 = vpop.permute.xlu1 %2868 }
 0x1f6   : > { %v2871_v2 = vunpack.i.h.bf16 %v2869_v51  ;;  %v2870_v24 = vunpack.i.l.bf16 %v2869_v51  ;;  %2294 = vmatmul.msk.bf16.gmra.mxu0 %vm1854_vm14, %v1817_v48 }
 0x1f7   : > { %v2879_v12 = vpop.permute.xlu0 %2878 }
 0x1f8   : > { %v1761_v3 = vsel %vm1748_vm12, %v1728_v42, %v2870_v24  ;;  %v1762_v10 = vsel %vm1748_vm12, %v1729_v26, %v2871_v2  ;;  %v2881_v60 = vunpack.i.h.bf16 %v2879_v12  ;;  %v2880_v58 = vunpack.i.l.bf16 %v2879_v12 }
 0x1fa   : > { %v1794_v1 = vsel %vm1781_vm13, %v1761_v3, %v2880_v58  ;;  %v1795_v18 = vsel %vm1781_vm13, %v1762_v10, %v2881_v60 }
 0x1fb   : > { %v1820_v63 = vpack.c.bf16 %v1795_v18, %v1794_v1  ;;  %v2934_v44 = vpop.permute.xlu2 %2933 }
 0x1fd   : > { %2297 = vmatmul.msk.bf16.gmra.mxu1 %vm1854_vm14, %v1820_v63  ;;  %v2884_v53 = vpop.permute.xlu1 %2883 }
 0x1fe   : > { %v2886_v21 = vunpack.i.h.bf16 %v2884_v53  ;;  %v2885_v14 = vunpack.i.l.bf16 %v2884_v53 }
 0x1ff   : > { %v2894_v4 = vpop.permute.xlu0 %2893 }
 0x200   : > { %v1736_v57 = vsel %vm1715_vm11, %v4326_v39, %v2885_v14  ;;  %v1737_v45 = vsel %vm1715_vm11, %v4323_v6, %v2886_v21  ;;  %v2896_v62 = vunpack.i.h.bf16 %v2894_v4  ;;  %v2895_v23 = vunpack.i.l.bf16 %v2894_v4 }
 0x201   : > { %v1742_v6 = vsel %vm1715_vm11, %v4348_v36, %v2890_v19  ;;  %v2936_v14 = vunpack.i.h.bf16 %v2934_v44 }
 0x202   : > { %v1769_v31 = vsel %vm1748_vm12, %v1736_v57, %v2895_v23  ;;  %v1770_v37 = vsel %vm1748_vm12, %v1737_v45, %v2896_v62 }
 0x203   : > { %v1802_v9 = vsel %vm1781_vm13, %v1769_v31, %v2905_v0  ;;  %v1803_v35 = vsel %vm1781_vm13, %v1770_v37, %v2906_v47  ;;  %v2949_v12 = vpop.permute.xlu2 %2948  ;;  %v2935_v47 = vunpack.i.l.bf16 %v2934_v44 }
 0x204   : > { %v1824_v54 = vpack.c.bf16 %v1803_v35, %v1802_v9  ;;  %v2951_v60 = vunpack.i.h.bf16 %v2949_v12 }
 0x205   : > { %v2899_v16 = vpop.permute.xlu1 %2898 }
 0x206   : > { %v2901_v29 = vunpack.i.h.bf16 %v2899_v16  ;;  %v2900_v39 = vunpack.i.l.bf16 %v2899_v16  ;;  %2301 = vmatmul.msk.bf16.gmra.mxu2 %vm1854_vm14, %v1824_v54 }
 0x207   : > { %v2909_v32 = vpop.permute.xlu0 %2908 }
 0x208   : > { %v1775_v22 = vsel %vm1748_vm12, %v1742_v6, %v2900_v39  ;;  %v1776_v25 = vsel %vm1748_vm12, %v1743_v11, %v2901_v29  ;;  %v2911_v55 = vunpack.i.h.bf16 %v2909_v32  ;;  %v2910_v52 = vunpack.i.l.bf16 %v2909_v32 }
 0x20a   : > { %v1808_v17 = vsel %vm1781_vm13, %v1775_v22, %v2910_v52  ;;  %v1809_v5 = vsel %vm1781_vm13, %v1776_v25, %v2911_v55 }
 0x20b   : > { %v1827_v27 = vpack.c.bf16 %v1809_v5, %v1808_v17  ;;  %v2964_v29 = vpop.permute.xlu2 %2963 }
 0x20c   : > { %v2966_v6 = vunpack.i.h.bf16 %v2964_v29 }
 0x20d   : > { %2304 = vmatmul.msk.bf16.gmra.mxu3 %vm1854_vm14, %v1827_v27  ;;  %v2914_v36 = vpop.permute.xlu1 %2913 }
 0x20e   : > { %v2916_v30 = vunpack.i.h.bf16 %v2914_v36  ;;  %v2915_v8 = vunpack.i.l.bf16 %v2914_v36 }
 0x20f   : > { %v2924_v46 = vpop.permute.xlu0 %2923 }
 0x210   : > { %v1730_v50 = vsel %vm1715_vm11, %v4301_v38, %v2915_v8  ;;  %v1731_v7 = vsel %vm1715_vm11, %v4298_v61, %v2916_v30  ;;  %v2926_v40 = vunpack.i.h.bf16 %v2924_v46  ;;  %v2925_v48 = vunpack.i.l.bf16 %v2924_v46 }
 0x211   : > { %v1763_v51 = vsel %vm1748_vm12, %v1730_v50, %v2920_v15  ;;  %v1764_v2 = vsel %vm1748_vm12, %v1731_v7, %v2921_v34  ;;  %v2950_v61 = vunpack.i.l.bf16 %v2949_v12 }
 0x212   : > { %v1796_v24 = vsel %vm1781_vm13, %v1763_v51, %v2925_v48  ;;  %v1797_v42 = vsel %vm1781_vm13, %v1764_v2, %v2926_v40 }
 0x213   : > { %v1821_v26 = vpack.c.bf16 %v1797_v42, %v1796_v24 }
 0x215   : > { %v2929_v28 = vpop.permute.xlu1 %2928  ;;  %2298 = vmatmul.msk.bf16.gmra.mxu1 %vm1854_vm14, %v1821_v26 }
 0x216   : > { %v2931_v3 = vunpack.i.h.bf16 %v2929_v28  ;;  %v2930_v38 = vunpack.i.l.bf16 %v2929_v28 }
 0x217   : > { %v2939_v10 = vpop.permute.xlu0 %2938 }
 0x218   : > { %v1738_v58 = vsel %vm1715_vm11, %v4408_v43, %v2930_v38  ;;  %v1739_v1 = vsel %vm1715_vm11, %v4412_v41, %v2931_v3  ;;  %v2941_v18 = vunpack.i.h.bf16 %v2939_v10  ;;  %v2940_v63 = vunpack.i.l.bf16 %v2939_v10 }
 0x219   : > { %v1744_v43 = vsel %vm1715_vm11, %v4429_v13, %v2935_v47  ;;  %v1745_v41 = vsel %vm1715_vm11, %v4433_v59, %v2936_v14  ;;  %v2965_v59 = vunpack.i.l.bf16 %v2964_v29 }
 0x21a   : > { %v1771_v53 = vsel %vm1748_vm12, %v1738_v58, %v2940_v63  ;;  %v1772_v21 = vsel %vm1748_vm12, %v1739_v1, %v2941_v18 }
 0x21b   : > { %v1804_v0 = vsel %vm1781_vm13, %v1771_v53, %v2950_v61  ;;  %v1805_v4 = vsel %vm1781_vm13, %v1772_v21, %v2951_v60 }
 0x21c   : > { %v1825_v57 = vpack.c.bf16 %v1805_v4, %v1804_v0 }
 0x21d   : > { %v2944_v45 = vpop.permute.xlu1 %2943 }
 0x21e   : > { %v2946_v62 = vunpack.i.h.bf16 %v2944_v45  ;;  %v2945_v23 = vunpack.i.l.bf16 %v2944_v45  ;;  %2302 = vmatmul.msk.bf16.gmra.mxu2 %vm1854_vm14, %v1825_v57 }
 0x21f   : > { %v2954_v56 = vpop.permute.xlu0 %2953 }
 0x220   : > { %v1777_v31 = vsel %vm1748_vm12, %v1744_v43, %v2945_v23  ;;  %v1778_v37 = vsel %vm1748_vm12, %v1745_v41, %v2946_v62  ;;  %v2956_v20 = vunpack.i.h.bf16 %v2954_v56  ;;  %v2955_v19 = vunpack.i.l.bf16 %v2954_v56 }
 0x222   : > { %v1810_v9 = vsel %vm1781_vm13, %v1777_v31, %v2955_v19  ;;  %v1811_v35 = vsel %vm1781_vm13, %v1778_v37, %v2956_v20 }
 0x223   : > { %v1828_v54 = vpack.c.bf16 %v1811_v35, %v1810_v9 }
 0x225   : > { %2305 = vmatmul.msk.bf16.gmra.mxu3 %vm1854_vm14, %v1828_v54  ;;  %v2959_v16 = vpop.permute.xlu1 %2958 }
 0x226   : > { %v2961_v13 = vunpack.i.h.bf16 %v2959_v16  ;;  %v2960_v39 = vunpack.i.l.bf16 %v2959_v16 }
 0x227   : > { %v2969_v11 = vpop.permute.xlu0 %2968 }
 0x228   : > { %v1713_v32 = vsel %vm1682_vm9, %v4311_v49, %v2960_v39  ;;  %v1714_v22 = vsel %vm1682_vm9, %v4315_v33, %v2961_v13  ;;  %v2971_v25 = vunpack.i.h.bf16 %v2969_v11  ;;  %v2970_v55 = vunpack.i.l.bf16 %v2969_v11  ;;  %v4631_v49 = vld [vmem:[%s4899_s4] ss:$0 sm:$0xff] }
 0x229   : > { %v1746_v52 = vsel %vm1715_vm11, %v1713_v32, %v2965_v59  ;;  %v1747_v17 = vsel %vm1715_vm11, %v1714_v22, %v2966_v6 }
 0x22a   : > { %v1779_v34 = vsel %vm1748_vm12, %v1746_v52, %v2970_v55  ;;  %v1780_v15 = vsel %vm1748_vm12, %v1747_v17, %v2971_v25 }
 0x22d   : > { %v2974_v5 = vpop.permute.xlu1 %2973 }
 0x22e   : > { %v2976_v27 = vunpack.i.h.bf16 %v2974_v5  ;;  %v2975_v44 = vunpack.i.l.bf16 %v2974_v5 }
 0x230   : > { %v1812_v33 = vsel %vm1781_vm13, %v1779_v34, %v2975_v44  ;;  %v1813_v36 = vsel %vm1781_vm13, %v1780_v15, %v2976_v27 }
 0x231   : > { %v1829_v30 = vpack.c.bf16 %v1813_v36, %v1812_v33 }
 0x232   : > { %v1916_v8 = vpop.f32.mrf.mxu0 }
 0x233   : > { %v1917_v46 = vadd.f32 %v4631_v49, %v1916_v8 }
 0x235   : > { %1996 = vst.msk [vmem:[%s3081_s8] sm:$0xff] %vm1583_vm6, %v1917_v46  ;;  %2306 = vmatmul.msk.bf16.gmra.mxu3 %vm1854_vm14, %v1829_v30  ;;  %v2102_v7 = vmul.f32 %v1917_v46, %v1917_v46  ;;  %v2029_v48 = vsel %vm1583_vm6, %v1917_v46, 0.0 }
 0x237   : > { %v2134_v42 = vsel %vm1583_vm6, %v2102_v7, 0.0 }
 0x23a   : > { %v1918_v50 = vpop.f32.mrf.mxu0 }
 0x23b   : > { %v1919_v40 = vadd.f32 %v4631_v49, %v1918_v50 }
 0x23d   : > { %1997 = vst.msk [vmem:[%s3081_s8 + $0x8] sm:$0xff] %vm1583_vm6, %v1919_v40  ;;  %v2030_v51 = vsel %vm1583_vm6, %v1919_v40, 0.0  ;;  %v2103_v2 = vmul.f32 %v1919_v40, %v1919_v40 }
 0x23e   : > { %v2031_v24 = vadd.f32 %v2030_v51, %v2029_v48 }
 0x23f   : > { %v2135_v26 = vsel %vm1583_vm6, %v2103_v2, 0.0 }
 0x240   : > { %v2136_v12 = vadd.f32 %v2135_v26, %v2134_v42 }
 0x242   : > { %v1936_v28 = vpop.f32.mrf.mxu1  ;;  %v1921_v3 = vpop.f32.mrf.mxu0 }
 0x243   : > { %v4647_v38 = vadd.f32 %v4631_v49, %v1936_v28  ;;  %v1922_v10 = vadd.f32 %v4631_v49, %v1921_v3 }
 0x245   : > { %2004 = vst.msk [vmem:[%s3081_s8 + $0x40] sm:$0xff] %vm1583_vm6, %v4647_v38  ;;  %v2032_v60 = vsel %vm1583_vm6, %v1922_v10, 0.0  ;;  %v2104_v61 = vmul.f32 %v1922_v10, %v1922_v10  ;;  %v2110_v2 = vmul.f32 %v4647_v38, %v4647_v38  ;;  %v2044_v28 = vsel %vm1583_vm6, %v4647_v38, 0.0 }
 0x246   : > { %1998 = vst.msk [vmem:[%s3081_s8 + $0x10] sm:$0xff] %vm1583_vm6, %v1922_v10  ;;  %v2033_v58 = vadd.f32 %v2032_v60, %v2031_v24 }
 0x247   : > { %v2137_v1 = vsel %vm1583_vm6, %v2104_v61, 0.0 }
 0x248   : > { %v2138_v18 = vadd.f32 %v2137_v1, %v2136_v12 }
 0x24a   : > { %v1938_v63 = vpop.f32.mrf.mxu1  ;;  %v1923_v53 = vpop.f32.mrf.mxu0 }
 0x24b   : > { %v4658_v21 = vadd.f32 %v4631_v49, %v1938_v63  ;;  %v1924_v14 = vadd.f32 %v4631_v49, %v1923_v53 }
 0x24d   : > { %2005 = vst.msk [vmem:[%s3081_s8 + $0x48] sm:$0xff] %vm1583_vm6, %v4658_v21  ;;  %v2105_v16 = vmul.f32 %v1924_v14, %v1924_v14  ;;  %v2034_v39 = vsel %vm1583_vm6, %v1924_v14, 0.0  ;;  %v2111_v3 = vmul.f32 %v4658_v21, %v4658_v21  ;;  %v2046_v1 = vsel %vm1583_vm6, %v4658_v21, 0.0 }
 0x24e   : > { %1999 = vst.msk [vmem:[%s3081_s8 + $0x18] sm:$0xff] %vm1583_vm6, %v1924_v14  ;;  %v2035_v25 = vadd.f32 %v2034_v39, %v2033_v58  ;;  %v2149_v58 = vsel %vm1583_vm6, %v2110_v2, 0.0 }
 0x24f   : > { %v2139_v11 = vsel %vm1583_vm6, %v2105_v16, 0.0  ;;  %v2151_v38 = vsel %vm1583_vm6, %v2111_v3, 0.0 }
 0x250   : > { %v1956_v47 = vpop.f32.mrf.mxu2  ;;  %v2140_v27 = vadd.f32 %v2139_v11, %v2138_v18 }
 0x251   : > { %v4667_v0 = vadd.f32 %v4631_v49, %v1956_v47 }
 0x253   : > { %2012 = vst.msk [vmem:[%s3081_s8 + $0x80] sm:$0xff] %vm1583_vm6, %v4667_v0  ;;  %v1926_v4 = vpop.f32.mrf.mxu0 }
 0x254   : > { %v1927_v57 = vadd.f32 %v4631_v49, %v1926_v4 }
 0x256   : > { %2000 = vst.msk [vmem:[%s3081_s8 + $0x20] sm:$0xff] %vm1583_vm6, %v1927_v57  ;;  %v2106_v6 = vmul.f32 %v1927_v57, %v1927_v57  ;;  %v2036_v32 = vsel %vm1583_vm6, %v1927_v57, 0.0 }
 0x257   : > { %v2037_v44 = vadd.f32 %v2036_v32, %v2035_v25 }
 0x258   : > { %v1958_v45 = vpop.f32.mrf.mxu2  ;;  %v2141_v55 = vsel %vm1583_vm6, %v2106_v6, 0.0 }
 0x259   : > { %v4676_v62 = vadd.f32 %v4631_v49, %v1958_v45  ;;  %v2142_v30 = vadd.f32 %v2141_v55, %v2140_v27 }
 0x25a   : > { %v1941_v23 = vpop.f32.mrf.mxu1 }
 0x25b   : > { %2013 = vst.msk [vmem:[%s3081_s8 + $0x88] sm:$0xff] %vm1583_vm6, %v4676_v62  ;;  %v4682_v43 = vadd.f32 %v4631_v49, %v1941_v23  ;;  %v1928_v41 = vpop.f32.mrf.mxu0 }
 0x25c   : > { %v1929_v56 = vadd.f32 %v4631_v49, %v1928_v41 }
 0x25d   : > { %2006 = vst.msk [vmem:[%s3081_s8 + $0x50] sm:$0xff] %vm1583_vm6, %v4682_v43  ;;  %v2112_v45 = vmul.f32 %v4682_v43, %v4682_v43  ;;  %v2048_v21 = vsel %vm1583_vm6, %v4682_v43, 0.0 }
 0x25e   : > { %2001 = vst.msk [vmem:[%s3081_s8 + $0x28] sm:$0xff] %vm1583_vm6, %v1929_v56  ;;  %v2107_v22 = vmul.f32 %v1929_v56, %v1929_v56  ;;  %v2038_v52 = vsel %vm1583_vm6, %v1929_v56, 0.0 }
 0x25f   : > { %v2039_v8 = vadd.f32 %v2038_v52, %v2037_v44  ;;  %v2153_v41 = vsel %vm1583_vm6, %v2112_v45, 0.0 }
 0x260   : > { %v2143_v15 = vsel %vm1583_vm6, %v2107_v22, 0.0 }
 0x261   : > { %v2144_v48 = vadd.f32 %v2143_v15, %v2142_v30 }
 0x262   : > { %v1943_v31 = vpop.f32.mrf.mxu1 }
 0x263   : > { %v4691_v37 = vadd.f32 %v4631_v49, %v1943_v31 }
 0x265   : > { %2007 = vst.msk [vmem:[%s3081_s8 + $0x58] sm:$0xff] %vm1583_vm6, %v4691_v37  ;;  %v2113_v56 = vmul.f32 %v4691_v37, %v4691_v37 }
 0x267   : > { %v2155_v6 = vsel %vm1583_vm6, %v2113_v56, 0.0 }
 0x269   : > { %v1961_v20 = vpop.f32.mrf.mxu2 }
 0x26a   : > { %v4697_v19 = vadd.f32 %v4631_v49, %v1961_v20 }
 0x26c   : > { %2014 = vst.msk [vmem:[%s3081_s8 + $0x90] sm:$0xff] %vm1583_vm6, %v4697_v19 }
 0x270   : > { %v1976_v9 = vpop.f32.mrf.mxu3 }
 0x271   : > { %v4703_v35 = vadd.f32 %v4631_v49, %v1976_v9  ;;  %v1963_v54 = vpop.f32.mrf.mxu2  ;;  %v2050_v9 = vsel %vm1583_vm6, %v4691_v37, 0.0 }
 0x272   : > { %v4706_v29 = vadd.f32 %v4631_v49, %v1963_v54 }
 0x273   : > { %2020 = vst.msk [vmem:[%s3081_s8 + $0xc0] sm:$0xff] %vm1583_vm6, %v4703_v35  ;;  %v1931_v13 = vpop.f32.mrf.mxu0 }
 0x274   : > { %2015 = vst.msk [vmem:[%s3081_s8 + $0x98] sm:$0xff] %vm1583_vm6, %v4706_v29  ;;  %v1932_v59 = vadd.f32 %v4631_v49, %v1931_v13 }
 0x276   : > { %2002 = vst.msk [vmem:[%s3081_s8 + $0x30] sm:$0xff] %vm1583_vm6, %v1932_v59  ;;  %v2108_v17 = vmul.f32 %v1932_v59, %v1932_v59  ;;  %v2040_v33 = vsel %vm1583_vm6, %v1932_v59, 0.0 }
 0x277   : > { %v2041_v51 = vadd.f32 %v2040_v33, %v2039_v8 }
 0x278   : > { %v1978_v5 = vpop.f32.mrf.mxu3  ;;  %v2145_v7 = vsel %vm1583_vm6, %v2108_v17, 0.0 }
 0x279   : > { %v4723_v34 = vadd.f32 %v4631_v49, %v1978_v5  ;;  %v2146_v26 = vadd.f32 %v2145_v7, %v2144_v48 }
 0x27a   : > { %v1946_v36 = vpop.f32.mrf.mxu1 }
 0x27b   : > { %2021 = vst.msk [vmem:[%s3081_s8 + $0xc8] sm:$0xff] %vm1583_vm6, %v4723_v34  ;;  %v1947_v46 = vadd.f32 %v4631_v49, %v1946_v36  ;;  %v1933_v50 = vpop.f32.mrf.mxu0 }
 0x27c   : > { %v1934_v40 = vadd.f32 %v4631_v49, %v1933_v50 }
 0x27d   : > { %2008 = vst.msk [vmem:[%s3081_s8 + $0x60] sm:$0xff] %vm1583_vm6, %v1947_v46  ;;  %v2114_v59 = vmul.f32 %v1947_v46, %v1947_v46  ;;  %v2052_v37 = vsel %vm1583_vm6, %v1947_v46, 0.0 }
 0x27e   : > { %2003 = vst.msk [vmem:[%s3081_s8 + $0x38] sm:$0xff] %vm1583_vm6, %v1934_v40  ;;  %v2042_v24 = vsel %vm1583_vm6, %v1934_v40, 0.0  ;;  %v2109_v42 = vmul.f32 %v1934_v40, %v1934_v40  ;;  %v2118_v40 = vmul.f32 %v4667_v0, %v4667_v0 }
 0x27f   : > { %v2043_v12 = vadd.f32 %v2042_v24, %v2041_v51  ;;  %v2157_v25 = vsel %vm1583_vm6, %v2114_v59, 0.0 }
 0x280   : > { %v2147_v10 = vsel %vm1583_vm6, %v2109_v42, 0.0  ;;  %v2060_v42 = vsel %vm1583_vm6, %v4667_v0, 0.0 }
 0x281   : > { %v2045_v60 = vadd.f32 %v2044_v28, %v2043_v12  ;;  %v2148_v61 = vadd.f32 %v2147_v10, %v2146_v26  ;;  %v2119_v26 = vmul.f32 %v4676_v62, %v4676_v62  ;;  %v2165_v10 = vsel %vm1583_vm6, %v2118_v40, 0.0 }
 0x282   : > { %v1948_v18 = vpop.f32.mrf.mxu1 }
 0x283   : > { %v2047_v63 = vadd.f32 %v2046_v1, %v2045_v60  ;;  %v2150_v53 = vadd.f32 %v2149_v58, %v2148_v61  ;;  %v1949_v14 = vadd.f32 %v4631_v49, %v1948_v18  ;;  %v2062_v60 = vsel %vm1583_vm6, %v4676_v62, 0.0 }
 0x284   : > { %v2120_v61 = vmul.f32 %v4697_v19, %v4697_v19 }
 0x285   : > { %v2152_v47 = vadd.f32 %v2151_v38, %v2150_v53  ;;  %2009 = vst.msk [vmem:[%s3081_s8 + $0x68] sm:$0xff] %vm1583_vm6, %v1949_v14  ;;  %v2049_v23 = vadd.f32 %v2048_v21, %v2047_v63  ;;  %v2115_v55 = vmul.f32 %v1949_v14, %v1949_v14  ;;  %v2054_v27 = vsel %vm1583_vm6, %v1949_v14, 0.0 }
 0x286   : > { %v2167_v63 = vsel %vm1583_vm6, %v2119_v26, 0.0  ;;  %v2064_v53 = vsel %vm1583_vm6, %v4697_v19, 0.0  ;;  %v2121_v14 = vmul.f32 %v4706_v29, %v4706_v29  ;;  %v2169_v62 = vsel %vm1583_vm6, %v2120_v61, 0.0 }
 0x287   : > { %v2154_v31 = vadd.f32 %v2153_v41, %v2152_v47  ;;  %v2051_v13 = vadd.f32 %v2050_v9, %v2049_v23  ;;  %v2159_v30 = vsel %vm1583_vm6, %v2115_v55, 0.0 }
 0x288   : > { %v2171_v41 = vsel %vm1583_vm6, %v2121_v14, 0.0 }
 0x289   : > { %v1966_v4 = vpop.f32.mrf.mxu2  ;;  %v2156_v32 = vadd.f32 %v2155_v6, %v2154_v31  ;;  %v2053_v22 = vadd.f32 %v2052_v37, %v2051_v13 }
 0x28a   : > { %v4753_v57 = vadd.f32 %v4631_v49, %v1966_v4  ;;  %v2066_v4 = vsel %vm1583_vm6, %v4706_v29, 0.0 }
 0x28b   : > { %v2158_v17 = vadd.f32 %v2157_v25, %v2156_v32  ;;  %v2055_v33 = vadd.f32 %v2054_v27, %v2053_v22 }
 0x28c   : > { %2016 = vst.msk [vmem:[%s3081_s8 + $0xa0] sm:$0xff] %vm1583_vm6, %v4753_v57  ;;  %v2122_v45 = vmul.f32 %v4753_v57, %v4753_v57  ;;  %v2068_v19 = vsel %vm1583_vm6, %v4753_v57, 0.0 }
 0x28d   : > { %v2160_v50 = vadd.f32 %v2159_v30, %v2158_v17 }
 0x28e   : > { %v2173_v29 = vsel %vm1583_vm6, %v2122_v45, 0.0 }
 0x290   : > { %v1981_v20 = vpop.f32.mrf.mxu3 }
 0x291   : > { %v4768_v54 = vadd.f32 %v4631_v49, %v1981_v20  ;;  %v1968_v16 = vpop.f32.mrf.mxu2 }
 0x292   : > { %v4771_v43 = vadd.f32 %v4631_v49, %v1968_v16  ;;  %v1951_v39 = vpop.f32.mrf.mxu1 }
 0x293   : > { %2022 = vst.msk [vmem:[%s3081_s8 + $0xd0] sm:$0xff] %vm1583_vm6, %v4768_v54  ;;  %v1952_v11 = vadd.f32 %v4631_v49, %v1951_v39  ;;  %v2128_v40 = vmul.f32 %v4768_v54, %v4768_v54 }
 0x294   : > { %2017 = vst.msk [vmem:[%s3081_s8 + $0xa8] sm:$0xff] %vm1583_vm6, %v4771_v43  ;;  %v2123_v56 = vmul.f32 %v4771_v43, %v4771_v43  ;;  %v2070_v16 = vsel %vm1583_vm6, %v4771_v43, 0.0  ;;  %v2126_v43 = vmul.f32 %v4703_v35, %v4703_v35 }
 0x295   : > { %2010 = vst.msk [vmem:[%s3081_s8 + $0x70] sm:$0xff] %vm1583_vm6, %v1952_v11  ;;  %v2116_v52 = vmul.f32 %v1952_v11, %v1952_v11  ;;  %v2056_v44 = vsel %vm1583_vm6, %v1952_v11, 0.0 }
 0x296   : > { %v2057_v7 = vadd.f32 %v2056_v44, %v2055_v33  ;;  %v2175_v32 = vsel %vm1583_vm6, %v2123_v56, 0.0  ;;  %v2076_v44 = vsel %vm1583_vm6, %v4703_v35, 0.0  ;;  %v2127_v33 = vmul.f32 %v4723_v34, %v4723_v34 }
 0x297   : > { %v2161_v8 = vsel %vm1583_vm6, %v2116_v52, 0.0 }
 0x298   : > { %v1983_v5 = vpop.f32.mrf.mxu3  ;;  %v2162_v2 = vadd.f32 %v2161_v8, %v2160_v50  ;;  %v2181_v50 = vsel %vm1583_vm6, %v2126_v43, 0.0  ;;  %v2101_v43 = vld [vmem:[%s4902_s7] sm:$0x1] }
 0x299   : > { %v4788_v15 = vadd.f32 %v4631_v49, %v1983_v5 }
 0x29a   : > { %v1953_v36 = vpop.f32.mrf.mxu1 }
 0x29b   : > { %2023 = vst.msk [vmem:[%s3081_s8 + $0xd8] sm:$0xff] %vm1583_vm6, %v4788_v15  ;;  %v1954_v46 = vadd.f32 %v4631_v49, %v1953_v36 }
 0x29d   : > { %2011 = vst.msk [vmem:[%s3081_s8 + $0x78] sm:$0xff] %vm1583_vm6, %v1954_v46  ;;  %v2058_v48 = vsel %vm1583_vm6, %v1954_v46, 0.0  ;;  %v2117_v51 = vmul.f32 %v1954_v46, %v1954_v46 }
 0x29e   : > { %v2059_v24 = vadd.f32 %v2058_v48, %v2057_v7  ;;  %v2078_v7 = vsel %vm1583_vm6, %v4723_v34, 0.0 }
 0x29f   : > { %v2163_v12 = vsel %vm1583_vm6, %v2117_v51, 0.0 }
 0x2a0   : > { %v2061_v28 = vadd.f32 %v2060_v42, %v2059_v24  ;;  %v2164_v3 = vadd.f32 %v2163_v12, %v2162_v2  ;;  %v2183_v2 = vsel %vm1583_vm6, %v2127_v33, 0.0  ;;  %v2080_v24 = vsel %vm1583_vm6, %v4768_v54, 0.0 }
 0x2a1   : > { %v1971_v58 = vpop.f32.mrf.mxu2  ;;  %v2129_v42 = vmul.f32 %v4788_v15, %v4788_v15  ;;  %v2185_v12 = vsel %vm1583_vm6, %v2128_v40, 0.0 }
 0x2a2   : > { %v2063_v1 = vadd.f32 %v2062_v60, %v2061_v28  ;;  %v2166_v18 = vadd.f32 %v2165_v10, %v2164_v3  ;;  %v1972_v0 = vadd.f32 %v4631_v49, %v1971_v58  ;;  %v2082_v28 = vsel %vm1583_vm6, %v4788_v15, 0.0 }
 0x2a3   : > { %v2187_v60 = vsel %vm1583_vm6, %v2129_v42, 0.0 }
 0x2a4   : > { %v2065_v38 = vadd.f32 %v2064_v53, %v2063_v1  ;;  %v2168_v47 = vadd.f32 %v2167_v63, %v2166_v18  ;;  %2018 = vst.msk [vmem:[%s3081_s8 + $0xb0] sm:$0xff] %vm1583_vm6, %v1972_v0  ;;  %v2124_v13 = vmul.f32 %v1972_v0, %v1972_v0  ;;  %v2072_v37 = vsel %vm1583_vm6, %v1972_v0, 0.0 }
 0x2a6   : > { %v2170_v21 = vadd.f32 %v2169_v62, %v2168_v47  ;;  %v2067_v23 = vadd.f32 %v2066_v4, %v2065_v38  ;;  %v2177_v52 = vsel %vm1583_vm6, %v2124_v13, 0.0 }
 0x2a8   : > { %v2069_v31 = vadd.f32 %v2068_v19, %v2067_v23  ;;  %v2172_v20 = vadd.f32 %v2171_v41, %v2170_v21  ;;  %v1986_v9 = vpop.f32.mrf.mxu3 }
 0x2a9   : > { %v1987_v39 = vadd.f32 %v4631_v49, %v1986_v9  ;;  %v1973_v6 = vpop.f32.mrf.mxu2 }
 0x2aa   : > { %v2071_v59 = vadd.f32 %v2070_v16, %v2069_v31  ;;  %v2174_v11 = vadd.f32 %v2173_v29, %v2172_v20  ;;  %v1974_v57 = vadd.f32 %v4631_v49, %v1973_v6 }
 0x2ab   : > { %2024 = vst.msk [vmem:[%s3081_s8 + $0xe0] sm:$0xff] %vm1583_vm6, %v1987_v39  ;;  %v2130_v61 = vmul.f32 %v1987_v39, %v1987_v39  ;;  %v2084_v1 = vsel %vm1583_vm6, %v1987_v39, 0.0 }
 0x2ac   : > { %v2073_v22 = vadd.f32 %v2072_v37, %v2071_v59  ;;  %v2176_v25 = vadd.f32 %v2175_v32, %v2174_v11  ;;  %2019 = vst.msk [vmem:[%s3081_s8 + $0xb8] sm:$0xff] %vm1583_vm6, %v1974_v57  ;;  %v2125_v55 = vmul.f32 %v1974_v57, %v1974_v57  ;;  %v2074_v17 = vsel %vm1583_vm6, %v1974_v57, 0.0 }
 0x2ad   : > { %v2189_v63 = vsel %vm1583_vm6, %v2130_v61, 0.0 }
 0x2ae   : > { %v2178_v5 = vadd.f32 %v2177_v52, %v2176_v25  ;;  %v2075_v27 = vadd.f32 %v2074_v17, %v2073_v22  ;;  %v2179_v36 = vsel %vm1583_vm6, %v2125_v55, 0.0  ;;  %v2028_v22 = vld [vmem:[%s4901_s6] sm:$0x1] }
 0x2b0   : > { %v2077_v30 = vadd.f32 %v2076_v44, %v2075_v27  ;;  %v2180_v8 = vadd.f32 %v2179_v36, %v2178_v5  ;;  %v1988_v46 = vpop.f32.mrf.mxu3 }
 0x2b1   : > { %v1989_v48 = vadd.f32 %v4631_v49, %v1988_v46 }
 0x2b2   : > { %v2079_v51 = vadd.f32 %v2078_v7, %v2077_v30  ;;  %v2182_v35 = vadd.f32 %v2181_v50, %v2180_v8 }
 0x2b3   : > { %2025 = vst.msk [vmem:[%s3081_s8 + $0xe8] sm:$0xff] %vm1583_vm6, %v1989_v48  ;;  %v2131_v53 = vmul.f32 %v1989_v48, %v1989_v48  ;;  %v2086_v15 = vsel %vm1583_vm6, %v1989_v48, 0.0 }
 0x2b4   : > { %v2184_v26 = vadd.f32 %v2183_v2, %v2182_v35  ;;  %v2081_v34 = vadd.f32 %v2080_v24, %v2079_v51 }
 0x2b5   : > { %v2191_v62 = vsel %vm1583_vm6, %v2131_v53, 0.0 }
 0x2b6   : > { %v2083_v3 = vadd.f32 %v2082_v28, %v2081_v34  ;;  %v2186_v10 = vadd.f32 %v2185_v12, %v2184_v26 }
 0x2b8   : > { %v2188_v58 = vadd.f32 %v2187_v60, %v2186_v10  ;;  %v1991_v54 = vpop.f32.mrf.mxu3  ;;  %v2085_v0 = vadd.f32 %v2084_v1, %v2083_v3 }
 0x2b9   : > { %v1992_v18 = vadd.f32 %v4631_v49, %v1991_v54 }
 0x2ba   : > { %v2190_v14 = vadd.f32 %v2189_v63, %v2188_v58  ;;  %v2087_v47 = vadd.f32 %v2086_v15, %v2085_v0 }
 0x2bb   : > { %2026 = vst.msk [vmem:[%s3081_s8 + $0xf0] sm:$0xff] %vm1583_vm6, %v1992_v18  ;;  %v2132_v38 = vmul.f32 %v1992_v18, %v1992_v18  ;;  %v2088_v4 = vsel %vm1583_vm6, %v1992_v18, 0.0 }
 0x2bc   : > { %v2192_v45 = vadd.f32 %v2191_v62, %v2190_v14  ;;  %v2089_v19 = vadd.f32 %v2088_v4, %v2087_v47 }
 0x2bd   : > { %v2193_v23 = vsel %vm1583_vm6, %v2132_v38, 0.0 }
 0x2be   : > { %v2194_v20 = vadd.f32 %v2193_v23, %v2192_v45 }
 0x2c0   : > { %v1993_v21 = vpop.f32.mrf.mxu3 }
 0x2c1   : > { %v1994_v41 = vadd.f32 %v4631_v49, %v1993_v21 }
 0x2c3   : > { %2027 = vst.msk [vmem:[%s3081_s8 + $0xf8] sm:$0xff] %vm1583_vm6, %v1994_v41  ;;  %v2090_v56 = vsel %vm1583_vm6, %v1994_v41, 0.0  ;;  %v2133_v31 = vmul.f32 %v1994_v41, %v1994_v41 }
 0x2c4   : > { %v2091_v9 = vadd.f32 %v2090_v56, %v2089_v19 }
 0x2c5   : > { %v2195_v29 = vsel %vm1583_vm6, %v2133_v31, 0.0 }
 0x2c6   : > { %v2092_v16 = vrot.slane %v2091_v9, 4  ;;  %v2196_v13 = vadd.f32 %v2195_v29, %v2194_v20 }
 0x2c8   : > { %v2093_v39 = vadd.f32 %v2092_v16, %v2091_v9  ;;  %v2197_v6 = vrot.slane %v2196_v13, 4 }
 0x2ca   : > { %v2094_v59 = vrot.slane %v2093_v39, 2  ;;  %v2198_v11 = vadd.f32 %v2197_v6, %v2196_v13 }
 0x2cc   : > { %v2095_v57 = vadd.f32 %v2094_v59, %v2093_v39  ;;  %v2199_v32 = vrot.slane %v2198_v11, 2 }
 0x2ce   : > { %v2096_v37 = vrot.slane %v2095_v57, 1  ;;  %v2200_v49 = vadd.f32 %v2199_v32, %v2198_v11 }
 0x2d0   : > { %v2097_v25 = vadd.f32 %v2096_v37, %v2095_v57  ;;  %v2201_v55 = vrot.slane %v2200_v49, 1 }
 0x2d2   : > { %v2098_v52 = vadd.f32 %v2097_v25, %v2028_v22  ;;  %v2202_v17 = vadd.f32 %v2201_v55, %v2200_v49 }
 0x2d4   : > { %2100 = vst.msk [vmem:[%s4901_s6] sm:$0x1] %vm2099_vm15, %v2098_v52  ;;  %v2203_v5 = vadd.f32 %v2202_v17, %v2101_v43 }
 0x2d6   : > { %2204 = vst.msk [vmem:[%s4902_s7] sm:$0x1] %vm2099_vm15, %v2203_v5 }
 0x2d7 PF: > { %s18_s24 = sadd.s32 1, %s3014_s24  }
 0x2d8   : > { %p15_p5 = scmp.ge.s32.totalorder %s18_s24, 4  }
 0x2da   :  { %17 = sbr.rel (!%p15_p5) target bundleno = 1 (0x1), region = 91 }

</bundles_post_ra>
